<compile_context>
chip_gen: v6e
topology: v6e:2x2x1
jax: 0.10.0
libtpu: 0.0.40
codegen_flags: <defaults>
</compile_context>

<pallas_src>
import jax
import jax.numpy as jnp
from jax.experimental import pallas as pl
from jax.experimental.pallas import tpu as pltpu

EPS = 1e-5


def _resnet_block_kernel(x_ref, w1_ref, w2_ref, o_ref):
    # x_ref : (1, H, W, C)  bf16 input tile for one batch element (NHWC)
    # w*_ref: (9, C, C)     bf16 conv weights, (kh*3+kw, cin, cout)
    # o_ref : (1, H, W, C)  bf16 output tile
    x = x_ref[0]                      # (H, W, C)
    H, W, C = x.shape
    HW = H * W

    # Masks for the W-edge reflection fix-up (built once, shared by both convs).
    w_pos = jax.lax.broadcasted_iota(jnp.int32, (HW, 1), 0) % W
    w_first = w_pos == 0
    w_last = w_pos == W - 1

    def conv3x3(flat, w_ref):
        # flat: (H*W, C) bf16, row-major (h, w). Reflect-pad in H only (aligned row concat);
        # kw = -1/+1 taps come from +/-1 rolls of the whole slab + a one-column edge select.
        tp = jnp.concatenate(
            [flat[W:2 * W], flat, flat[(H - 2) * W:(H - 1) * W]], axis=0)   # ((H+2)*W, C)
        prev = jnp.roll(tp, 1, axis=0)      # prev[i] = tp[i-1]  -> x[.., w-1] away from edges
        nxt = jnp.roll(tp, -1, axis=0)      # nxt[i]  = tp[i+1]  -> x[.., w+1] away from edges
        acc = None
        for kh in range(3):
            lo = kh * W                      # multiple of 8 when W % 8 == 0 -> aligned slices
            c_tap = tp[lo:lo + HW]
            p_tap = prev[lo:lo + HW]
            n_tap = nxt[lo:lo + HW]
            taps = (
                jnp.where(w_first, n_tap, p_tap),   # kw=0: x[w-1], reflect at w=0   -> x[1]
                c_tap,                              # kw=1: x[w]
                jnp.where(w_last, p_tap, n_tap),    # kw=2: x[w+1], reflect at w=W-1 -> x[W-2]
            )
            for kw in range(3):
                part = jnp.dot(taps[kw], w_ref[3 * kh + kw],
                               preferred_element_type=jnp.float32)
                acc = part if acc is None else acc + part
        return acc                           # (H*W, C) f32

    def in_stats(y):
        # One-pass per-channel stats over space, f32.
        inv_n = 1.0 / float(y.shape[0])
        mean = jnp.sum(y, axis=0, keepdims=True) * inv_n
        var = jnp.maximum(jnp.sum(y * y, axis=0, keepdims=True) * inv_n - mean * mean, 0.0)
        return mean, jax.lax.rsqrt(var + EPS)

    xf = x.reshape(HW, C)

    # conv1 -> InstanceNorm -> ReLU   (bias omitted: cancelled exactly by the InstanceNorm)
    y1 = conv3x3(xf, w1_ref)
    m1, r1 = in_stats(y1)
    h = jnp.maximum((y1 - m1) * r1, 0.0).astype(x.dtype)    # bf16 for the second MXU pass

    # conv2 -> InstanceNorm, residual add fused into the normalize expression
    y2 = conv3x3(h, w2_ref)
    m2, r2 = in_stats(y2)
    out = xf.astype(jnp.float32) + (y2 - m2) * r2

    o_ref[0] = out.reshape(H, W, C).astype(o_ref.dtype)


def resnet_block(x_nchw, w1_oihw, b1, w2_oihw, b2, *, compute_dtype=jnp.bfloat16):
    """x_nchw: (N, C, H, W). Returns (N, C, H, W) in x_nchw.dtype.

    b1/b2 are accepted for API parity with the PyTorch module (use_bias=True) but are not used:
    a conv bias feeding directly into InstanceNorm(affine=False) has exactly zero effect.
    """
    N, C, H, W = x_nchw.shape
    assert H >= 2 and W >= 2, "ReflectionPad2d(1) requires H, W >= 2"
    in_dtype = x_nchw.dtype
    del b1, b2   # mathematically cancelled by the following InstanceNorm

    # NCHW -> NHWC, bf16 I/O
    x = jnp.transpose(x_nchw, (0, 2, 3, 1)).astype(compute_dtype)
    # OIHW -> (kh, kw, Cin, Cout) -> (9, Cin, Cout): matches tap order kh*3+kw in the kernel.
    w1 = jnp.transpose(w1_oihw, (2, 3, 1, 0)).reshape(9, C, C).astype(compute_dtype)
    w2 = jnp.transpose(w2_oihw, (2, 3, 1, 0)).reshape(9, C, C).astype(compute_dtype)

    # Generation-aware VMEM budget (~15% headroom vs. physical capacity).
    try:
        vmem_cap = int(pltpu.get_tpu_info().vmem_capacity_bytes)
    except Exception:
        vmem_cap = 64 * 1024 * 1024
    act = jnp.dtype(compute_dtype).itemsize
    hwc = H * W * C
    est = (4 * hwc * act                    # double-buffered in + out blocks
           + 4 * 9 * C * C * act            # two weight tensors, pipeline double-buffered
           + 3 * (H + 2) * W * C * act      # H-padded slab + its two rolled copies
           + 3 * hwc * act                  # shifted taps / bf16 intermediate h
           + 3 * hwc * 4)                   # f32 conv accumulator + norm/residual intermediates
    vmem_limit = int(min(max(2 * est, 16 * 1024 * 1024), int(0.85 * vmem_cap)))

    out_nhwc = pl.pallas_call(
        _resnet_block_kernel,
        out_shape=jax.ShapeDtypeStruct((N, H, W, C), compute_dtype),
        grid=(N,),
        in_specs=[
            pl.BlockSpec((1, H, W, C), lambda b: (b, 0, 0, 0)),
            pl.BlockSpec((9, C, C), lambda b: (0, 0, 0)),   # constant index_map: fetched once
            pl.BlockSpec((9, C, C), lambda b: (0, 0, 0)),
        ],
        out_specs=pl.BlockSpec((1, H, W, C), lambda b: (b, 0, 0, 0)),
        compiler_params=pltpu.CompilerParams(
            dimension_semantics=("parallel",),
            vmem_limit_bytes=vmem_limit,
        ),
    )(x, w1, w2)

    return jnp.transpose(out_nhwc, (0, 3, 1, 2)).astype(in_dtype)   # back to NCHW


def resnet_block_reference(x, w1, b1, w2, b2):
    """Pure-JAX f32 reference mirroring the PyTorch module (NCHW), biases included."""
    def conv(t, w, b):
        tp = jnp.pad(t, ((0, 0), (0, 0), (1, 1), (1, 1)), mode="reflect")
        y = jax.lax.conv_general_dilated(
            tp, w, window_strides=(1, 1), padding="VALID",
            dimension_numbers=("NCHW", "OIHW", "NCHW"))
        return y + b.reshape(1, -1, 1, 1)

    def inorm(y):
        m = jnp.mean(y, axis=(2, 3), keepdims=True)
        v = jnp.mean((y - m) ** 2, axis=(2, 3), keepdims=True)
        return (y - m) / jnp.sqrt(v + EPS)

    h = jax.nn.relu(inorm(conv(x, w1, b1)))
    z = inorm(conv(h, w2, b2))
    return x + z


if __name__ == "__main__":
    # Small shapes consistent with ResnetBlock(dim=C): batch=2, dim=4, spatial=16
    N, C, H, W = 2, 4, 16, 16
    key = jax.random.PRNGKey(0)
    kx, kw1, kb1, kw2, kb2 = jax.random.split(key, 5)

    x = jax.random.normal(kx, (N, C, H, W), dtype=jnp.float32)
    w1 = 0.1 * jax.random.normal(kw1, (C, C, 3, 3), dtype=jnp.float32)  # OIHW
    b1 = 0.1 * jax.random.normal(kb1, (C,), dtype=jnp.float32)
    w2 = 0.1 * jax.random.normal(kw2, (C, C, 3, 3), dtype=jnp.float32)
    b2 = 0.1 * jax.random.normal(kb2, (C,), dtype=jnp.float32)

    out = jax.block_until_ready(resnet_block(x, w1, b1, w2, b2))
    ref = jax.block_until_ready(resnet_block_reference(x, w1, b1, w2, b2))

    assert out.shape == (N, C, H, W)
    # bf16 I/O + bf16 matmuls (f32 accumulation / stats): allow bf16-level tolerance vs f32 ref.
    assert jnp.allclose(out, ref, rtol=5e-2, atol=5e-2), "mismatch vs reference"
    print("KERNEL_OK")
</pallas_src>

<mosaic_0001>
module attributes {stable_mosaic.version = 11 : i64} {
  func.func @_resnet_block_kernel(%arg0: i32, %arg1: memref<1x16x16x4xbf16, #tpu.memory_space<vmem>>, %arg2: memref<9x4x4xbf16, #tpu.memory_space<vmem>>, %arg3: memref<9x4x4xbf16, #tpu.memory_space<vmem>>, %arg4: memref<1x16x16x4xbf16, #tpu.memory_space<vmem>>) attributes {dimension_semantics = [#tpu.dimension_semantics<parallel>], iteration_bounds = array<i64: 2>, scalar_prefetch = 0 : i64, scratch_operands = 0 : i64, tpu.core_type = #tpu.core_type<tc>, window_params = [{transform_indices = @transform_0, window_bounds = array<i64: 1, 16, 16, 4>}, {pipeline_mode = #tpu.pipeline_mode<synchronous>, transform_indices = @transform_1, window_bounds = array<i64: 9, 4, 4>}, {pipeline_mode = #tpu.pipeline_mode<synchronous>, transform_indices = @transform_2, window_bounds = array<i64: 9, 4, 4>}, {transform_indices = @transform_3, window_bounds = array<i64: 1, 16, 16, 4>}]} {
    %c0 = arith.constant 0 : index
    %c0_0 = arith.constant 0 : index
    %c0_1 = arith.constant 0 : index
    %c0_2 = arith.constant 0 : index
    %0 = vector.load %arg1[%c0, %c0_0, %c0_1, %c0_2] : memref<1x16x16x4xbf16, #tpu.memory_space<vmem>>, vector<1x16x16x4xbf16>
    %1 = vector.shape_cast %0 : vector<1x16x16x4xbf16> to vector<16x16x4xbf16>
    %2 = tpu.iota {dimensions = array<i32: 0>} : vector<256x1xi32>
    %c16_i32 = arith.constant 16 : i32
    %c0_i32 = arith.constant 0 : i32
    %3 = arith.cmpi eq, %c16_i32, %c0_i32 : i32
    %c1_i32 = arith.constant 1 : i32
    %4 = arith.select %3, %c1_i32, %c16_i32 : i32
    %5 = vector.broadcast %4 : i32 to vector<256x1xi32>
    %6 = arith.remsi %2, %5 : vector<256x1xi32>
    %c0_i32_3 = arith.constant 0 : i32
    %7 = vector.broadcast %c0_i32_3 : i32 to vector<256x1xi32>
    %8 = arith.cmpi ne, %6, %7 : vector<256x1xi32>
    %c0_i32_4 = arith.constant 0 : i32
    %9 = vector.broadcast %c0_i32_4 : i32 to vector<256x1xi32>
    %10 = arith.cmpi slt, %6, %9 : vector<256x1xi32>
    %c0_i32_5 = arith.constant 0 : i32
    %11 = arith.cmpi slt, %4, %c0_i32_5 : i32
    %12 = vector.broadcast %11 : i1 to vector<256x1xi1>
    %13 = vector.broadcast %12 : vector<256x1xi1> to vector<256x1xi1>
    %14 = arith.xori %10, %13 : vector<256x1xi1>
    %15 = arith.andi %14, %8 : vector<256x1xi1>
    %16 = vector.broadcast %4 : i32 to vector<256x1xi32>
    %17 = arith.addi %6, %16 : vector<256x1xi32>
    %18 = arith.select %15, %17, %6 : vector<256x1xi1>, vector<256x1xi32>
    %c0_i32_6 = arith.constant 0 : i32
    %19 = vector.broadcast %c0_i32_6 : i32 to vector<256x1xi32>
    %20 = arith.cmpi eq, %18, %19 : vector<256x1xi32>
    %c15_i32 = arith.constant 15 : i32
    %21 = vector.broadcast %c15_i32 : i32 to vector<256x1xi32>
    %22 = arith.cmpi eq, %18, %21 : vector<256x1xi32>
    %23 = vector.shape_cast %1 : vector<16x16x4xbf16> to vector<256x4xbf16>
    %24 = vector.extract_strided_slice %23 {offsets = [16, 0], sizes = [16, 4], strides = [1, 1]} : vector<256x4xbf16> to vector<16x4xbf16>
    %25 = vector.extract_strided_slice %23 {offsets = [224, 0], sizes = [16, 4], strides = [1, 1]} : vector<256x4xbf16> to vector<16x4xbf16>
    %26 = tpu.concatenate %24, %23, %25 in 0 : vector<16x4xbf16>, vector<256x4xbf16>, vector<16x4xbf16> -> vector<288x4xbf16>
    %27 = vector.extract_strided_slice %26 {offsets = [287, 0], sizes = [1, 4], strides = [1, 1]} : vector<288x4xbf16> to vector<1x4xbf16>
    %28 = vector.extract_strided_slice %26 {offsets = [0, 0], sizes = [287, 4], strides = [1, 1]} : vector<288x4xbf16> to vector<287x4xbf16>
    %29 = tpu.concatenate %27, %28 in 0 : vector<1x4xbf16>, vector<287x4xbf16> -> vector<288x4xbf16>
    %30 = vector.extract_strided_slice %26 {offsets = [1, 0], sizes = [287, 4], strides = [1, 1]} : vector<288x4xbf16> to vector<287x4xbf16>
    %31 = vector.extract_strided_slice %26 {offsets = [0, 0], sizes = [1, 4], strides = [1, 1]} : vector<288x4xbf16> to vector<1x4xbf16>
    %32 = tpu.concatenate %30, %31 in 0 : vector<287x4xbf16>, vector<1x4xbf16> -> vector<288x4xbf16>
    %33 = vector.extract_strided_slice %26 {offsets = [0, 0], sizes = [256, 4], strides = [1, 1]} : vector<288x4xbf16> to vector<256x4xbf16>
    %34 = vector.extract_strided_slice %29 {offsets = [0, 0], sizes = [256, 4], strides = [1, 1]} : vector<288x4xbf16> to vector<256x4xbf16>
    %35 = vector.extract_strided_slice %32 {offsets = [0, 0], sizes = [256, 4], strides = [1, 1]} : vector<288x4xbf16> to vector<256x4xbf16>
    %36 = vector.shape_cast %20 : vector<256x1xi1> to vector<256x1xi1>
    %37 = vector.broadcast %36 : vector<256x1xi1> to vector<256x4xi1>
    %38 = arith.select %37, %35, %34 : vector<256x4xi1>, vector<256x4xbf16>
    %39 = vector.shape_cast %22 : vector<256x1xi1> to vector<256x1xi1>
    %40 = vector.broadcast %39 : vector<256x1xi1> to vector<256x4xi1>
    %41 = arith.select %40, %34, %35 : vector<256x4xi1>, vector<256x4xbf16>
    %c0_7 = arith.constant 0 : index
    %c0_8 = arith.constant 0 : index
    %c0_9 = arith.constant 0 : index
    %42 = vector.load %arg2[%c0_7, %c0_8, %c0_9] : memref<9x4x4xbf16, #tpu.memory_space<vmem>>, vector<1x4x4xbf16>
    %43 = vector.shape_cast %42 : vector<1x4x4xbf16> to vector<4x4xbf16>
    %cst = arith.constant dense<0.000000e+00> : vector<256x4xf32>
    %44 = tpu.matmul %38, %43, %cst {dimension_numbers = #tpu.dot_dimension_numbers<[1], [0], [0], [1], [0, 0, 1, 1], [], []>} : vector<256x4xbf16>, vector<4x4xbf16>, vector<256x4xf32> -> vector<256x4xf32>
    %c1 = arith.constant 1 : index
    %c0_10 = arith.constant 0 : index
    %c0_11 = arith.constant 0 : index
    %45 = vector.load %arg2[%c1, %c0_10, %c0_11] : memref<9x4x4xbf16, #tpu.memory_space<vmem>>, vector<1x4x4xbf16>
    %46 = vector.shape_cast %45 : vector<1x4x4xbf16> to vector<4x4xbf16>
    %cst_12 = arith.constant dense<0.000000e+00> : vector<256x4xf32>
    %47 = tpu.matmul %33, %46, %cst_12 {dimension_numbers = #tpu.dot_dimension_numbers<[1], [0], [0], [1], [0, 0, 1, 1], [], []>} : vector<256x4xbf16>, vector<4x4xbf16>, vector<256x4xf32> -> vector<256x4xf32>
    %48 = arith.addf %44, %47 : vector<256x4xf32>
    %c2 = arith.constant 2 : index
    %c0_13 = arith.constant 0 : index
    %c0_14 = arith.constant 0 : index
    %49 = vector.load %arg2[%c2, %c0_13, %c0_14] : memref<9x4x4xbf16, #tpu.memory_space<vmem>>, vector<1x4x4xbf16>
    %50 = vector.shape_cast %49 : vector<1x4x4xbf16> to vector<4x4xbf16>
    %cst_15 = arith.constant dense<0.000000e+00> : vector<256x4xf32>
    %51 = tpu.matmul %41, %50, %cst_15 {dimension_numbers = #tpu.dot_dimension_numbers<[1], [0], [0], [1], [0, 0, 1, 1], [], []>} : vector<256x4xbf16>, vector<4x4xbf16>, vector<256x4xf32> -> vector<256x4xf32>
    %52 = arith.addf %48, %51 : vector<256x4xf32>
    %53 = vector.extract_strided_slice %26 {offsets = [16, 0], sizes = [256, 4], strides = [1, 1]} : vector<288x4xbf16> to vector<256x4xbf16>
    %54 = vector.extract_strided_slice %29 {offsets = [16, 0], sizes = [256, 4], strides = [1, 1]} : vector<288x4xbf16> to vector<256x4xbf16>
    %55 = vector.extract_strided_slice %32 {offsets = [16, 0], sizes = [256, 4], strides = [1, 1]} : vector<288x4xbf16> to vector<256x4xbf16>
    %56 = vector.shape_cast %20 : vector<256x1xi1> to vector<256x1xi1>
    %57 = vector.broadcast %56 : vector<256x1xi1> to vector<256x4xi1>
    %58 = arith.select %57, %55, %54 : vector<256x4xi1>, vector<256x4xbf16>
    %59 = vector.shape_cast %22 : vector<256x1xi1> to vector<256x1xi1>
    %60 = vector.broadcast %59 : vector<256x1xi1> to vector<256x4xi1>
    %61 = arith.select %60, %54, %55 : vector<256x4xi1>, vector<256x4xbf16>
    %c3 = arith.constant 3 : index
    %c0_16 = arith.constant 0 : index
    %c0_17 = arith.constant 0 : index
    %62 = vector.load %arg2[%c3, %c0_16, %c0_17] : memref<9x4x4xbf16, #tpu.memory_space<vmem>>, vector<1x4x4xbf16>
    %63 = vector.shape_cast %62 : vector<1x4x4xbf16> to vector<4x4xbf16>
    %cst_18 = arith.constant dense<0.000000e+00> : vector<256x4xf32>
    %64 = tpu.matmul %58, %63, %cst_18 {dimension_numbers = #tpu.dot_dimension_numbers<[1], [0], [0], [1], [0, 0, 1, 1], [], []>} : vector<256x4xbf16>, vector<4x4xbf16>, vector<256x4xf32> -> vector<256x4xf32>
    %65 = arith.addf %52, %64 : vector<256x4xf32>
    %c4 = arith.constant 4 : index
    %c0_19 = arith.constant 0 : index
    %c0_20 = arith.constant 0 : index
    %66 = vector.load %arg2[%c4, %c0_19, %c0_20] : memref<9x4x4xbf16, #tpu.memory_space<vmem>>, vector<1x4x4xbf16>
    %67 = vector.shape_cast %66 : vector<1x4x4xbf16> to vector<4x4xbf16>
    %cst_21 = arith.constant dense<0.000000e+00> : vector<256x4xf32>
    %68 = tpu.matmul %53, %67, %cst_21 {dimension_numbers = #tpu.dot_dimension_numbers<[1], [0], [0], [1], [0, 0, 1, 1], [], []>} : vector<256x4xbf16>, vector<4x4xbf16>, vector<256x4xf32> -> vector<256x4xf32>
    %69 = arith.addf %65, %68 : vector<256x4xf32>
    %c5 = arith.constant 5 : index
    %c0_22 = arith.constant 0 : index
    %c0_23 = arith.constant 0 : index
    %70 = vector.load %arg2[%c5, %c0_22, %c0_23] : memref<9x4x4xbf16, #tpu.memory_space<vmem>>, vector<1x4x4xbf16>
    %71 = vector.shape_cast %70 : vector<1x4x4xbf16> to vector<4x4xbf16>
    %cst_24 = arith.constant dense<0.000000e+00> : vector<256x4xf32>
    %72 = tpu.matmul %61, %71, %cst_24 {dimension_numbers = #tpu.dot_dimension_numbers<[1], [0], [0], [1], [0, 0, 1, 1], [], []>} : vector<256x4xbf16>, vector<4x4xbf16>, vector<256x4xf32> -> vector<256x4xf32>
    %73 = arith.addf %69, %72 : vector<256x4xf32>
    %74 = vector.extract_strided_slice %26 {offsets = [32, 0], sizes = [256, 4], strides = [1, 1]} : vector<288x4xbf16> to vector<256x4xbf16>
    %75 = vector.extract_strided_slice %29 {offsets = [32, 0], sizes = [256, 4], strides = [1, 1]} : vector<288x4xbf16> to vector<256x4xbf16>
    %76 = vector.extract_strided_slice %32 {offsets = [32, 0], sizes = [256, 4], strides = [1, 1]} : vector<288x4xbf16> to vector<256x4xbf16>
    %77 = vector.shape_cast %20 : vector<256x1xi1> to vector<256x1xi1>
    %78 = vector.broadcast %77 : vector<256x1xi1> to vector<256x4xi1>
    %79 = arith.select %78, %76, %75 : vector<256x4xi1>, vector<256x4xbf16>
    %80 = vector.shape_cast %22 : vector<256x1xi1> to vector<256x1xi1>
    %81 = vector.broadcast %80 : vector<256x1xi1> to vector<256x4xi1>
    %82 = arith.select %81, %75, %76 : vector<256x4xi1>, vector<256x4xbf16>
    %c6 = arith.constant 6 : index
    %c0_25 = arith.constant 0 : index
    %c0_26 = arith.constant 0 : index
    %83 = vector.load %arg2[%c6, %c0_25, %c0_26] : memref<9x4x4xbf16, #tpu.memory_space<vmem>>, vector<1x4x4xbf16>
    %84 = vector.shape_cast %83 : vector<1x4x4xbf16> to vector<4x4xbf16>
    %cst_27 = arith.constant dense<0.000000e+00> : vector<256x4xf32>
    %85 = tpu.matmul %79, %84, %cst_27 {dimension_numbers = #tpu.dot_dimension_numbers<[1], [0], [0], [1], [0, 0, 1, 1], [], []>} : vector<256x4xbf16>, vector<4x4xbf16>, vector<256x4xf32> -> vector<256x4xf32>
    %86 = arith.addf %73, %85 : vector<256x4xf32>
    %c7 = arith.constant 7 : index
    %c0_28 = arith.constant 0 : index
    %c0_29 = arith.constant 0 : index
    %87 = vector.load %arg2[%c7, %c0_28, %c0_29] : memref<9x4x4xbf16, #tpu.memory_space<vmem>>, vector<1x4x4xbf16>
    %88 = vector.shape_cast %87 : vector<1x4x4xbf16> to vector<4x4xbf16>
    %cst_30 = arith.constant dense<0.000000e+00> : vector<256x4xf32>
    %89 = tpu.matmul %74, %88, %cst_30 {dimension_numbers = #tpu.dot_dimension_numbers<[1], [0], [0], [1], [0, 0, 1, 1], [], []>} : vector<256x4xbf16>, vector<4x4xbf16>, vector<256x4xf32> -> vector<256x4xf32>
    %90 = arith.addf %86, %89 : vector<256x4xf32>
    %c8 = arith.constant 8 : index
    %c0_31 = arith.constant 0 : index
    %c0_32 = arith.constant 0 : index
    %91 = vector.load %arg2[%c8, %c0_31, %c0_32] : memref<9x4x4xbf16, #tpu.memory_space<vmem>>, vector<1x4x4xbf16>
    %92 = vector.shape_cast %91 : vector<1x4x4xbf16> to vector<4x4xbf16>
    %cst_33 = arith.constant dense<0.000000e+00> : vector<256x4xf32>
    %93 = tpu.matmul %82, %92, %cst_33 {dimension_numbers = #tpu.dot_dimension_numbers<[1], [0], [0], [1], [0, 0, 1, 1], [], []>} : vector<256x4xbf16>, vector<4x4xbf16>, vector<256x4xf32> -> vector<256x4xf32>
    %94 = arith.addf %90, %93 : vector<256x4xf32>
    %cst_34 = arith.constant dense<0.000000e+00> : vector<4xf32>
    %95 = vector.multi_reduction <add>, %94, %cst_34 [0] : vector<256x4xf32> to vector<4xf32>
    %96 = vector.shape_cast %95 : vector<4xf32> to vector<1x4xf32>
    %cst_35 = arith.constant 3.906250e-03 : f32
    %97 = vector.broadcast %cst_35 : f32 to vector<1x4xf32>
    %98 = arith.mulf %96, %97 : vector<1x4xf32>
    %99 = arith.mulf %94, %94 : vector<256x4xf32>
    %cst_36 = arith.constant dense<0.000000e+00> : vector<4xf32>
    %100 = vector.multi_reduction <add>, %99, %cst_36 [0] : vector<256x4xf32> to vector<4xf32>
    %101 = vector.shape_cast %100 : vector<4xf32> to vector<1x4xf32>
    %cst_37 = arith.constant 3.906250e-03 : f32
    %102 = vector.broadcast %cst_37 : f32 to vector<1x4xf32>
    %103 = arith.mulf %101, %102 : vector<1x4xf32>
    %104 = arith.mulf %98, %98 : vector<1x4xf32>
    %105 = arith.subf %103, %104 : vector<1x4xf32>
    %cst_38 = arith.constant 0.000000e+00 : f32
    %106 = vector.broadcast %cst_38 : f32 to vector<1x4xf32>
    %107 = arith.maximumf %105, %106 : vector<1x4xf32>
    %cst_39 = arith.constant 9.99999974E-6 : f32
    %108 = vector.broadcast %cst_39 : f32 to vector<1x4xf32>
    %109 = arith.addf %107, %108 : vector<1x4xf32>
    %110 = math.rsqrt %109 : vector<1x4xf32>
    %111 = vector.broadcast %98 : vector<1x4xf32> to vector<256x4xf32>
    %112 = arith.subf %94, %111 : vector<256x4xf32>
    %113 = vector.broadcast %110 : vector<1x4xf32> to vector<256x4xf32>
    %114 = arith.mulf %112, %113 : vector<256x4xf32>
    %cst_40 = arith.constant 0.000000e+00 : f32
    %115 = vector.broadcast %cst_40 : f32 to vector<256x4xf32>
    %116 = arith.maximumf %114, %115 : vector<256x4xf32>
    %117 = arith.truncf %116 : vector<256x4xf32> to vector<256x4xbf16>
    %118 = vector.extract_strided_slice %117 {offsets = [16, 0], sizes = [16, 4], strides = [1, 1]} : vector<256x4xbf16> to vector<16x4xbf16>
    %119 = vector.extract_strided_slice %117 {offsets = [224, 0], sizes = [16, 4], strides = [1, 1]} : vector<256x4xbf16> to vector<16x4xbf16>
    %120 = tpu.concatenate %118, %117, %119 in 0 : vector<16x4xbf16>, vector<256x4xbf16>, vector<16x4xbf16> -> vector<288x4xbf16>
    %121 = vector.extract_strided_slice %120 {offsets = [287, 0], sizes = [1, 4], strides = [1, 1]} : vector<288x4xbf16> to vector<1x4xbf16>
    %122 = vector.extract_strided_slice %120 {offsets = [0, 0], sizes = [287, 4], strides = [1, 1]} : vector<288x4xbf16> to vector<287x4xbf16>
    %123 = tpu.concatenate %121, %122 in 0 : vector<1x4xbf16>, vector<287x4xbf16> -> vector<288x4xbf16>
    %124 = vector.extract_strided_slice %120 {offsets = [1, 0], sizes = [287, 4], strides = [1, 1]} : vector<288x4xbf16> to vector<287x4xbf16>
    %125 = vector.extract_strided_slice %120 {offsets = [0, 0], sizes = [1, 4], strides = [1, 1]} : vector<288x4xbf16> to vector<1x4xbf16>
    %126 = tpu.concatenate %124, %125 in 0 : vector<287x4xbf16>, vector<1x4xbf16> -> vector<288x4xbf16>
    %127 = vector.extract_strided_slice %120 {offsets = [0, 0], sizes = [256, 4], strides = [1, 1]} : vector<288x4xbf16> to vector<256x4xbf16>
    %128 = vector.extract_strided_slice %123 {offsets = [0, 0], sizes = [256, 4], strides = [1, 1]} : vector<288x4xbf16> to vector<256x4xbf16>
    %129 = vector.extract_strided_slice %126 {offsets = [0, 0], sizes = [256, 4], strides = [1, 1]} : vector<288x4xbf16> to vector<256x4xbf16>
    %130 = vector.shape_cast %20 : vector<256x1xi1> to vector<256x1xi1>
    %131 = vector.broadcast %130 : vector<256x1xi1> to vector<256x4xi1>
    %132 = arith.select %131, %129, %128 : vector<256x4xi1>, vector<256x4xbf16>
    %133 = vector.shape_cast %22 : vector<256x1xi1> to vector<256x1xi1>
    %134 = vector.broadcast %133 : vector<256x1xi1> to vector<256x4xi1>
    %135 = arith.select %134, %128, %129 : vector<256x4xi1>, vector<256x4xbf16>
    %c0_41 = arith.constant 0 : index
    %c0_42 = arith.constant 0 : index
    %c0_43 = arith.constant 0 : index
    %136 = vector.load %arg3[%c0_41, %c0_42, %c0_43] : memref<9x4x4xbf16, #tpu.memory_space<vmem>>, vector<1x4x4xbf16>
    %137 = vector.shape_cast %136 : vector<1x4x4xbf16> to vector<4x4xbf16>
    %cst_44 = arith.constant dense<0.000000e+00> : vector<256x4xf32>
    %138 = tpu.matmul %132, %137, %cst_44 {dimension_numbers = #tpu.dot_dimension_numbers<[1], [0], [0], [1], [0, 0, 1, 1], [], []>} : vector<256x4xbf16>, vector<4x4xbf16>, vector<256x4xf32> -> vector<256x4xf32>
    %c1_45 = arith.constant 1 : index
    %c0_46 = arith.constant 0 : index
    %c0_47 = arith.constant 0 : index
    %139 = vector.load %arg3[%c1_45, %c0_46, %c0_47] : memref<9x4x4xbf16, #tpu.memory_space<vmem>>, vector<1x4x4xbf16>
    %140 = vector.shape_cast %139 : vector<1x4x4xbf16> to vector<4x4xbf16>
    %cst_48 = arith.constant dense<0.000000e+00> : vector<256x4xf32>
    %141 = tpu.matmul %127, %140, %cst_48 {dimension_numbers = #tpu.dot_dimension_numbers<[1], [0], [0], [1], [0, 0, 1, 1], [], []>} : vector<256x4xbf16>, vector<4x4xbf16>, vector<256x4xf32> -> vector<256x4xf32>
    %142 = arith.addf %138, %141 : vector<256x4xf32>
    %c2_49 = arith.constant 2 : index
    %c0_50 = arith.constant 0 : index
    %c0_51 = arith.constant 0 : index
    %143 = vector.load %arg3[%c2_49, %c0_50, %c0_51] : memref<9x4x4xbf16, #tpu.memory_space<vmem>>, vector<1x4x4xbf16>
    %144 = vector.shape_cast %143 : vector<1x4x4xbf16> to vector<4x4xbf16>
    %cst_52 = arith.constant dense<0.000000e+00> : vector<256x4xf32>
    %145 = tpu.matmul %135, %144, %cst_52 {dimension_numbers = #tpu.dot_dimension_numbers<[1], [0], [0], [1], [0, 0, 1, 1], [], []>} : vector<256x4xbf16>, vector<4x4xbf16>, vector<256x4xf32> -> vector<256x4xf32>
    %146 = arith.addf %142, %145 : vector<256x4xf32>
    %147 = vector.extract_strided_slice %120 {offsets = [16, 0], sizes = [256, 4], strides = [1, 1]} : vector<288x4xbf16> to vector<256x4xbf16>
    %148 = vector.extract_strided_slice %123 {offsets = [16, 0], sizes = [256, 4], strides = [1, 1]} : vector<288x4xbf16> to vector<256x4xbf16>
    %149 = vector.extract_strided_slice %126 {offsets = [16, 0], sizes = [256, 4], strides = [1, 1]} : vector<288x4xbf16> to vector<256x4xbf16>
    %150 = vector.shape_cast %20 : vector<256x1xi1> to vector<256x1xi1>
    %151 = vector.broadcast %150 : vector<256x1xi1> to vector<256x4xi1>
    %152 = arith.select %151, %149, %148 : vector<256x4xi1>, vector<256x4xbf16>
    %153 = vector.shape_cast %22 : vector<256x1xi1> to vector<256x1xi1>
    %154 = vector.broadcast %153 : vector<256x1xi1> to vector<256x4xi1>
    %155 = arith.select %154, %148, %149 : vector<256x4xi1>, vector<256x4xbf16>
    %c3_53 = arith.constant 3 : index
    %c0_54 = arith.constant 0 : index
    %c0_55 = arith.constant 0 : index
    %156 = vector.load %arg3[%c3_53, %c0_54, %c0_55] : memref<9x4x4xbf16, #tpu.memory_space<vmem>>, vector<1x4x4xbf16>
    %157 = vector.shape_cast %156 : vector<1x4x4xbf16> to vector<4x4xbf16>
    %cst_56 = arith.constant dense<0.000000e+00> : vector<256x4xf32>
    %158 = tpu.matmul %152, %157, %cst_56 {dimension_numbers = #tpu.dot_dimension_numbers<[1], [0], [0], [1], [0, 0, 1, 1], [], []>} : vector<256x4xbf16>, vector<4x4xbf16>, vector<256x4xf32> -> vector<256x4xf32>
    %159 = arith.addf %146, %158 : vector<256x4xf32>
    %c4_57 = arith.constant 4 : index
    %c0_58 = arith.constant 0 : index
    %c0_59 = arith.constant 0 : index
    %160 = vector.load %arg3[%c4_57, %c0_58, %c0_59] : memref<9x4x4xbf16, #tpu.memory_space<vmem>>, vector<1x4x4xbf16>
    %161 = vector.shape_cast %160 : vector<1x4x4xbf16> to vector<4x4xbf16>
    %cst_60 = arith.constant dense<0.000000e+00> : vector<256x4xf32>
    %162 = tpu.matmul %147, %161, %cst_60 {dimension_numbers = #tpu.dot_dimension_numbers<[1], [0], [0], [1], [0, 0, 1, 1], [], []>} : vector<256x4xbf16>, vector<4x4xbf16>, vector<256x4xf32> -> vector<256x4xf32>
    %163 = arith.addf %159, %162 : vector<256x4xf32>
    %c5_61 = arith.constant 5 : index
    %c0_62 = arith.constant 0 : index
    %c0_63 = arith.constant 0 : index
    %164 = vector.load %arg3[%c5_61, %c0_62, %c0_63] : memref<9x4x4xbf16, #tpu.memory_space<vmem>>, vector<1x4x4xbf16>
    %165 = vector.shape_cast %164 : vector<1x4x4xbf16> to vector<4x4xbf16>
    %cst_64 = arith.constant dense<0.000000e+00> : vector<256x4xf32>
    %166 = tpu.matmul %155, %165, %cst_64 {dimension_numbers = #tpu.dot_dimension_numbers<[1], [0], [0], [1], [0, 0, 1, 1], [], []>} : vector<256x4xbf16>, vector<4x4xbf16>, vector<256x4xf32> -> vector<256x4xf32>
    %167 = arith.addf %163, %166 : vector<256x4xf32>
    %168 = vector.extract_strided_slice %120 {offsets = [32, 0], sizes = [256, 4], strides = [1, 1]} : vector<288x4xbf16> to vector<256x4xbf16>
    %169 = vector.extract_strided_slice %123 {offsets = [32, 0], sizes = [256, 4], strides = [1, 1]} : vector<288x4xbf16> to vector<256x4xbf16>
    %170 = vector.extract_strided_slice %126 {offsets = [32, 0], sizes = [256, 4], strides = [1, 1]} : vector<288x4xbf16> to vector<256x4xbf16>
    %171 = vector.shape_cast %20 : vector<256x1xi1> to vector<256x1xi1>
    %172 = vector.broadcast %171 : vector<256x1xi1> to vector<256x4xi1>
    %173 = arith.select %172, %170, %169 : vector<256x4xi1>, vector<256x4xbf16>
    %174 = vector.shape_cast %22 : vector<256x1xi1> to vector<256x1xi1>
    %175 = vector.broadcast %174 : vector<256x1xi1> to vector<256x4xi1>
    %176 = arith.select %175, %169, %170 : vector<256x4xi1>, vector<256x4xbf16>
    %c6_65 = arith.constant 6 : index
    %c0_66 = arith.constant 0 : index
    %c0_67 = arith.constant 0 : index
    %177 = vector.load %arg3[%c6_65, %c0_66, %c0_67] : memref<9x4x4xbf16, #tpu.memory_space<vmem>>, vector<1x4x4xbf16>
    %178 = vector.shape_cast %177 : vector<1x4x4xbf16> to vector<4x4xbf16>
    %cst_68 = arith.constant dense<0.000000e+00> : vector<256x4xf32>
    %179 = tpu.matmul %173, %178, %cst_68 {dimension_numbers = #tpu.dot_dimension_numbers<[1], [0], [0], [1], [0, 0, 1, 1], [], []>} : vector<256x4xbf16>, vector<4x4xbf16>, vector<256x4xf32> -> vector<256x4xf32>
    %180 = arith.addf %167, %179 : vector<256x4xf32>
    %c7_69 = arith.constant 7 : index
    %c0_70 = arith.constant 0 : index
    %c0_71 = arith.constant 0 : index
    %181 = vector.load %arg3[%c7_69, %c0_70, %c0_71] : memref<9x4x4xbf16, #tpu.memory_space<vmem>>, vector<1x4x4xbf16>
    %182 = vector.shape_cast %181 : vector<1x4x4xbf16> to vector<4x4xbf16>
    %cst_72 = arith.constant dense<0.000000e+00> : vector<256x4xf32>
    %183 = tpu.matmul %168, %182, %cst_72 {dimension_numbers = #tpu.dot_dimension_numbers<[1], [0], [0], [1], [0, 0, 1, 1], [], []>} : vector<256x4xbf16>, vector<4x4xbf16>, vector<256x4xf32> -> vector<256x4xf32>
    %184 = arith.addf %180, %183 : vector<256x4xf32>
    %c8_73 = arith.constant 8 : index
    %c0_74 = arith.constant 0 : index
    %c0_75 = arith.constant 0 : index
    %185 = vector.load %arg3[%c8_73, %c0_74, %c0_75] : memref<9x4x4xbf16, #tpu.memory_space<vmem>>, vector<1x4x4xbf16>
    %186 = vector.shape_cast %185 : vector<1x4x4xbf16> to vector<4x4xbf16>
    %cst_76 = arith.constant dense<0.000000e+00> : vector<256x4xf32>
    %187 = tpu.matmul %176, %186, %cst_76 {dimension_numbers = #tpu.dot_dimension_numbers<[1], [0], [0], [1], [0, 0, 1, 1], [], []>} : vector<256x4xbf16>, vector<4x4xbf16>, vector<256x4xf32> -> vector<256x4xf32>
    %188 = arith.addf %184, %187 : vector<256x4xf32>
    %cst_77 = arith.constant dense<0.000000e+00> : vector<4xf32>
    %189 = vector.multi_reduction <add>, %188, %cst_77 [0] : vector<256x4xf32> to vector<4xf32>
    %190 = vector.shape_cast %189 : vector<4xf32> to vector<1x4xf32>
    %cst_78 = arith.constant 3.906250e-03 : f32
    %191 = vector.broadcast %cst_78 : f32 to vector<1x4xf32>
    %192 = arith.mulf %190, %191 : vector<1x4xf32>
    %193 = arith.mulf %188, %188 : vector<256x4xf32>
    %cst_79 = arith.constant dense<0.000000e+00> : vector<4xf32>
    %194 = vector.multi_reduction <add>, %193, %cst_79 [0] : vector<256x4xf32> to vector<4xf32>
    %195 = vector.shape_cast %194 : vector<4xf32> to vector<1x4xf32>
    %cst_80 = arith.constant 3.906250e-03 : f32
    %196 = vector.broadcast %cst_80 : f32 to vector<1x4xf32>
    %197 = arith.mulf %195, %196 : vector<1x4xf32>
    %198 = arith.mulf %192, %192 : vector<1x4xf32>
    %199 = arith.subf %197, %198 : vector<1x4xf32>
    %cst_81 = arith.constant 0.000000e+00 : f32
    %200 = vector.broadcast %cst_81 : f32 to vector<1x4xf32>
    %201 = arith.maximumf %199, %200 : vector<1x4xf32>
    %cst_82 = arith.constant 9.99999974E-6 : f32
    %202 = vector.broadcast %cst_82 : f32 to vector<1x4xf32>
    %203 = arith.addf %201, %202 : vector<1x4xf32>
    %204 = math.rsqrt %203 : vector<1x4xf32>
    %205 = arith.extf %23 : vector<256x4xbf16> to vector<256x4xf32>
    %206 = vector.broadcast %192 : vector<1x4xf32> to vector<256x4xf32>
    %207 = arith.subf %188, %206 : vector<256x4xf32>
    %208 = vector.broadcast %204 : vector<1x4xf32> to vector<256x4xf32>
    %209 = arith.mulf %207, %208 : vector<256x4xf32>
    %210 = arith.addf %205, %209 : vector<256x4xf32>
    %211 = vector.shape_cast %210 : vector<256x4xf32> to vector<16x16x4xf32>
    %212 = arith.truncf %211 : vector<16x16x4xf32> to vector<16x16x4xbf16>
    %c0_83 = arith.constant 0 : index
    %c0_84 = arith.constant 0 : index
    %c0_85 = arith.constant 0 : index
    %c0_86 = arith.constant 0 : index
    %213 = vector.load %arg4[%c0_83, %c0_84, %c0_85, %c0_86] : memref<1x16x16x4xbf16, #tpu.memory_space<vmem>>, vector<1x16x16x4xbf16>
    %214 = vector.shape_cast %213 : vector<1x16x16x4xbf16> to vector<16x16x4xbf16>
    %215 = vector.shape_cast %212 : vector<16x16x4xbf16> to vector<1x16x16x4xbf16>
    tpu.vector_store %arg4[%c0_83, %c0_84, %c0_85, %c0_86], %215 {strides = array<i32>} : memref<1x16x16x4xbf16, #tpu.memory_space<vmem>>, vector<1x16x16x4xbf16>,
    return
  }
  func.func @transform_0(%arg0: i32) -> (i32, i32, i32, i32) {
    %c0_i32 = arith.constant 0 : i32
    %c0_i32_0 = arith.constant 0 : i32
    %c0_i32_1 = arith.constant 0 : i32
    %c0_i32_2 = arith.constant 0 : i32
    return %arg0, %c0_i32, %c0_i32_0, %c0_i32_1 : i32, i32, i32, i32
  }
  func.func @transform_1(%arg0: i32) -> (i32, i32, i32) {
    %c0_i32 = arith.constant 0 : i32
    %c0_i32_0 = arith.constant 0 : i32
    %c0_i32_1 = arith.constant 0 : i32
    %c0_i32_2 = arith.constant 0 : i32
    return %c0_i32, %c0_i32_0, %c0_i32_1 : i32, i32, i32
  }
  func.func @transform_2(%arg0: i32) -> (i32, i32, i32) {
    %c0_i32 = arith.constant 0 : i32
    %c0_i32_0 = arith.constant 0 : i32
    %c0_i32_1 = arith.constant 0 : i32
    %c0_i32_2 = arith.constant 0 : i32
    return %c0_i32, %c0_i32_0, %c0_i32_1 : i32, i32, i32
  }
  func.func @transform_3(%arg0: i32) -> (i32, i32, i32, i32) {
    %c0_i32 = arith.constant 0 : i32
    %c0_i32_0 = arith.constant 0 : i32
    %c0_i32_1 = arith.constant 0 : i32
    %c0_i32_2 = arith.constant 0 : i32
    return %arg0, %c0_i32, %c0_i32_0, %c0_i32_1 : i32, i32, i32, i32
  }
}

</mosaic_0001>

<bundles_post_ra>
// kernel: tpu_custom_call.1
= control target key start
LH: loop header
LB: loop body
LE: loop exit
PB: predicated region body
PF: predicated region fallthrough
CT: control target
= control target key end

     0   :  { %s8128_s12 = smov 0   ;;  %s12422_s0 = inlined_call_operand.vmem [shape: bf16[2,16,16,4], index: 0, kind: input, shape index: {}]   ;;  %s12423_s1 = inlined_call_operand.vmem [shape: bf16[9,4,4], index: 1, kind: input, shape index: {}]   ;;  %s12424_s2 = inlined_call_operand.vmem [shape: bf16[9,4,4], index: 2, kind: input, shape index: {}]   ;;  %s12425_s3 = inlined_call_operand.vmem [shape: bf16[2,16,16,4], index: 3, kind: output, shape index: {}]  }
   0x1 LB: > { %s6671_s13 = sadd.s32 4294967295, %s8104_s12   ;;  %p6675_p0 = scmp.ge.s32.totalorder %s8104_s12, 1  ;;  %s8104_s12 = sphi %s8128_s12, %s13_s12  }
   0x2   : > { %p137_p1 = scmp.lt.s32.totalorder %s8104_s12, 3 }
   0x4   : > { %p138_p2 = pnand %p6675_p0, %p137_p1 }
   0x6   : > { %141 = sbr.rel (%p138_p2) target bundleno = 1210 (0x4ba), region = 32 }
   0xb   : > { %v6728_v0 = vld [vmem:[%s12423_s1 + $0x2] sm:$0x3]  ;;  %vm12427_vm0 = vcmask 1041408   ;;  %p161_p3 = scmp.lt.s32.totalorder %s6671_s13, 1  ;;  %v206_v1 = vlaneseq  ;;  %v6761_v3 = vld [vmem:[%s12423_s1 + $0x4] sm:$0x3] }
   0xc   : > { %8018 = vmatprep.subr.msk.bf16.mxu0 %vm12427_vm0, %v6728_v0  ;;  %v1443_v2 = vsel %vm12427_vm0, %v6728_v0, 0  ;;  %v1407_v4 = vld [vmem:[%s12423_s1] sm:$0x3]  ;;  %v8157_v7 = vld [vmem:[%s12423_s1 + $0x6] sm:$0x3]  ;;  %vm8106_vm1 = vmmov 0  }
   0xd   : > { %7407 = vmatpush3.bf16.msra.mxu0 %v1443_v2  ;;  %s13854_s13 = smov (!%p161_p3, %s6671_s13), 1  ;;  %8019 = vmatprep.subr.msk.bf16.mxu1 %vm12427_vm0, %v1407_v4  ;;  %v1655_v5 = vsel %vm12427_vm0, %v1407_v4, 0  ;;  %v8151_v6 = vshrl.u32 %v206_v1, 7  ;;  %vm1056_vm2 = vmpackc.low %vm8106_vm1, %vm8106_vm1  ;;  %vm12456_vm3 = vcmask 31744   ;;  %vm916_vm5 = vcmask 1040384  }
   0xe   : > { %8020 = vmatprep.subr.msk.bf16.mxu0 %vm12427_vm0, %v6761_v3  ;;  %7441 = vmatpush3.bf16.msra.mxu1 %v1655_v5  ;;  %s7066_s22 = sshll.u32 %s13854_s13, 7  ;;  %v1869_v13 = vsel %vm12427_vm0, %v6761_v3, 0  ;;  %vm12447_vm6 = vsmask.f32 256  ;;  %v12428_v15 = vmov 0   ;;  %v12712_v32 = vmov 0 }
   0xf   : > { %v243_v8 = vand.u32 15, %v8151_v6  ;;  %8021 = vmatprep.subr.msk.bf16.mxu1 %vm12427_vm0, %v8157_v7  ;;  %s8168_s25 = scalar_lea.vmem %s12422_s0, %s7066_s22  ;;  %v8191_v16 = vsel %vm1056_vm2, 65537, %v12428_v15  ;;  %v209_v17 = vadd.s32 16, %v8151_v6  ;;  %v8203_v22 = vld [vmem:[%s12423_s1 + $0x8] sm:$0x3]  ;;  %v211_v25 = vadd.s32 32, %v8151_v6  ;;  %vm8223_vm9 = vmand %vm916_vm5, %vm12447_vm6  ;;  %s12313_s5 = scalar_lea.vmem %s12425_s3, %s7066_s22 }
  0x10   : > { %v8171_v9 = vld [vmem:[%s8168_s25 + $0x8] sm:$0xff]   ;;  %v8174_v10 = vld [vmem:[%s8168_s25] sm:$0xff]   ;;  %v8177_v11 = vld [vmem:[%s8168_s25 + $0x10] sm:$0xff]   ;;  %vm12463_vm8 = vsmask.f32 7424  ;;  %v12713_v32 = vsel %vm8223_vm9, 4294967295, %v12712_v32 }
  0x11   : > { %12705 = vst [vmem:[#allocation2_spill] sm:$0xff] %v8171_v9  ;;  %12706 = vst [vmem:[#allocation3_spill] sm:$0xff] %v8174_v10  ;;  %vm8179_vm4 = vcmp.eq.s32.totalorder %v243_v8, 0  ;;  %v8185_v14 = vld [vmem:[%s8168_s25 + $0x70] sm:$0xff]   ;;  %7408 = vmatprep.mubr.msk.bf16.mxu0 %vm12456_vm3, %v8171_v9  ;;  %v774_v18 = vshrl.u32 %v8171_v9, 16  ;;  %v777_v19 = vshll.u32 %v8171_v9, 16 }
  0x12   : > { %12707 = vst [vmem:[#allocation4_spill] sm:$0xff] %v8177_v11  ;;  %12710 = vst [vmem:[#allocation5_spill] sm:$0xff] %v8185_v14  ;;  %v781_v20 = vshrl.u32 %v8174_v10, 16  ;;  %v784_v21 = vshll.u32 %v8174_v10, 16  ;;  %7409 = vmatmul.mubr.msk.bf16.vlgmr.msra.gmra.mxu0 %vm12456_vm3, %v8174_v10  ;;  %v12426_v23 = vshrl.u32 %v8185_v14, 16  ;;  %v793_v31 = vshll.u32 %v8177_v11, 16 }
  0x13   : > { %vm1055_vm7 = vmpackc.low %vm8179_vm4, %vm8179_vm4  ;;  %7475 = vmatpush3.bf16.msra.mxu0 %v1869_v13  ;;  %7412 = vmatprep.mubr.msk.bf16.mxu0 %vm12456_vm3, %v8171_v9  ;;  %v8212_v26 = vrot.slane %v774_v18, 7  ;;  %v8214_v28 = vrot.slane %v777_v19, 1  ;;  %12714 = vst [vmem:[#allocation7_spill] sm:$0xff] %v12713_v32  ;;  %v257_v34 = vand.u32 15, %v209_v17  ;;  %v12715_v37 = vmov 0  ;;  %v8237_v38 = vld [vmem:[%s8168_s25 + $0x18] sm:$0xff]  }
  0x14   : > { %v1087_v24 = vsel %vm1055_vm7, 65537, %v12428_v15  ;;  %v783_v27 = vrot.slane %v781_v20, 7  ;;  %v922_v29 = vrot.slane %v784_v21, 1  ;;  %v8218_v30 = vrot.slane %v12426_v23, 7  ;;  %8022 = vmatprep.subr.msk.bf16.mxu0 %vm12427_vm0, %v8203_v22  ;;  %12718 = vst [vmem:[#allocation9_spill] sm:$0xff] %v8237_v38  ;;  %v8261_v50 = vld [vmem:[%s8168_s25 + $0x20] sm:$0xff]  }
  0x15   : > { %12711 = vst [vmem:[#allocation6_spill] sm:$0xff] %v8214_v28  ;;  %v6696_v33 = vcombine.low %v1087_v24, %v8191_v16  ;;  %v779_v35 = vor.u32 %v777_v19, %v8212_v26  ;;  %v921_v36 = vor.u32 %v8214_v28, %v774_v18  ;;  %v271_v39 = vand.u32 15, %v211_v25  ;;  %12719 = vst [vmem:[#allocation10_spill] sm:$0xff] %v8261_v50  ;;  %v8282_v60 = vld [vmem:[%s8168_s25 + $0x28] sm:$0xff]   ;;  %v8321_v24 = vld [vmem:[%s8168_s25 + $0x30] sm:$0xff]  }
  0x16   : > { %v213_v40 = vadd.s32 48, %v8151_v6  ;;  %v786_v41 = vor.u32 %v784_v21, %v783_v27  ;;  %v924_v44 = vor.u32 %v922_v29, %v781_v20  ;;  %v926_v45 = vrot.slane %v793_v31, 1  ;;  %12720 = vst [vmem:[#allocation11_spill] sm:$0xff] %v8282_v60  ;;  %12732 = vst [vmem:[#allocation17_spill] sm:$0xff] %v8321_v24 }
  0x17   : > { %vm8232_vm10 = vcmp.ne.s16.totalorder %v6696_v33, 0  ;;  %v8243_v42 = vsel %vm8223_vm9, %v8218_v30, %v779_v35  ;;  %v8246_v43 = vsel %vm12463_vm8, %v921_v36, %v922_v29  ;;  %vm625_vm11 = vcmp.eq.s32.totalorder %v257_v34, 0 }
  0x18   : > { %v12716_v37 = vsel %vm8232_vm10, 4294967295, %v12715_v37  ;;  %v1183_v46 = vsel %vm8232_vm10, %v8246_v43, %v8243_v42  ;;  %vm1057_vm12 = vmpackc.low %vm625_vm11, %vm625_vm11  ;;  %v215_v47 = vadd.s32 64, %v8151_v6  ;;  %v8255_v48 = vsel %vm12447_vm6, %v783_v27, %v779_v35 }
  0x19   : > { %12717 = vst [vmem:[#allocation8_spill] sm:$0xff] %v12716_v37  ;;  %7442 = vmatprep.mubr.msk.bf16.mxu1 %vm12456_vm3, %v1183_v46  ;;  %v1089_v49 = vsel %vm1057_vm12, 65537, %v12428_v15  ;;  %vm627_vm13 = vcmp.eq.s32.totalorder %v271_v39, 0  ;;  %v217_v51 = vadd.s32 80, %v8151_v6  ;;  %v8266_v52 = vsel %vm12447_vm6, %v8212_v26, %v786_v41  ;;  %v8334_v39 = vld [vmem:[%s8168_s25 + $0x38] sm:$0xff]  }
  0x1a   : > { %7413 = vmatmul.mubr.msk.bf16.gmra.mxu0 %vm12456_vm3, %v8177_v11  ;;  %v8270_v53 = vsel %vm12463_vm8, %v924_v44, %v8214_v28  ;;  %v6697_v54 = vcombine.low %v1089_v49, %v8191_v16  ;;  %vm1059_vm14 = vmpackc.low %vm627_vm13, %vm627_vm13  ;;  %v285_v55 = vand.u32 15, %v213_v40  ;;  %v8276_v56 = vsel %vm12463_vm8, %v921_v36, %v926_v45  ;;  %12733 = vst [vmem:[#allocation18_spill] sm:$0xff] %v8334_v39 }
  0x1b   : > { %7416 = vmatprep.mubr.msk.bf16.mxu0 %vm12456_vm3, %v8237_v38  ;;  %v1091_v57 = vsel %vm1059_vm14, 65537, %v12428_v15  ;;  %v790_v58 = vshrl.u32 %v8177_v11, 16  ;;  %v801_v59 = vshll.u32 %v8237_v38, 16  ;;  %v12721_v61 = vmov 0 }
  0x1c   : > { %vm8284_vm15 = vcmp.ne.s16.totalorder %v6697_v54, 0  ;;  %v6698_v62 = vcombine.low %v1091_v57, %v8191_v16  ;;  %vm629_vm1 = vcmp.eq.s32.totalorder %v285_v55, 0  ;;  %v12724_v3 = vmov 0 }
  0x1d   : > { %v12722_v61 = vsel %vm8284_vm15, 4294967295, %v12721_v61  ;;  %v1184_v63 = vsel %vm8284_vm15, %v8270_v53, %v8266_v52  ;;  %v792_v0 = vrot.slane %v790_v58, 7  ;;  %v928_v1 = vor.u32 %v926_v45, %v790_v58  ;;  %vm1061_vm2 = vmpackc.low %vm629_vm1, %vm629_vm1 }
  0x1e   : > { %12723 = vst [vmem:[#allocation12_spill] sm:$0xff] %v12722_v61  ;;  %v929_v2 = vrot.slane %v801_v59, 1  ;;  %7443 = vmatmul.mubr.msk.bf16.vlgmr.msra.gmra.mxu1 %vm12456_vm3, %v1184_v63  ;;  %vm8294_vm4 = vcmp.ne.s16.totalorder %v6698_v62, 0  ;;  %v1093_v4 = vsel %vm1061_vm2, 65537, %v12428_v15  ;;  %v299_v5 = vand.u32 15, %v215_v47 }
  0x1f   : > { %v12725_v3 = vsel %vm8294_vm4, 4294967295, %v12724_v3  ;;  %v1185_v8 = vsel %vm8294_vm4, %v8276_v56, %v8255_v48  ;;  %v795_v12 = vor.u32 %v793_v31, %v792_v0  ;;  %v6699_v17 = vcombine.low %v1093_v4, %v8191_v16 }
  0x20   : > { %12726 = vst [vmem:[#allocation13_spill] sm:$0xff] %v12725_v3  ;;  %v8304_v13 = vsel %vm12463_vm8, %v928_v1, %v929_v2  ;;  %7446 = vmatprep.mubr.msk.bf16.mxu1 %vm12456_vm3, %v1185_v8  ;;  %vm631_vm5 = vcmp.eq.s32.totalorder %v299_v5, 0  ;;  %v798_v18 = vshrl.u32 %v8237_v38, 16  ;;  %v809_v19 = vshll.u32 %v8261_v50, 16 }
  0x21   : > { %12727 = vst [vmem:[#allocation14_spill] sm:$0xff] %v8304_v13  ;;  %v8314_v20 = vsel %vm12447_vm6, %v8212_v26, %v795_v12  ;;  %vm8316_vm7 = vcmp.ne.s16.totalorder %v6699_v17, 0  ;;  %v12729_v21 = vmov 0  ;;  %vm1063_vm11 = vmpackc.low %vm631_vm5, %vm631_vm5  ;;  %v219_v25 = vadd.s32 96, %v8151_v6 }
  0x22   : > { %7417 = vmatmul.mubr.msk.bf16.gmra.mxu0 %vm12456_vm3, %v8261_v50  ;;  %12728 = vst [vmem:[#allocation15_spill] sm:$0xff] %v8314_v20  ;;  %v12730_v21 = vsel %vm8316_vm7, 4294967295, %v12729_v21  ;;  %v1186_v27 = vsel %vm8316_vm7, %v8304_v13, %v8314_v20  ;;  %v800_v29 = vrot.slane %v798_v18, 7  ;;  %v931_v26 = vor.u32 %v929_v2, %v798_v18  ;;  %v8366_v2 = vld [vmem:[%s8168_s25 + $0x40] sm:$0xff]  }
  0x23   : > { %12731 = vst [vmem:[#allocation16_spill] sm:$0xff] %v12730_v21  ;;  %7420 = vmatprep.mubr.msk.bf16.mxu0 %vm12456_vm3, %v8282_v60  ;;  %v932_v31 = vrot.slane %v809_v19, 1  ;;  %v1095_v33 = vsel %vm1063_vm11, 65537, %v12428_v15  ;;  %v313_v34 = vand.u32 15, %v217_v51  ;;  %v806_v35 = vshrl.u32 %v8261_v50, 16  ;;  %12738 = vst [vmem:[#allocation21_spill] sm:$0xff] %v8366_v2 }
  0x24   : > { %v817_v36 = vshll.u32 %v8282_v60, 16  ;;  %v803_v40 = vor.u32 %v801_v59, %v800_v29  ;;  %v6700_v44 = vcombine.low %v1095_v33, %v8191_v16  ;;  %v12734_v51 = vmov 0 }
  0x25   : > { %v8337_v41 = vsel %vm12463_vm8, %v931_v26, %v932_v31  ;;  %vm633_vm12 = vcmp.eq.s32.totalorder %v313_v34, 0  ;;  %v808_v45 = vrot.slane %v806_v35, 7  ;;  %v934_v46 = vor.u32 %v932_v31, %v806_v35  ;;  %v8387_v35 = vld [vmem:[%s8168_s25 + $0x48] sm:$0xff]  }
  0x26   : > { %v935_v47 = vrot.slane %v817_v36, 1  ;;  %7447 = vmatmul.mubr.msk.bf16.gmra.mxu1 %vm12456_vm3, %v1186_v27  ;;  %v8342_v49 = vsel %vm12447_vm6, %v792_v0, %v803_v40  ;;  %vm8344_vm13 = vcmp.ne.s16.totalorder %v6700_v44, 0  ;;  %vm1065_vm14 = vmpackc.low %vm633_vm12, %vm633_vm12  ;;  %v327_v62 = vand.u32 15, %v219_v25  ;;  %12742 = vst [vmem:[#allocation23_spill] sm:$0xff] %v8387_v35 }
  0x27   : > { %v12735_v51 = vsel %vm8344_vm13, 4294967295, %v12734_v51  ;;  %v1187_v54 = vsel %vm8344_vm13, %v8337_v41, %v8342_v49  ;;  %v811_v55 = vor.u32 %v809_v19, %v808_v45  ;;  %v1097_v58 = vsel %vm1065_vm14, 65537, %v12428_v15 }
  0x28   : > { %12736 = vst [vmem:[#allocation19_spill] sm:$0xff] %v12735_v51  ;;  %v8353_v57 = vsel %vm12463_vm8, %v934_v46, %v935_v47  ;;  %7450 = vmatprep.mubr.msk.bf16.mxu1 %vm12456_vm3, %v1187_v54  ;;  %v6701_v59 = vcombine.low %v1097_v58, %v8191_v16  ;;  %v814_v63 = vshrl.u32 %v8282_v60, 16  ;;  %v825_v0 = vshll.u32 %v8321_v24, 16 }
  0x29   : > { %v8363_v1 = vsel %vm12447_vm6, %v800_v29, %v811_v55  ;;  %v12739_v4 = vmov 0  ;;  %vm635_vm2 = vcmp.eq.s32.totalorder %v327_v62, 0  ;;  %v221_v18 = vadd.s32 112, %v8151_v6 }
  0x2a   : > { %7421 = vmatmul.mubr.msk.bf16.gmra.mxu0 %vm12456_vm3, %v8321_v24  ;;  %12737 = vst [vmem:[#allocation20_spill] sm:$0xff] %v8363_v1  ;;  %vm8368_vm1 = vcmp.ne.s16.totalorder %v6701_v59, 0  ;;  %v816_v5 = vrot.slane %v814_v63, 7  ;;  %v937_v8 = vor.u32 %v935_v47, %v814_v63  ;;  %v938_v17 = vrot.slane %v825_v0, 1  ;;  %vm1067_vm5 = vmpackc.low %vm635_vm2, %vm635_vm2 }
  0x2b   : > { %v12740_v4 = vsel %vm8368_vm1, 4294967295, %v12739_v4  ;;  %7424 = vmatprep.mubr.msk.bf16.mxu0 %vm12456_vm3, %v8334_v39  ;;  %v1188_v12 = vsel %vm8368_vm1, %v8353_v57, %v8363_v1  ;;  %v822_v19 = vshrl.u32 %v8321_v24, 16  ;;  %v1099_v27 = vsel %vm1067_vm5, 65537, %v12428_v15 }
  0x2c   : > { %12741 = vst [vmem:[#allocation22_spill] sm:$0xff] %v12740_v4  ;;  %v819_v25 = vor.u32 %v817_v36, %v816_v5  ;;  %v833_v29 = vshll.u32 %v8334_v39, 16  ;;  %v8383_v26 = vsel %vm12463_vm8, %v937_v8, %v938_v17  ;;  %v6702_v31 = vcombine.low %v1099_v27, %v8191_v16 }
  0x2d   : > { %v341_v33 = vand.u32 15, %v221_v18  ;;  %v824_v34 = vrot.slane %v822_v19, 7  ;;  %v940_v44 = vor.u32 %v938_v17, %v822_v19  ;;  %v12743_v46 = vmov 0  ;;  %v8418_v18 = vld [vmem:[%s8168_s25 + $0x50] sm:$0xff]  }
  0x2e   : > { %7451 = vmatmul.mubr.msk.bf16.gmra.mxu1 %vm12456_vm3, %v1188_v12  ;;  %v8391_v40 = vsel %vm12447_vm6, %v808_v45, %v819_v25  ;;  %v941_v36 = vrot.slane %v833_v29, 1  ;;  %vm8393_vm11 = vcmp.ne.s16.totalorder %v6702_v31, 0  ;;  %v223_v55 = vadd.s32 128, %v8151_v6  ;;  %12747 = vst [vmem:[#allocation26_spill] sm:$0xff] %v8418_v18 }
  0x2f   : > { %v12744_v46 = vsel %vm8393_vm11, 4294967295, %v12743_v46  ;;  %vm637_vm12 = vcmp.eq.s32.totalorder %v341_v33, 0  ;;  %v827_v47 = vor.u32 %v825_v0, %v824_v34  ;;  %v1189_v54 = vsel %vm8393_vm11, %v8383_v26, %v8391_v40 }
  0x30   : > { %12745 = vst [vmem:[#allocation24_spill] sm:$0xff] %v12744_v46  ;;  %vm1069_vm14 = vmpackc.low %vm637_vm12, %vm637_vm12  ;;  %v830_v45 = vshrl.u32 %v8334_v39, 16  ;;  %7454 = vmatprep.mubr.msk.bf16.mxu1 %vm12456_vm3, %v1189_v54  ;;  %v8410_v59 = vsel %vm12463_vm8, %v940_v44, %v941_v36  ;;  %v841_v63 = vshll.u32 %v8366_v2, 16  ;;  %v355_v8 = vand.u32 15, %v223_v55 }
  0x31   : > { %v8407_v58 = vsel %vm12447_vm6, %v816_v5, %v827_v47  ;;  %v1101_v62 = vsel %vm1069_vm14, 65537, %v12428_v15  ;;  %v225_v19 = vadd.s32 144, %v8151_v6  ;;  %v12748_v25 = vmov 0  ;;  %v8432_v47 = vld [vmem:[%s8168_s25 + $0x58] sm:$0xff]  }
  0x32   : > { %7425 = vmatmul.mubr.msk.bf16.gmra.mxu0 %vm12456_vm3, %v8366_v2  ;;  %12746 = vst [vmem:[#allocation25_spill] sm:$0xff] %v8407_v58  ;;  %v6703_v0 = vcombine.low %v1101_v62, %v8191_v16  ;;  %v832_v12 = vrot.slane %v830_v45, 7  ;;  %v943_v17 = vor.u32 %v941_v36, %v830_v45  ;;  %v944_v5 = vrot.slane %v841_v63, 1  ;;  %12751 = vst [vmem:[#allocation28_spill] sm:$0xff] %v8432_v47 }
  0x33   : > { %7428 = vmatprep.mubr.msk.bf16.mxu0 %vm12456_vm3, %v8387_v35  ;;  %vm639_vm5 = vcmp.eq.s32.totalorder %v355_v8, 0  ;;  %v838_v31 = vshrl.u32 %v8366_v2, 16  ;;  %v369_v44 = vand.u32 15, %v225_v19  ;;  %v849_v36 = vshll.u32 %v8387_v35, 16 }
  0x34   : > { %vm8421_vm2 = vcmp.ne.s16.totalorder %v6703_v0, 0  ;;  %v835_v27 = vor.u32 %v833_v29, %v832_v12  ;;  %vm1071_vm12 = vmpackc.low %vm639_vm5, %vm639_vm5  ;;  %v8436_v54 = vsel %vm12463_vm8, %v943_v17, %v944_v5  ;;  %v227_v23 = vadd.s32 160, %v8151_v6 }
  0x35   : > { %v12749_v25 = vsel %vm8421_vm2, 4294967295, %v12748_v25  ;;  %v1190_v33 = vsel %vm8421_vm2, %v8410_v59, %v8407_v58  ;;  %v1103_v29 = vsel %vm1071_vm12, 65537, %v12428_v15  ;;  %v840_v55 = vrot.slane %v838_v31, 7 }
  0x36   : > { %12750 = vst [vmem:[#allocation27_spill] sm:$0xff] %v12749_v25  ;;  %7455 = vmatmul.mubr.msk.bf16.gmra.mxu1 %vm12456_vm3, %v1190_v33  ;;  %v946_v45 = vor.u32 %v944_v5, %v838_v31  ;;  %v8440_v62 = vsel %vm12447_vm6, %v824_v34, %v835_v27  ;;  %v6704_v0 = vcombine.low %v1103_v29, %v8191_v16  ;;  %vm641_vm14 = vcmp.eq.s32.totalorder %v369_v44, 0  ;;  %v8456_v27 = vld [vmem:[%s8168_s25 + $0x60] sm:$0xff]  }
  0x37   : > { %v947_v8 = vrot.slane %v849_v36, 1  ;;  %v843_v19 = vor.u32 %v841_v63, %v840_v55  ;;  %vm1073_vm5 = vmpackc.low %vm641_vm14, %vm641_vm14  ;;  %v12752_v33 = vmov 0  ;;  %v846_v5 = vshrl.u32 %v8387_v35, 16  ;;  %12755 = vst [vmem:[#allocation30_spill] sm:$0xff] %v8456_v27 }
  0x38   : > { %vm8444_vm0 = vcmp.ne.s16.totalorder %v6704_v0, 0  ;;  %v1105_v34 = vsel %vm1073_vm5, 65537, %v12428_v15  ;;  %v383_v29 = vand.u32 15, %v227_v23  ;;  %v857_v0 = vshll.u32 %v8418_v18, 16 }
  0x39   : > { %v12753_v33 = vsel %vm8444_vm0, 4294967295, %v12752_v33  ;;  %v8451_v17 = vsel %vm12463_vm8, %v946_v45, %v947_v8  ;;  %v1191_v63 = vsel %vm8444_vm0, %v8436_v54, %v8440_v62  ;;  %v8463_v31 = vsel %vm12447_vm6, %v832_v12, %v843_v19 }
  0x3a   : > { %12754 = vst [vmem:[#allocation29_spill] sm:$0xff] %v12753_v33  ;;  %7429 = vmatmul.mubr.msk.bf16.gmra.mxu0 %vm12456_vm3, %v8418_v18  ;;  %12756 = vst [vmem:[#allocation31_spill] sm:$0xff] %v8463_v31  ;;  %v6705_v44 = vcombine.low %v1105_v34, %v8191_v16  ;;  %7458 = vmatprep.mubr.msk.bf16.mxu1 %vm12456_vm3, %v1191_v63  ;;  %v848_v45 = vrot.slane %v846_v5, 7  ;;  %v949_v15 = vor.u32 %v947_v8, %v846_v5  ;;  %v12757_v35 = vmov 0  ;;  %v8481_v63 = vld [vmem:[%s8168_s25 + $0x68] sm:$0xff]  }
  0x3b   : > { %7432 = vmatprep.mubr.msk.bf16.mxu0 %vm12456_vm3, %v8432_v47  ;;  %vm643_vm14 = vcmp.eq.s32.totalorder %v383_v29, 0  ;;  %v950_v23 = vrot.slane %v857_v0, 1  ;;  %v229_v34 = vadd.s32 176, %v8151_v6  ;;  %12760 = vst [vmem:[#allocation33_spill] sm:$0xff] %v8481_v63  ;;  %v12761_v8 = vmov 0  }
  0x3c   : > { %vm8471_vm12 = vcmp.ne.s16.totalorder %v6705_v44, 0  ;;  %v851_v19 = vor.u32 %v849_v36, %v848_v45  ;;  %vm1075_vm5 = vmpackc.low %vm643_vm14, %vm643_vm14  ;;  %v854_v44 = vshrl.u32 %v8418_v18, 16  ;;  %v865_v29 = vshll.u32 %v8432_v47, 16 }
  0x3d   : > { %v12758_v35 = vsel %vm8471_vm12, 4294967295, %v12757_v35  ;;  %v1192_v12 = vsel %vm8471_vm12, %v8451_v17, %v8463_v31  ;;  %v1107_v5 = vsel %vm1075_vm5, 65537, %v12761_v8  ;;  %v8491_v2 = vsel %vm12463_vm8, %v949_v15, %v950_v23 }
  0x3e   : > { %12759 = vst [vmem:[#allocation32_spill] sm:$0xff] %v12758_v35  ;;  %7459 = vmatmul.mubr.msk.bf16.gmra.mxu1 %vm12456_vm3, %v1192_v12  ;;  %v8488_v32 = vsel %vm12447_vm6, %v840_v55, %v851_v19  ;;  %v6706_v36 = vcombine.low %v1107_v5, %v8191_v16  ;;  %v397_v39 = vand.u32 15, %v229_v34  ;;  %v856_v24 = vrot.slane %v854_v44, 7 }
  0x3f   : > { %v952_v60 = vor.u32 %v950_v23, %v854_v44  ;;  %v953_v50 = vrot.slane %v865_v29, 1  ;;  %v12762_v12 = vshll.u32 %v8185_v14, 16  ;;  %v12764_v18 = vmov 0 }
  0x40   : > { %vm8498_vm14 = vcmp.ne.s16.totalorder %v6706_v36, 0  ;;  %vm645_vm5 = vcmp.eq.s32.totalorder %v397_v39, 0  ;;  %v231_v15 = vadd.s32 192, %v8151_v6  ;;  %v859_v19 = vor.u32 %v857_v0, %v856_v24 }
  0x41   : > { %v8496_v38 = vrot.slane %v12762_v12, 1  ;;  %v12765_v18 = vsel %vm8498_vm14, 4294967295, %v12764_v18  ;;  %v1193_v55 = vsel %vm8498_vm14, %v8491_v2, %v8488_v32  ;;  %v8510_v23 = vsel %vm12463_vm8, %v952_v60, %v953_v50  ;;  %vm1077_vm6 = vmpackc.low %vm645_vm5, %vm645_vm5 }
  0x42   : > { %12766 = vst [vmem:[#allocation35_spill] sm:$0xff] %v12765_v18  ;;  %7433 = vmatmul.mubr.msk.bf16.gmra.mxu0 %vm12456_vm3, %v8456_v27  ;;  %v862_v34 = vshrl.u32 %v8432_v47, 16  ;;  %7462 = vmatprep.mubr.msk.bf16.mxu1 %vm12456_vm3, %v1193_v55  ;;  %v1109_v39 = vsel %vm1077_vm6, 65537, %v12761_v8  ;;  %v411_v5 = vand.u32 15, %v231_v15  ;;  %v873_v44 = vshll.u32 %v8456_v27, 16 }
  0x43   : > { %12763 = vst [vmem:[#allocation34_spill] sm:$0xff] %v8496_v38  ;;  %7436 = vmatprep.mubr.msk.bf16.mxu0 %vm12456_vm3, %v8481_v63  ;;  %v233_v36 = vadd.s32 208, %v8151_v6  ;;  %vm12767_vm9 = vsmask.f32 256  ;;  %v6707_v60 = vcombine.low %v1109_v39, %v8191_v16  ;;  %v870_v47 = vshrl.u32 %v8456_v27, 16 }
  0x44   : > { %v8520_v0 = vsel %vm12767_vm9, %v848_v45, %v859_v19  ;;  %v864_v12 = vrot.slane %v862_v34, 7  ;;  %v955_v11 = vor.u32 %v953_v50, %v862_v34  ;;  %vm647_vm5 = vcmp.eq.s32.totalorder %v411_v5, 0  ;;  %v8527_v15 = vld [vmem:[%s12423_s1 + $0xa] sm:$0x3] }
  0x45   : > { %12768 = vst [vmem:[#allocation36_spill] sm:$0xff] %v8520_v0  ;;  %v956_v9 = vrot.slane %v873_v44, 1  ;;  %v425_v10 = vand.u32 15, %v233_v36  ;;  %vm8529_vm6 = vcmp.ne.s16.totalorder %v6707_v60, 0  ;;  %v12769_v55 = vmov 0  ;;  %vm1079_vm9 = vmpackc.low %vm647_vm5, %vm647_vm5 }
  0x46   : > { %v12770_v55 = vsel %vm8529_vm6, 4294967295, %v12769_v55  ;;  %v867_v45 = vor.u32 %v865_v29, %v864_v12  ;;  %v881_v19 = vshll.u32 %v8481_v63, 16  ;;  %vm12772_vm3 = vcmask 1041408  }
  0x47   : > { %12771 = vst [vmem:[#allocation37_spill] sm:$0xff] %v12770_v55  ;;  %v2147_v50 = vsel %vm12772_vm3, %v8157_v7, 0  ;;  %v1194_v34 = vsel %vm8529_vm6, %v8510_v23, %v8520_v0  ;;  %v8541_v39 = vsel %vm12463_vm8, %v955_v11, %v956_v9  ;;  %v1111_v5 = vsel %vm1079_vm9, 65537, %v12761_v8 }
  0x48   : > { %vm649_vm14 = vcmp.eq.s32.totalorder %v425_v10, 0  ;;  %7509 = vmatpush3.bf16.msra.mxu1 %v2147_v50  ;;  %vm12773_vm12 = vcmask 31744   ;;  %vm12774_vm5 = vsmask.f32 256  ;;  %v6708_v36 = vcombine.low %v1111_v5, %v8191_v16 }
  0x49   : > { %7463 = vmatmul.mubr.msk.bf16.gmra.mxu1 %vm12773_vm12, %v1194_v34  ;;  %v8546_v29 = vsel %vm12774_vm5, %v856_v24, %v867_v45  ;;  %v872_v7 = vrot.slane %v870_v47, 7  ;;  %v958_v60 = vor.u32 %v956_v9, %v870_v47  ;;  %vm1081_vm3 = vmpackc.low %vm649_vm14, %vm649_vm14  ;;  %vm12775_vm6 = vcmask 1041408  }
  0x4a   : > { %8023 = vmatprep.subr.msk.bf16.mxu1 %vm12775_vm6, %v8527_v15  ;;  %vm12776_vm8 = vmmov %vm12773_vm12  ;;  %v959_v11 = vrot.slane %v881_v19, 1  ;;  %v1113_v10 = vsel %vm1081_vm3, 65537, %v12761_v8  ;;  %v235_v50 = vadd.s32 224, %v8151_v6  ;;  %v878_v24 = vshrl.u32 %v8481_v63, 16  ;;  %v8570_v63 = vld [vmem:[%s8168_s25 + $0x78] sm:$0xff]  }
  0x4b   : > { %7437 = vmatmul.mubr.msk.bf16.gmra.mxu0 %vm12776_vm8, %v8185_v14  ;;  %vm8556_vm12 = vcmp.ne.s16.totalorder %v6708_v36, 0  ;;  %v12777_v45 = vmov 0  ;;  %v875_v9 = vor.u32 %v873_v44, %v872_v7  ;;  %v6709_v47 = vcombine.low %v1113_v10, %v8191_v16  ;;  %vm12782_vm6 = vmmov %vm12774_vm5 }
  0x4c   : > { %v12778_v45 = vsel %vm8556_vm12, 4294967295, %v12777_v45  ;;  %v208_v34 = vadd.s32 8, %v8151_v6  ;;  %v1195_v5 = vsel %vm8556_vm12, %v8541_v39, %v8546_v29  ;;  %vm12780_vm8 = vsmask.f32 7424 }
  0x4d   : > { %12779 = vst [vmem:[#allocation38_spill] sm:$0xff] %v12778_v45  ;;  %v8567_v27 = vsel %vm12780_vm8, %v958_v60, %v959_v11  ;;  %v439_v28 = vand.u32 15, %v235_v50  ;;  %v880_v55 = vrot.slane %v878_v24, 7  ;;  %vm12781_vm14 = vcmask 31744  }
  0x4e   : > { %7466 = vmatprep.mubr.msk.bf16.mxu1 %vm12781_vm14, %v1195_v5  ;;  %v8574_v44 = vsel %vm12782_vm6, %v864_v12, %v875_v9  ;;  %vm8576_vm9 = vcmp.ne.s16.totalorder %v6709_v47, 0  ;;  %v12783_v36 = vmov 0  ;;  %v961_v10 = vor.u32 %v959_v11, %v878_v24 }
  0x4f   : > { %v12784_v36 = vsel %vm8576_vm9, 4294967295, %v12783_v36  ;;  %v250_v18 = vand.u32 15, %v208_v34  ;;  %v1196_v60 = vsel %vm8576_vm9, %v8567_v27, %v8574_v44  ;;  %vm651_vm5 = vcmp.eq.s32.totalorder %v439_v28, 0 }
  0x50   : > { %12785 = vst [vmem:[#allocation39_spill] sm:$0xff] %v12784_v36  ;;  %v883_v50 = vor.u32 %v881_v19, %v880_v55  ;;  %v237_v45 = vadd.s32 240, %v8151_v6  ;;  %v12786_v5 = vshll.u32 %v8185_v14, 16  ;;  %vm1083_vm3 = vmpackc.low %vm651_vm5, %vm651_vm5  ;;  %v12787_v9 = vshrl.u32 %v8185_v14, 16 }
  0x51   : > { %vm656_vm8 = vcmp.eq.s32.totalorder %v250_v18, 15  ;;  %vm12789_vm14 = vsmask.f32 7424  ;;  %v1115_v28 = vsel %vm1083_vm3, 65537, %v12761_v8  ;;  %vm12790_vm9 = vcmask 31744  }
  0x52   : > { %v8588_v12 = vor.u32 %v12786_v5, %v8218_v30  ;;  %v8593_v11 = vor.u32 %v8496_v38, %v12787_v9  ;;  %v8597_v24 = vsel %vm12789_vm14, %v961_v10, %v8496_v38  ;;  %vm1264_vm6 = vmpackc.low %vm656_vm8, %vm656_vm8  ;;  %v453_v19 = vand.u32 15, %v237_v45  ;;  %7467 = vmatmul.mubr.msk.bf16.gmra.mxu1 %vm12790_vm9, %v1196_v60 }
  0x53   : > { %vm12791_vm12 = vsmask.f32 256  ;;  %v6710_v18 = vcombine.low %v1115_v28, %v8191_v16  ;;  %v1296_v34 = vsel %vm1264_vm6, 65537, %v12761_v8  ;;  %v12481_v5 = vshll.u32 %v8570_v63, 16 }
  0x54   : > { %12788 = vst [vmem:[#allocation40_spill] sm:$0xff] %v8593_v11  ;;  %v8602_v47 = vsel %vm12791_vm12, %v872_v7, %v883_v50  ;;  %v6712_v9 = vcombine.low %v8191_v16, %v1296_v34  ;;  %vm653_vm5 = vcmp.eq.s32.totalorder %v453_v19, 0  ;;  %v210_v10 = vadd.s32 24, %v8151_v6  ;;  %vm12795_vm9 = vmmov %vm12791_vm12 }
  0x55   : > { %vm8609_vm14 = vcmp.ne.s16.totalorder %v6710_v18, 0  ;;  %v12792_v14 = vmov 0  ;;  %v8615_v45 = vsel %vm12795_vm9, %v880_v55, %v8588_v12  ;;  %v8619_v7 = vrot.slane %v12481_v5, 1  ;;  %vm1085_vm12 = vmpackc.low %vm653_vm5, %vm653_vm5 }
  0x56   : > { %v12793_v14 = vsel %vm8609_vm14, 4294967295, %v12792_v14  ;;  %12796 = vst [vmem:[#allocation42_spill] sm:$0xff] %v8615_v45  ;;  %v212_v60 = vadd.s32 40, %v8151_v6  ;;  %v1197_v50 = vsel %vm8609_vm14, %v8597_v24, %v8602_v47  ;;  %vm8626_vm3 = vcmp.ne.s16.totalorder %v6712_v9, 0 }
  0x57   : > { %12794 = vst [vmem:[#allocation41_spill] sm:$0xff] %v12793_v14  ;;  %v12797_v28 = vmov 0  ;;  %v1117_v19 = vsel %vm1085_vm12, 65537, %v12761_v8  ;;  %v264_v55 = vand.u32 15, %v210_v10  ;;  %vm12800_vm8 = vcmask 31744  }
  0x58   : > { %v12798_v28 = vsel %vm8626_vm3, 4294967295, %v12797_v28  ;;  %7470 = vmatprep.mubr.msk.bf16.mxu1 %vm12800_vm8, %v1197_v50  ;;  %v1391_v18 = vsel %vm8626_vm3, %v8243_v42, %v8246_v43  ;;  %vm12801_vm6 = vsmask.f32 7424  ;;  %v6711_v9 = vcombine.low %v1117_v19, %v8191_v16  ;;  %vm12802_vm5 = vmmov %vm12800_vm8 }
  0x59   : > { %12799 = vst [vmem:[#allocation43_spill] sm:$0xff] %v12798_v28  ;;  %v8639_v34 = vsel %vm12801_vm6, %v8593_v11, %v8619_v7  ;;  %v278_v5 = vand.u32 15, %v212_v60  ;;  %7476 = vmatprep.mubr.msk.bf16.mxu0 %vm12802_vm5, %v1391_v18  ;;  %vm658_vm9 = vcmp.eq.s32.totalorder %v264_v55, 15  ;;  %v214_v10 = vadd.s32 56, %v8151_v6 }
  0x5a   : > { %v216_v50 = vadd.s32 72, %v8151_v6  ;;  %vm8645_vm12 = vcmp.ne.s16.totalorder %v6711_v9, 0  ;;  %v12803_v38 = vmov 0  ;;  %vm1266_vm8 = vmpackc.low %vm658_vm9, %vm658_vm9  ;;  %v2064_v42 = vsel %vm8232_vm10, %v8270_v53, %v8266_v52 }
  0x5b   : > { %v12804_v38 = vsel %vm8645_vm12, 4294967295, %v12803_v38  ;;  %vm660_vm3 = vcmp.eq.s32.totalorder %v278_v5, 15  ;;  %v218_v43 = vadd.s32 88, %v8151_v6  ;;  %v1198_v60 = vsel %vm8645_vm12, %v8639_v34, %v8615_v45  ;;  %vm12806_vm9 = vmmov %vm12802_vm5 }
  0x5c   : > { %12805 = vst [vmem:[#allocation44_spill] sm:$0xff] %v12804_v38  ;;  %v1298_v19 = vsel %vm1266_vm8, 65537, %v12761_v8  ;;  %vm1268_vm6 = vmpackc.low %vm660_vm3, %vm660_vm3  ;;  %v292_v55 = vand.u32 15, %v214_v10  ;;  %v306_v18 = vand.u32 15, %v216_v50  ;;  %7471 = vmatmul.mubr.msk.bf16.gmra.mxu1 %vm12802_vm5, %v1198_v60  ;;  %v220_v11 = vadd.s32 104, %v8151_v6 }
  0x5d   : > { %v6713_v5 = vcombine.low %v8191_v16, %v1298_v19  ;;  %v1300_v9 = vsel %vm1268_vm6, 65537, %v12761_v8  ;;  %v320_v37 = vand.u32 15, %v218_v43  ;;  %7510 = vmatprep.mubr.msk.bf16.mxu1 %vm12806_vm9, %v2064_v42  ;;  %v12809_v10 = vmov 0 }
  0x5e   : > { %v6714_v28 = vcombine.low %v8191_v16, %v1300_v9  ;;  %vm662_vm10 = vcmp.eq.s32.totalorder %v292_v55, 15  ;;  %vm8664_vm14 = vcmp.eq.s32.totalorder %v306_v18, 15  ;;  %vm12812_vm8 = vcmask 1041408  }
  0x5f   : > { %vm8669_vm3 = vcmp.ne.s16.totalorder %v6713_v5, 0  ;;  %v2347_v50 = vsel %vm12812_vm8, %v8203_v22, 0  ;;  %vm1270_vm6 = vmpackc.low %vm662_vm10, %vm662_vm10  ;;  %vm8675_vm5 = vcmp.eq.s32.totalorder %v320_v37, 15  ;;  %v222_v42 = vadd.s32 120, %v8151_v6  ;;  %v8695_v37 = vld [vmem:[%s12423_s1 + $0xc] sm:$0x3] }
  0x60   : > { %v12810_v10 = vsel %vm8669_vm3, 4294967295, %v12809_v10  ;;  %v1392_v60 = vsel %vm8669_vm3, %v8266_v52, %v8270_v53  ;;  %vm8684_vm9 = vcmp.ne.s16.totalorder %v6714_v28, 0  ;;  %v12815_v19 = vmov 0  ;;  %vm1272_vm10 = vmpackc.low %vm8664_vm14, %vm8664_vm14 }
  0x61   : > { %12811 = vst [vmem:[#allocation45_spill] sm:$0xff] %v12810_v10  ;;  %v12816_v19 = vsel %vm8684_vm9, 4294967295, %v12815_v19  ;;  %v1302_v55 = vsel %vm1270_vm6, 65537, %v12761_v8  ;;  %v334_v22 = vand.u32 15, %v220_v11  ;;  %vm12818_vm8 = vcmask 31744   ;;  %vm1274_vm14 = vmpackc.low %vm8675_vm5, %vm8675_vm5 }
  0x62   : > { %12817 = vst [vmem:[#allocation46_spill] sm:$0xff] %v12816_v19  ;;  %7477 = vmatmul.mubr.msk.bf16.vlgmr.msra.gmra.mxu0 %vm12818_vm8, %v1392_v60  ;;  %v1393_v28 = vsel %vm8684_vm9, %v8255_v48, %v8276_v56  ;;  %v6715_v18 = vcombine.low %v8191_v16, %v1302_v55  ;;  %v1304_v5 = vsel %vm1272_vm10, 65537, %v12761_v8  ;;  %vm12819_vm6 = vmmov %vm12818_vm8  ;;  %v2065_v38 = vsel %vm8284_vm15, %v8276_v56, %v8255_v48 }
  0x63   : > { %7543 = vmatpush3.bf16.msra.mxu0 %v2347_v50  ;;  %7480 = vmatprep.mubr.msk.bf16.mxu0 %vm12819_vm6, %v1393_v28  ;;  %v6716_v11 = vcombine.low %v8191_v16, %v1304_v5  ;;  %vm668_vm8 = vcmp.eq.s32.totalorder %v334_v22, 15  ;;  %v348_v9 = vand.u32 15, %v222_v42  ;;  %v12820_v60 = vmov 0 }
  0x64   : > { %vm8713_vm9 = vcmp.ne.s16.totalorder %v6715_v18, 0  ;;  %v2066_v50 = vsel %vm8294_vm4, %v8304_v13, %v8314_v20  ;;  %vm1276_vm5 = vmpackc.low %vm668_vm8, %vm668_vm8  ;;  %v224_v43 = vadd.s32 136, %v8151_v6  ;;  %vm12823_vm10 = vcmask 1041408  }
  0x65   : > { %v12821_v60 = vsel %vm8713_vm9, 4294967295, %v12820_v60  ;;  %8024 = vmatprep.subr.msk.bf16.mxu0 %vm12823_vm10, %v8695_v37  ;;  %vm8724_vm6 = vcmp.ne.s16.totalorder %v6716_v11, 0  ;;  %v12824_v55 = vmov 0  ;;  %v1306_v42 = vsel %vm1274_vm14, 65537, %v12761_v8 }
  0x66   : > { %12822 = vst [vmem:[#allocation47_spill] sm:$0xff] %v12821_v60  ;;  %v12825_v55 = vsel %vm8724_vm6, 4294967295, %v12824_v55  ;;  %vm12827_vm15 = vcmask 31744   ;;  %v1308_v22 = vsel %vm1276_vm5, 65537, %v12761_v8  ;;  %v1394_v28 = vsel %vm8713_vm9, %v8314_v20, %v8304_v13 }
  0x67   : > { %12826 = vst [vmem:[#allocation48_spill] sm:$0xff] %v12825_v55  ;;  %7511 = vmatmul.mubr.msk.bf16.vlgmr.msra.gmra.mxu1 %vm12827_vm15, %v2065_v38  ;;  %vm12828_vm8 = vmmov %vm12827_vm15  ;;  %vm8736_vm4 = vcmp.eq.s32.totalorder %v348_v9, 15  ;;  %v362_v5 = vand.u32 15, %v224_v43  ;;  %v226_v11 = vadd.s32 152, %v8151_v6  ;;  %v1395_v38 = vsel %vm8724_vm6, %v8342_v49, %v8337_v41 }
  0x68   : > { %7514 = vmatprep.mubr.msk.bf16.mxu1 %vm12828_vm8, %v2066_v50  ;;  %v6717_v3 = vcombine.low %v8191_v16, %v1306_v42  ;;  %v228_v61 = vadd.s32 168, %v8151_v6  ;;  %v6718_v60 = vcombine.low %v8191_v16, %v1308_v22  ;;  %vm12831_vm14 = vmmov %vm12828_vm8  ;;  %v2067_v9 = vsel %vm8316_vm7, %v8337_v41, %v8342_v49 }
  0x69   : > { %vm672_vm15 = vcmp.eq.s32.totalorder %v362_v5, 15  ;;  %vm1278_vm5 = vmpackc.low %vm8736_vm4, %vm8736_vm4  ;;  %v376_v50 = vand.u32 15, %v226_v11  ;;  %v12833_v43 = vmov 0  ;;  %v2068_v42 = vsel %vm8344_vm13, %v8353_v57, %v8363_v1 }
  0x6a   : > { %7481 = vmatmul.mubr.msk.bf16.gmra.mxu0 %vm12831_vm14, %v1394_v28  ;;  %vm12832_vm10 = vmmov %vm12828_vm8  ;;  %vm8757_vm6 = vcmp.ne.s16.totalorder %v6717_v3, 0  ;;  %v390_v22 = vand.u32 15, %v228_v61  ;;  %vm8765_vm4 = vcmp.ne.s16.totalorder %v6718_v60, 0  ;;  %v12836_v28 = vmov 0 }
  0x6b   : > { %7484 = vmatprep.mubr.msk.bf16.mxu0 %vm12832_vm10, %v1395_v38  ;;  %vm1280_vm8 = vmpackc.low %vm672_vm15, %vm672_vm15  ;;  %v12834_v43 = vsel %vm8757_vm6, 4294967295, %v12833_v43  ;;  %v12837_v28 = vsel %vm8765_vm4, 4294967295, %v12836_v28  ;;  %v1310_v18 = vsel %vm1278_vm5, 65537, %v12761_v8  ;;  %v1396_v3 = vsel %vm8757_vm6, %v8363_v1, %v8353_v57 }
  0x6c   : > { %12835 = vst [vmem:[#allocation49_spill] sm:$0xff] %v12834_v43  ;;  %12838 = vst [vmem:[#allocation50_spill] sm:$0xff] %v12837_v28  ;;  %v1312_v5 = vsel %vm1280_vm8, 65537, %v12761_v8  ;;  %v230_v61 = vadd.s32 184, %v8151_v6  ;;  %v1397_v60 = vsel %vm8765_vm4, %v8391_v40, %v8383_v26  ;;  %v6719_v38 = vcombine.low %v8191_v16, %v1310_v18 }
  0x6d   : > { %vm12839_vm14 = vmmov %vm12832_vm10  ;;  %vm8787_vm5 = vcmp.eq.s32.totalorder %v390_v22, 15  ;;  %v232_v51 = vadd.s32 200, %v8151_v6  ;;  %v2069_v22 = vsel %vm8368_vm1, %v8383_v26, %v8391_v40  ;;  %vm12847_vm13 = vcmask 1041408  }
  0x6e   : > { %vm12840_vm15 = vmmov %vm12832_vm10  ;;  %vm8777_vm10 = vcmp.eq.s32.totalorder %v376_v50, 15  ;;  %v6720_v50 = vcombine.low %v8191_v16, %v1312_v5  ;;  %v404_v18 = vand.u32 15, %v230_v61  ;;  %v2593_v5 = vsel %vm12847_vm13, %v8527_v15, 0 }
  0x6f   : > { %7515 = vmatmul.mubr.msk.bf16.gmra.mxu1 %vm12839_vm14, %v2067_v9  ;;  %vm12845_vm8 = vmmov %vm12839_vm14  ;;  %v2070_v11 = vsel %vm8393_vm11, %v8410_v59, %v8407_v58  ;;  %v12851_v4 = vmov 0  ;;  %v234_v9 = vadd.s32 216, %v8151_v6  ;;  %v236_v46 = vadd.s32 232, %v8151_v6 }
  0x70   : > { %7518 = vmatprep.mubr.msk.bf16.mxu1 %vm12840_vm15, %v2068_v42  ;;  %vm1282_vm14 = vmpackc.low %vm8777_vm10, %vm8777_vm10  ;;  %v8800_v42 = vld [vmem:[%s12423_s1 + $0xe] sm:$0x3]  ;;  %vm8812_vm10 = vcmp.ne.s16.totalorder %v6719_v38, 0  ;;  %7577 = vmatpush3.bf16.msra.mxu1 %v2593_v5  ;;  %vm8834_vm1 = vcmp.eq.s32.totalorder %v404_v18, 15 }
  0x71   : > { %vm12846_vm15 = vmmov %vm12845_vm8  ;;  %v1314_v61 = vsel %vm1282_vm14, 65537, %v12761_v8  ;;  %v1398_v38 = vsel %vm8812_vm10, %v8407_v58, %v8410_v59 }
  0x72   : > { %7485 = vmatmul.mubr.msk.bf16.gmra.mxu0 %vm12845_vm8, %v1396_v3  ;;  %vm1284_vm8 = vmpackc.low %vm8787_vm5, %vm8787_vm5  ;;  %v12848_v3 = vmov 0 }
  0x73   : > { %7488 = vmatprep.mubr.msk.bf16.mxu0 %vm12846_vm15, %v1397_v60  ;;  %v12849_v3 = vsel %vm8812_vm10, 4294967295, %v12848_v3  ;;  %v418_v60 = vand.u32 15, %v232_v51  ;;  %vm8820_vm15 = vcmp.ne.s16.totalorder %v6720_v50, 0  ;;  %vm12854_vm5 = vmmov %vm12847_vm13  ;;  %vm12855_vm13 = vcmask 31744  }
  0x74   : > { %12850 = vst [vmem:[#allocation51_spill] sm:$0xff] %v12849_v3  ;;  %v12852_v4 = vsel %vm8820_vm15, 4294967295, %v12851_v4  ;;  %8025 = vmatprep.subr.msk.bf16.mxu1 %vm12854_vm5, %v8800_v42  ;;  %v1316_v15 = vsel %vm1284_vm8, 65537, %v12761_v8  ;;  %vm12856_vm11 = vmmov %vm12855_vm13  ;;  %v1399_v50 = vsel %vm8820_vm15, %v8440_v62, %v8436_v54  ;;  %v12865_v51 = vmov 0 }
  0x75   : > { %12853 = vst [vmem:[#allocation52_spill] sm:$0xff] %v12852_v4  ;;  %vm8844_vm14 = vcmp.eq.s32.totalorder %v418_v60, 15  ;;  %v6722_v18 = vcombine.low %v8191_v16, %v1316_v15  ;;  %vm1286_vm8 = vmpackc.low %vm8834_vm1, %vm8834_vm1  ;;  %v432_v60 = vand.u32 15, %v234_v9  ;;  %v2072_v15 = vsel %vm8444_vm0, %v8451_v17, %v8463_v31 }
  0x76   : > { %vm12861_vm5 = vmmov %vm12856_vm11  ;;  %vm12874_vm0 = vnez %v12758_v35  ;;  %v12918_v35 = vld [vmem:[#allocation3_spill] sm:$0xff]  ;;  %v2088_v28 = vsel %vm8820_vm15, %v8463_v31, %v8451_v17 }
  0x77   : > { %7519 = vmatmul.mubr.msk.bf16.gmra.mxu1 %vm12855_vm13, %v2069_v22  ;;  %v6721_v22 = vcombine.low %v8191_v16, %v1314_v61  ;;  %vm1288_vm13 = vmpackc.low %vm8844_vm14, %vm8844_vm14  ;;  %v12862_v61 = vmov 0  ;;  %vm8870_vm1 = vcmp.ne.s16.totalorder %v6722_v18, 0 }
  0x78   : > { %7522 = vmatprep.mubr.msk.bf16.mxu1 %vm12856_vm11, %v2070_v11  ;;  %v2071_v11 = vsel %vm8421_vm2, %v8436_v54, %v8440_v62  ;;  %v12866_v51 = vsel %vm8870_vm1, 4294967295, %v12865_v51  ;;  %v1320_v9 = vsel %vm1288_vm13, 65537, %v12761_v8  ;;  %vm12869_vm14 = vmmov %vm12861_vm5  ;;  %v1401_v18 = vsel %vm8870_vm1, %v8488_v32, %v8491_v2 }
  0x79   : > { %vm8862_vm7 = vcmp.ne.s16.totalorder %v6721_v22, 0  ;;  %12867 = vst [vmem:[#allocation54_spill] sm:$0xff] %v12866_v51  ;;  %v6724_v33 = vcombine.low %v8191_v16, %v1320_v9  ;;  %v12880_v9 = vmov 0 }
  0x7a   : > { %7489 = vmatmul.mubr.msk.bf16.gmra.mxu0 %vm12856_vm11, %v1398_v38  ;;  %v12863_v61 = vsel %vm8862_vm7, 4294967295, %v12862_v61  ;;  %v446_v38 = vand.u32 15, %v236_v46  ;;  %vm12868_vm11 = vmmov %vm12861_vm5  ;;  %v1400_v22 = vsel %vm8862_vm7, %v8463_v31, %v8451_v17  ;;  %v238_v46 = vadd.s32 248, %v8151_v6 }
  0x7b   : > { %7492 = vmatprep.mubr.msk.bf16.mxu0 %vm12861_vm5, %v1399_v50  ;;  %12864 = vst [vmem:[#allocation53_spill] sm:$0xff] %v12863_v61  ;;  %v1318_v50 = vsel %vm1286_vm8, 65537, %v12761_v8  ;;  %vm8882_vm5 = vcmp.eq.s32.totalorder %v432_v60, 15  ;;  %vm12872_vm13 = vmmov %vm12868_vm11  ;;  %v2073_v6 = vsel %vm12874_vm0, %v8491_v2, %v8488_v32  ;;  %vm8910_vm7 = vcmp.ne.s16.totalorder %v6724_v33, 0 }
  0x7c   : > { %vm684_vm8 = vcmp.eq.s32.totalorder %v446_v38, 15  ;;  %v460_v60 = vand.u32 15, %v238_v46  ;;  %v12878_v38 = vld [vmem:[#allocation35_spill] sm:$0xff]  ;;  %v12881_v9 = vsel %vm8910_vm7, 4294967295, %v12880_v9  ;;  %v1403_v33 = vsel %vm8910_vm7, %v8546_v29, %v8541_v39 }
  0x7d   : > { %vm1292_vm2 = vmpackc.low %vm684_vm8, %vm684_vm8  ;;  %12882 = vst [vmem:[#allocation56_spill] sm:$0xff] %v12881_v9 }
  0x7e   : > { %v1324_v5 = vsel %vm1292_vm2, 65537, %v12761_v8 }
  0x7f   : > { %7523 = vmatmul.mubr.msk.bf16.gmra.mxu1 %vm12868_vm11, %v2071_v11  ;;  %v6723_v11 = vcombine.low %v8191_v16, %v1318_v50  ;;  %vm1290_vm11 = vmpackc.low %vm8882_vm5, %vm8882_vm5 }
  0x80   : > { %7526 = vmatprep.mubr.msk.bf16.mxu1 %vm12869_vm14, %v2072_v15  ;;  %vm12873_vm14 = vmmov %vm12872_vm13  ;;  %v12875_v15 = vmov 0 }
  0x81   : > { %vm8902_vm1 = vcmp.ne.s16.totalorder %v6723_v11, 0  ;;  %vm12883_vm5 = vmmov %vm12873_vm14  ;;  %v6726_v11 = vcombine.low %v8191_v16, %v1324_v5  ;;  %v890_v5 = vshrl.u32 %v8570_v63, 16 }
  0x82   : > { %7493 = vmatmul.mubr.msk.bf16.gmra.mxu0 %vm12872_vm13, %v1400_v22  ;;  %v12876_v15 = vsel %vm8902_vm1, 4294967295, %v12875_v15  ;;  %vm12879_vm13 = vnez %v12878_v38  ;;  %v1322_v22 = vsel %vm1290_vm11, 65537, %v12761_v8  ;;  %v1402_v46 = vsel %vm8902_vm1, %v8520_v0, %v8510_v23  ;;  %vm12884_vm8 = vmmov %vm12883_vm5  ;;  %v12891_v38 = vld [vmem:[#allocation38_spill] sm:$0xff] }
  0x83   : > { %7496 = vmatprep.mubr.msk.bf16.mxu0 %vm12873_vm14, %v1401_v18  ;;  %12877 = vst [vmem:[#allocation55_spill] sm:$0xff] %v12876_v15  ;;  %v2074_v50 = vsel %vm12879_vm13, %v8510_v23, %v8520_v0  ;;  %vm686_vm14 = vcmp.eq.s32.totalorder %v460_v60, 15  ;;  %v6725_v18 = vcombine.low %v8191_v16, %v1322_v22  ;;  %vm12885_vm11 = vmmov %vm12883_vm5  ;;  %v12888_v60 = vmov 0 }
  0x84   : > { %vm1294_vm2 = vmpackc.low %vm686_vm14, %vm686_vm14  ;;  %vm12892_vm0 = vnez %v12891_v38 }
  0x85   : > { %v2076_v22 = vsel %vm12892_vm0, %v8567_v27, %v8574_v44  ;;  %vm12896_vm14 = vmmov %vm12883_vm5 }
  0x86   : > { %vm12897_vm0 = vmmov %vm12883_vm5 }
  0x87   : > { %7527 = vmatmul.mubr.msk.bf16.gmra.mxu1 %vm12883_vm5, %v2073_v6  ;;  %v12886_v6 = vld [vmem:[#allocation37_spill] sm:$0xff] }
  0x88   : > { %7530 = vmatprep.mubr.msk.bf16.mxu1 %vm12884_vm8, %v2074_v50  ;;  %vm12887_vm13 = vnez %v12886_v6  ;;  %vm8934_vm8 = vcmp.ne.s16.totalorder %v6725_v18, 0  ;;  %v892_v6 = vrot.slane %v890_v5, 7 }
  0x89   : > { %v2075_v50 = vsel %vm12887_vm13, %v8541_v39, %v8546_v29  ;;  %v12889_v60 = vsel %vm8934_vm8, 4294967295, %v12888_v60  ;;  %v1404_v18 = vsel %vm8934_vm8, %v8574_v44, %v8567_v27 }
  0x8a   : > { %7497 = vmatmul.mubr.msk.bf16.gmra.mxu0 %vm12885_vm11, %v1402_v46  ;;  %12890 = vst [vmem:[#allocation57_spill] sm:$0xff] %v12889_v60  ;;  %vm8943_vm11 = vcmp.ne.s16.totalorder %v6726_v11, 0  ;;  %v12893_v46 = vmov 0 }
  0x8b   : > { %7500 = vmatprep.mubr.msk.bf16.mxu0 %vm12883_vm5, %v1403_v33  ;;  %v12894_v46 = vsel %vm8943_vm11, 4294967295, %v12893_v46  ;;  %v1326_v33 = vsel %vm1294_vm2, 65537, %v12761_v8  ;;  %v1405_v38 = vsel %vm8943_vm11, %v8602_v47, %v8597_v24  ;;  %vm12898_vm2 = vmmov %vm12897_vm0  ;;  %vm12906_vm11 = vsmask.f32 256 }
  0x8c   : > { %12895 = vst [vmem:[#allocation58_spill] sm:$0xff] %v12894_v46  ;;  %v6727_v11 = vcombine.low %v8191_v16, %v1326_v33  ;;  %v12904_v16 = vshll.u32 %v8570_v63, 16  ;;  %vm12911_vm7 = vmmov %vm12906_vm11 }
  0x8e   : > { %vm8965_vm13 = vcmp.ne.s16.totalorder %v6727_v11, 0  ;;  %v895_v33 = vor.u32 %v12904_v16, %v892_v6  ;;  %v8984_v11 = vsel %vm12906_vm11, %v892_v6, %v8588_v12  ;;  %v12914_v16 = vld [vmem:[#allocation6_spill] sm:$0xff]  ;;  %v2086_v6 = vsel %vm8765_vm4, %v8407_v58, %v8410_v59 }
  0x8f   : > { %7531 = vmatmul.mubr.msk.bf16.gmra.mxu1 %vm12896_vm14, %v2075_v50  ;;  %vm12899_vm14 = vnez %v12784_v36  ;;  %v12900_v50 = vmov 0  ;;  %v12915_v36 = vld [vmem:[#allocation40_spill] sm:$0xff] }
  0x90   : > { %7534 = vmatprep.mubr.msk.bf16.mxu1 %vm12883_vm5, %v2076_v22  ;;  %v2077_v8 = vsel %vm12899_vm14, %v8597_v24, %v8602_v47  ;;  %v12901_v50 = vsel %vm8965_vm13, 4294967295, %v12900_v50  ;;  %vm12903_vm5 = vnez %v12793_v14  ;;  %vm12905_vm14 = vmmov %vm12897_vm0  ;;  %v12908_v14 = vmov 0 }
  0x91   : > { %12902 = vst [vmem:[#allocation59_spill] sm:$0xff] %v12901_v50  ;;  %v2078_v22 = vsel %vm12903_vm5, %v8639_v34, %v8615_v45  ;;  %vm12907_vm5 = vsmask.f32 7424  ;;  %vm12917_vm11 = vmmov %vm12905_vm14 }
  0x92   : > { %7501 = vmatmul.mubr.msk.bf16.gmra.mxu0 %vm12897_vm0, %v1404_v18  ;;  %v967_v18 = vor.u32 %v8619_v7, %v890_v5  ;;  %v8993_v7 = vsel %vm12911_vm7, %v8218_v30, %v895_v33  ;;  %v12912_v5 = vld [vmem:[#allocation34_spill] sm:$0xff]  ;;  %vm12919_vm7 = vmmov %vm12917_vm11  ;;  %v12920_v33 = vld [vmem:[#allocation43_spill] sm:$0xff] }
  0x93   : > { %7504 = vmatprep.mubr.msk.bf16.mxu0 %vm12898_vm2, %v1405_v38  ;;  %vm988_vm2 = vcmask 1047552   ;;  %v1406_v38 = vsel %vm8965_vm13, %v8615_v45, %v8639_v34 }
  0x94   : > { %vm8987_vm8 = vmand %vm988_vm2, %vm12907_vm5 }
  0x95   : > { %v12909_v14 = vsel %vm8987_vm8, 4294967295, %v12908_v14 }
  0x96   : > { %12910 = vst [vmem:[#allocation60_spill] sm:$0xff] %v12909_v14  ;;  %v2087_v14 = vsel %vm8812_vm10, %v8440_v62, %v8436_v54  ;;  %vm12955_vm10 = vnez %v12866_v51 }
  0x97   : > { %7535 = vmatmul.mubr.msk.bf16.gmra.mxu1 %vm12897_vm0, %v2077_v8  ;;  %vm12913_vm0 = vmmov %vm12907_vm5  ;;  %v2090_v4 = vsel %vm12955_vm10, %v8520_v0, %v8510_v23 }
  0x98   : > { %7538 = vmatprep.mubr.msk.bf16.mxu1 %vm12905_vm14, %v2078_v22  ;;  %v8997_v8 = vsel %vm12913_vm0, %v967_v18, %v12912_v5  ;;  %v9003_v22 = vsel %vm8987_vm8, %v12915_v36, %v12914_v16  ;;  %vm12921_vm14 = vnez %v12920_v33  ;;  %vm12922_vm5 = vmmov %vm12919_vm7  ;;  %vm12924_vm0 = vcmask 1041408   ;;  %v12927_v5 = vld [vmem:[#allocation4_spill] sm:$0xff]  ;;  %v12933_v16 = vld [vmem:[#allocation9_spill] sm:$0xff] }
  0x99   : > { %v2079_v30 = vsel %vm8645_vm12, %v8997_v8, %v8993_v7  ;;  %v2080_v36 = vsel %vm12921_vm14, %v8266_v52, %v8270_v53  ;;  %vm12923_vm2 = vmmov %vm12922_vm5  ;;  %v2871_v18 = vsel %vm12924_vm0, %v8695_v37, 0  ;;  %v2081_v52 = vsel %vm8669_vm3, %v8255_v48, %v8276_v56 }
  0x9a   : > { %7505 = vmatmul.mubr.msk.bf16.gmra.mxu0 %vm12917_vm11, %v1406_v38  ;;  %v12925_v38 = vld [vmem:[#allocation2_spill] sm:$0xff]  ;;  %vm12926_vm11 = vmmov %vm12923_vm2 }
  0x9b   : > { %7544 = vmatprep.mubr.msk.bf16.mxu0 %vm12919_vm7, %v12918_v35  ;;  %v6863_v35 = vld [vmem:[%s12423_s1 + $0x10] sm:$0x3]  ;;  %vm12928_vm7 = vmmov %vm12923_vm2 }
  0x9c   : > { %vm12932_vm8 = vmmov %vm12928_vm7 }
  0x9d   : > { %vm12935_vm3 = vmmov %vm12928_vm7 }
  0x9f   : > { %7539 = vmatmul.mubr.msk.bf16.gmra.mxu1 %vm12922_vm5, %v2079_v30  ;;  %vm12929_vm5 = vnez %v12816_v19  ;;  %v12934_v30 = vld [vmem:[#allocation10_spill] sm:$0xff]  ;;  %v12980_v19 = vld [vmem:[#allocation13_spill] sm:$0xff] }
  0xa0   : > { %7578 = vmatprep.mubr.msk.bf16.mxu1 %vm12923_vm2, %v2080_v36  ;;  %v2082_v53 = vsel %vm12929_vm5, %v8314_v20, %v8304_v13  ;;  %vm12930_vm2 = vmmov %vm12924_vm0 }
  0xa1   : > { %v3069_v37 = vsel %vm12930_vm2, %v8800_v42, 0  ;;  %vm12937_vm2 = vnez %v12825_v55 }
  0xa2   : > { %7545 = vmatmul.mubr.msk.bf16.vlgmr.msra.gmra.mxu0 %vm12926_vm11, %v12925_v38  ;;  %vm12931_vm11 = vmmov %vm12928_vm7  ;;  %v2084_v42 = vsel %vm12937_vm2, %v8363_v1, %v8353_v57 }
  0xa3   : > { %7611 = vmatpush3.bf16.msra.mxu0 %v2871_v18  ;;  %7548 = vmatprep.mubr.msk.bf16.mxu0 %vm12928_vm7, %v12927_v5  ;;  %v2083_v18 = vsel %vm8713_vm9, %v8342_v49, %v8337_v41 }
  0xa4   : > { %8026 = vmatprep.subr.msk.bf16.mxu0 %vm12924_vm0, %v6863_v35  ;;  %vm12938_vm0 = vmmov %vm12935_vm3 }
  0xa5   : > { %vm12956_vm15 = vmmov %vm12938_vm0 }
  0xa6   : > { %vm12962_vm10 = vmmov %vm12938_vm0 }
  0xa7   : > { %7579 = vmatmul.mubr.msk.bf16.vlgmr.msra.gmra.mxu1 %vm12931_vm11, %v2081_v52  ;;  %v12940_v52 = vld [vmem:[#allocation11_spill] sm:$0xff]  ;;  %vm12941_vm11 = vmmov %vm12938_vm0 }
  0xa8   : > { %7582 = vmatprep.mubr.msk.bf16.mxu1 %vm12932_vm8, %v2082_v53  ;;  %7645 = vmatpush3.bf16.msra.mxu1 %v3069_v37  ;;  %vm12939_vm8 = vmmov %vm12938_vm0  ;;  %v12942_v53 = vld [vmem:[#allocation17_spill] sm:$0xff]  ;;  %v2085_v37 = vsel %vm8757_vm6, %v8391_v40, %v8383_v26 }
  0xaa   : > { %7549 = vmatmul.mubr.msk.bf16.gmra.mxu0 %vm12928_vm7, %v12933_v16  ;;  %vm12943_vm7 = vmmov %vm12938_vm0 }
  0xab   : > { %7552 = vmatprep.mubr.msk.bf16.mxu0 %vm12935_vm3, %v12934_v30  ;;  %vm12944_vm3 = vmmov %vm12938_vm0 }
  0xaf   : > { %7583 = vmatmul.mubr.msk.bf16.gmra.mxu1 %vm12938_vm0, %v2083_v18  ;;  %v12945_v18 = vld [vmem:[#allocation18_spill] sm:$0xff] }
  0xb0   : > { %7586 = vmatprep.mubr.msk.bf16.mxu1 %vm12939_vm8, %v2084_v42  ;;  %vm12946_vm8 = vmmov %vm12938_vm0  ;;  %v12947_v42 = vld [vmem:[#allocation21_spill] sm:$0xff] }
  0xb2   : > { %7553 = vmatmul.mubr.msk.bf16.gmra.mxu0 %vm12941_vm11, %v12940_v52  ;;  %vm12948_vm11 = vmmov %vm12938_vm0 }
  0xb3   : > { %7556 = vmatprep.mubr.msk.bf16.mxu0 %vm12943_vm7, %v12942_v53  ;;  %vm12949_vm7 = vmmov %vm12938_vm0 }
  0xb7   : > { %7587 = vmatmul.mubr.msk.bf16.gmra.mxu1 %vm12944_vm3, %v2085_v37  ;;  %vm12950_vm3 = vmmov %vm12938_vm0  ;;  %v12952_v37 = vld [vmem:[#allocation26_spill] sm:$0xff] }
  0xb8   : > { %7590 = vmatprep.mubr.msk.bf16.mxu1 %vm12938_vm0, %v2086_v6  ;;  %v12951_v6 = vld [vmem:[#allocation23_spill] sm:$0xff] }
  0xba   : > { %7557 = vmatmul.mubr.msk.bf16.gmra.mxu0 %vm12946_vm8, %v12945_v18  ;;  %vm12953_vm8 = vmmov %vm12938_vm0 }
  0xbb   : > { %7560 = vmatprep.mubr.msk.bf16.mxu0 %vm12948_vm11, %v12947_v42  ;;  %vm12954_vm11 = vnez %v12863_v61  ;;  %v2091_v61 = vsel %vm8902_vm1, %v8546_v29, %v8541_v39  ;;  %vm12969_vm1 = vnez %v12894_v46 }
  0xbc   : > { %v2089_v3 = vsel %vm12954_vm11, %v8488_v32, %v8491_v2 }
  0xbf   : > { %7591 = vmatmul.mubr.msk.bf16.gmra.mxu1 %vm12949_vm7, %v2087_v14  ;;  %vm12957_vm7 = vmmov %vm12938_vm0  ;;  %v12958_v14 = vld [vmem:[#allocation28_spill] sm:$0xff] }
  0xc0   : > { %7594 = vmatprep.mubr.msk.bf16.mxu1 %vm12950_vm3, %v2088_v28  ;;  %vm12959_vm3 = vmmov %vm12938_vm0  ;;  %v12960_v28 = vld [vmem:[#allocation30_spill] sm:$0xff] }
  0xc2   : > { %7561 = vmatmul.mubr.msk.bf16.gmra.mxu0 %vm12938_vm0, %v12951_v6 }
  0xc3   : > { %7564 = vmatprep.mubr.msk.bf16.mxu0 %vm12953_vm8, %v12952_v37  ;;  %vm12961_vm8 = vnez %v12881_v9  ;;  %v2094_v9 = vsel %vm12969_vm1, %v8615_v45, %v8639_v34 }
  0xc4   : > { %v2092_v51 = vsel %vm12961_vm8, %v8574_v44, %v8567_v27 }
  0xc7   : > { %7595 = vmatmul.mubr.msk.bf16.gmra.mxu1 %vm12956_vm15, %v2089_v3  ;;  %vm12963_vm15 = vmmov %vm12938_vm0  ;;  %v12966_v3 = vld [vmem:[#allocation5_spill] sm:$0xff] }
  0xc8   : > { %7598 = vmatprep.mubr.msk.bf16.mxu1 %vm12957_vm7, %v2090_v4  ;;  %v12964_v4 = vld [vmem:[#allocation33_spill] sm:$0xff]  ;;  %vm12965_vm7 = vmmov %vm12938_vm0 }
  0xca   : > { %7565 = vmatmul.mubr.msk.bf16.gmra.mxu0 %vm12959_vm3, %v12958_v14  ;;  %vm12967_vm3 = vmmov %vm12938_vm0 }
  0xcb   : > { %7568 = vmatprep.mubr.msk.bf16.mxu0 %vm12938_vm0, %v12960_v28  ;;  %vm12968_vm0 = vnez %v12889_v60  ;;  %vm12970_vm8 = vmmov %vm12967_vm3 }
  0xcc   : > { %v2093_v15 = vsel %vm12968_vm0, %v8602_v47, %v8597_v24 }
  0xcf   : > { %7599 = vmatmul.mubr.msk.bf16.gmra.mxu1 %vm12962_vm10, %v2091_v61  ;;  %vm12971_vm10 = vmmov %vm12967_vm3 }
  0xd0   : > { %7602 = vmatprep.mubr.msk.bf16.mxu1 %vm12963_vm15, %v2092_v51  ;;  %v12972_v51 = vld [vmem:[#allocation8_spill] sm:$0xff] }
  0xd1   : > { %vm12973_vm15 = vnez %v12972_v51  ;;  %v12976_v51 = vld [vmem:[#allocation12_spill] sm:$0xff] }
  0xd2   : > { %7569 = vmatmul.mubr.msk.bf16.gmra.mxu0 %vm12965_vm7, %v12964_v4  ;;  %v7410_v61 = vpop.f32.mrf.mxu0  ;;  %v2788_v43 = vsel %vm12973_vm15, %v8276_v56, %v8255_v48  ;;  %vm12974_vm7 = vmmov %vm12967_vm3 }
  0xd3   : > { %7572 = vmatprep.mubr.msk.bf16.mxu0 %vm12967_vm3, %v12966_v3  ;;  %vm12978_vm15 = vmmov %vm12967_vm3 }
  0xd4   : > { %v1479_v55 = vpop.f32.mrf.mxu0 }
  0xd7   : > { %7603 = vmatmul.mubr.msk.bf16.gmra.mxu1 %vm12970_vm8, %v2093_v15  ;;  %v2095_v15 = vsel %vm8965_vm13, %v8993_v7, %v8997_v8  ;;  %vm12975_vm8 = vmmov %vm12967_vm3 }
  0xd8   : > { %7606 = vmatprep.mubr.msk.bf16.mxu1 %vm12971_vm10, %v2094_v9  ;;  %v7411_v9 = vpop.f32.mrf.mxu0  ;;  %vm12977_vm10 = vnez %v12976_v51  ;;  %vm12982_vm13 = vmmov %vm12975_vm8 }
  0xd9   : > { %v2789_v36 = vsel %vm12977_vm10, %v8304_v13, %v8314_v20 }
  0xda   : > { %7573 = vmatmul.mubr.msk.bf16.gmra.mxu0 %vm12974_vm7, %v8570_v63  ;;  %v1482_v46 = vpop.f32.mrf.mxu0  ;;  %vm12979_vm7 = vcmask 1041408  }
  0xdb   : > { %7612 = vmatprep.mubr.msk.bf16.mxu0 %vm12967_vm3, %v2788_v43  ;;  %v3315_v43 = vsel %vm12979_vm7, %v6863_v35, 0  ;;  %vm12981_vm3 = vnez %v12980_v19  ;;  %vm12985_vm7 = vnez %v12730_v21 }
  0xdc   : > { %v7414_v60 = vpop.f32.mrf.mxu0  ;;  %v2790_v50 = vsel %vm12981_vm3, %v8337_v41, %v8342_v49 }
  0xde   : > { %v1495_v10 = vpop.f32.mrf.mxu0  ;;  %v7444_v51 = vpop.f32.mrf.mxu1 }
  0xdf   : > { %7607 = vmatmul.mubr.msk.bf16.gmra.mxu1 %vm12975_vm8, %v2095_v15  ;;  %v9157_v20 = vadd.f32 %v7444_v51, %v7410_v61  ;;  %v12987_v61 = vld [vmem:[#allocation19_spill] sm:$0xff] }
  0xe0   : > { %7646 = vmatprep.mubr.msk.bf16.mxu1 %vm12978_vm15, %v12925_v38  ;;  %v7415_v15 = vpop.f32.mrf.mxu0  ;;  %vm12984_vm15 = vmmov %vm12975_vm8  ;;  %v1691_v35 = vpop.f32.mrf.mxu1  ;;  %v2791_v38 = vsel %vm12985_vm7, %v8353_v57, %v8363_v1 }
  0xe1   : > { %12983 = vst [vmem:[#allocation34_spill] sm:$0xff] %v9157_v20  ;;  %v9165_v19 = vadd.f32 %v1691_v35, %v1479_v55 }
  0xe2   : > { %7613 = vmatmul.mubr.msk.bf16.vlgmr.msra.gmra.mxu0 %vm12982_vm13, %v2789_v36  ;;  %v1498_v13 = vpop.f32.mrf.mxu0  ;;  %vm12986_vm13 = vmmov %vm12975_vm8  ;;  %v7445_v36 = vpop.f32.mrf.mxu1 }
  0xe3   : > { %7679 = vmatpush3.bf16.msra.mxu0 %v3315_v43  ;;  %7616 = vmatprep.mubr.msk.bf16.mxu0 %vm12975_vm8, %v2790_v50  ;;  %vm12988_vm8 = vnez %v12987_v61  ;;  %v9173_v43 = vadd.f32 %v7445_v36, %v7411_v9  ;;  %vm12990_vm7 = vmmov %vm12986_vm13  ;;  %v12993_v9 = vld [vmem:[#allocation22_spill] sm:$0xff] }
  0xe4   : > { %v7418_v50 = vpop.f32.mrf.mxu0  ;;  %v2792_v51 = vsel %vm12988_vm8, %v8383_v26, %v8391_v40  ;;  %v1694_v20 = vpop.f32.mrf.mxu1  ;;  %vm12994_vm8 = vnez %v12993_v9 }
  0xe5   : > { %v9176_v21 = vadd.f32 %v1694_v20, %v1482_v46  ;;  %v2793_v36 = vsel %vm12994_vm8, %v8410_v59, %v8407_v58 }
  0xe6   : > { %v7448_v35 = vpop.f32.mrf.mxu1 }
  0xe7   : > { %7647 = vmatmul.mubr.msk.bf16.vlgmr.msra.gmra.mxu1 %vm12984_vm15, %v12927_v5  ;;  %v1511_v5 = vpop.f32.mrf.mxu0  ;;  %vm12989_vm15 = vmmov %vm12986_vm13 }
  0xe8   : > { %7650 = vmatprep.mubr.msk.bf16.mxu1 %vm12986_vm13, %v12933_v16  ;;  %v9179_v16 = vadd.f32 %v7448_v35, %v7414_v60  ;;  %vm12992_vm13 = vmmov %vm12990_vm7  ;;  %v1707_v61 = vpop.f32.mrf.mxu1  ;;  %v12996_v60 = vld [vmem:[#allocation24_spill] sm:$0xff] }
  0xe9   : > { %v7419_v55 = vpop.f32.mrf.mxu0  ;;  %vm12998_vm8 = vmmov %vm12992_vm13 }
  0xea   : > { %7617 = vmatmul.mubr.msk.bf16.gmra.mxu0 %vm12989_vm15, %v2791_v38  ;;  %12991 = vst [vmem:[#allocation6_spill] sm:$0xff] %v9179_v16  ;;  %v9187_v38 = vadd.f32 %v1707_v61, %v1495_v10  ;;  %vm12995_vm15 = vmmov %vm12990_vm7  ;;  %v7449_v46 = vpop.f32.mrf.mxu1 }
  0xeb   : > { %7620 = vmatprep.mubr.msk.bf16.mxu0 %vm12990_vm7, %v2792_v51  ;;  %v1514_v1 = vpop.f32.mrf.mxu0  ;;  %vm12997_vm7 = vnez %v12996_v60  ;;  %v9195_v35 = vadd.f32 %v7449_v46, %v7415_v15 }
  0xec   : > { %v2794_v51 = vsel %vm12997_vm7, %v8436_v54, %v8440_v62  ;;  %v1710_v16 = vpop.f32.mrf.mxu1  ;;  %vm13000_vm7 = vnez %v12749_v25 }
  0xed   : > { %v7422_v20 = vpop.f32.mrf.mxu0  ;;  %v9198_v9 = vadd.f32 %v1710_v16, %v1498_v13  ;;  %v2795_v15 = vsel %vm13000_vm7, %v8451_v17, %v8463_v31 }
  0xee   : > { %v7452_v61 = vpop.f32.mrf.mxu1 }
  0xef   : > { %7651 = vmatmul.mubr.msk.bf16.gmra.mxu1 %vm12992_vm13, %v12934_v30  ;;  %v1527_v30 = vpop.f32.mrf.mxu0 }
  0xf0   : > { %7654 = vmatprep.mubr.msk.bf16.mxu1 %vm12995_vm15, %v12940_v52  ;;  %v9201_v52 = vadd.f32 %v7452_v61, %v7418_v50  ;;  %vm12999_vm15 = vmmov %vm12998_vm8  ;;  %v1723_v60 = vpop.f32.mrf.mxu1  ;;  %v13002_v50 = vld [vmem:[#allocation29_spill] sm:$0xff] }
  0xf1   : > { %v7423_v10 = vpop.f32.mrf.mxu0 }
  0xf2   : > { %7621 = vmatmul.mubr.msk.bf16.gmra.mxu0 %vm12992_vm13, %v2793_v36  ;;  %v9209_v36 = vadd.f32 %v1723_v60, %v1511_v5  ;;  %vm13001_vm13 = vmmov %vm12998_vm8  ;;  %v7453_v16 = vpop.f32.mrf.mxu1 }
  0xf3   : > { %7624 = vmatprep.mubr.msk.bf16.mxu0 %vm12998_vm8, %v2794_v51  ;;  %v1530_v58 = vpop.f32.mrf.mxu0  ;;  %vm13003_vm8 = vnez %v13002_v50  ;;  %v9217_v51 = vadd.f32 %v7453_v16, %v7419_v55  ;;  %vm13005_vm7 = vmmov %vm13001_vm13  ;;  %v13008_v55 = vld [vmem:[#allocation32_spill] sm:$0xff] }
  0xf4   : > { %v2796_v46 = vsel %vm13003_vm8, %v8491_v2, %v8488_v32  ;;  %v1726_v61 = vpop.f32.mrf.mxu1  ;;  %vm13009_vm8 = vnez %v13008_v55 }
  0xf5   : > { %v7426_v13 = vpop.f32.mrf.mxu0  ;;  %v9220_v25 = vadd.f32 %v1726_v61, %v1514_v1 }
  0xf6   : > { %v7456_v60 = vpop.f32.mrf.mxu1 }
  0xf7   : > { %7655 = vmatmul.mubr.msk.bf16.gmra.mxu1 %vm12999_vm15, %v12942_v53  ;;  %v1543_v53 = vpop.f32.mrf.mxu0  ;;  %vm13004_vm15 = vmmov %vm13001_vm13 }
  0xf8   : > { %7658 = vmatprep.mubr.msk.bf16.mxu1 %vm13001_vm13, %v12945_v18  ;;  %v9223_v18 = vadd.f32 %v7456_v60, %v7422_v20  ;;  %vm13007_vm13 = vmmov %vm13005_vm7  ;;  %v1739_v50 = vpop.f32.mrf.mxu1  ;;  %v13011_v20 = vld [vmem:[#allocation35_spill] sm:$0xff] }
  0xf9   : > { %v7427_v5 = vpop.f32.mrf.mxu0  ;;  %v9233_v16 = vadd.f32 %v1739_v50, %v1527_v30 }
  0xfa   : > { %7625 = vmatmul.mubr.msk.bf16.gmra.mxu0 %vm13004_vm15, %v2795_v15  ;;  %v2797_v15 = vsel %vm13009_vm8, %v8510_v23, %v8520_v0  ;;  %vm13010_vm15 = vmmov %vm13005_vm7 }
  0xfb   : > { %7628 = vmatprep.mubr.msk.bf16.mxu0 %vm13005_vm7, %v2796_v46  ;;  %v9225_v31 = vpop.f32.mrf.mxu0  ;;  %v7457_v46 = vpop.f32.mrf.mxu1  ;;  %vm13012_vm7 = vnez %v13011_v20  ;;  %vm13013_vm8 = vmmov %vm13007_vm13 }
  0xfc   : > { %13006 = vst [vmem:[#allocation40_spill] sm:$0xff] %v9225_v31  ;;  %v2798_v61 = vsel %vm13012_vm7, %v8541_v39, %v8546_v29  ;;  %v9241_v60 = vadd.f32 %v7457_v46, %v7423_v10  ;;  %v13016_v10 = vld [vmem:[#allocation37_spill] sm:$0xff] }
  0xfd   : > { %v7430_v1 = vpop.f32.mrf.mxu0  ;;  %v1742_v31 = vpop.f32.mrf.mxu1  ;;  %vm13017_vm7 = vnez %v13016_v10 }
  0xfe   : > { %v9244_v55 = vadd.f32 %v1742_v31, %v1530_v58 }
  0xff   : > { %7659 = vmatmul.mubr.msk.bf16.gmra.mxu1 %vm13007_vm13, %v12947_v42  ;;  %v1559_v42 = vpop.f32.mrf.mxu0  ;;  %v7460_v50 = vpop.f32.mrf.mxu1 }
 0x100   : > { %7662 = vmatprep.mubr.msk.bf16.mxu1 %vm13010_vm15, %v12951_v6  ;;  %v9247_v6 = vadd.f32 %v7460_v50, %v7426_v13  ;;  %vm13015_vm15 = vmmov %vm13013_vm8  ;;  %v13019_v13 = vld [vmem:[#allocation38_spill] sm:$0xff] }
 0x101   : > { %v7431_v30 = vpop.f32.mrf.mxu0  ;;  %v1755_v20 = vpop.f32.mrf.mxu1 }
 0x102   : > { %7629 = vmatmul.mubr.msk.bf16.gmra.mxu0 %vm13007_vm13, %v2797_v15  ;;  %v2799_v15 = vsel %vm13017_vm7, %v8567_v27, %v8574_v44  ;;  %v9257_v46 = vadd.f32 %v1755_v20, %v1543_v53  ;;  %vm13018_vm13 = vmmov %vm13013_vm8 }
 0x103   : > { %7632 = vmatprep.mubr.msk.bf16.mxu0 %vm13013_vm8, %v2798_v61  ;;  %v9249_v0 = vpop.f32.mrf.mxu0  ;;  %v7461_v31 = vpop.f32.mrf.mxu1  ;;  %vm13020_vm8 = vnez %v13019_v13  ;;  %vm13023_vm7 = vmmov %vm13018_vm13 }
 0x104   : > { %13014 = vst [vmem:[#allocation3_spill] sm:$0xff] %v9249_v0  ;;  %v2800_v61 = vsel %vm13020_vm8, %v8597_v24, %v8602_v47  ;;  %v9265_v50 = vadd.f32 %v7461_v31, %v7427_v5  ;;  %v13026_v5 = vld [vmem:[#allocation39_spill] sm:$0xff] }
 0x105   : > { %v7434_v58 = vpop.f32.mrf.mxu0  ;;  %v9268_v0 = vpop.f32.mrf.mxu1  ;;  %vm13027_vm8 = vnez %v13026_v5 }
 0x106   : > { %13022 = vst [vmem:[#allocation2_spill] sm:$0xff] %v9268_v0  ;;  %v2801_v31 = vsel %vm13027_vm8, %v8639_v34, %v8615_v45 }
 0x107   : > { %7663 = vmatmul.mubr.msk.bf16.gmra.mxu1 %vm13015_vm15, %v12952_v37  ;;  %v1575_v37 = vpop.f32.mrf.mxu0  ;;  %vm13021_vm15 = vmmov %vm13018_vm13 }
 0x108   : > { %7666 = vmatprep.mubr.msk.bf16.mxu1 %vm13018_vm13, %v12958_v14  ;;  %vm13024_vm13 = vmmov %vm13023_vm7 }
 0x109   : > { %v7435_v53 = vpop.f32.mrf.mxu0  ;;  %v7464_v20 = vpop.f32.mrf.mxu1  ;;  %vm13031_vm3 = vmmov %vm13024_vm13 }
 0x10a   : > { %7633 = vmatmul.mubr.msk.bf16.gmra.mxu0 %vm13021_vm15, %v2799_v15  ;;  %v9275_v10 = vadd.f32 %v7464_v20, %v7430_v1  ;;  %vm13028_vm15 = vmmov %vm13023_vm7 }
 0x10b   : > { %7636 = vmatprep.mubr.msk.bf16.mxu0 %vm13023_vm7, %v2800_v61  ;;  %v9273_v14 = vpop.f32.mrf.mxu0  ;;  %v1771_v15 = vpop.f32.mrf.mxu1  ;;  %v13029_v61 = vld [vmem:[#allocation41_spill] sm:$0xff] }
 0x10c   : > { %13025 = vst [vmem:[#allocation4_spill] sm:$0xff] %v9273_v14  ;;  %vm13030_vm7 = vnez %v13029_v61  ;;  %v9287_v0 = vadd.f32 %v1771_v15, %v1559_v42  ;;  %v13041_v61 = vld [vmem:[#allocation45_spill] sm:$0xff] }
 0x10d   : > { %v2802_v13 = vsel %vm13030_vm7, %v8997_v8, %v8993_v7  ;;  %v7438_v1 = vpop.f32.mrf.mxu0  ;;  %vm13033_vm7 = vmmov %vm13031_vm3 }
 0x10f   : > { %7667 = vmatmul.mubr.msk.bf16.gmra.mxu1 %vm13024_vm13, %v12960_v28  ;;  %v7465_v28 = vpop.f32.mrf.mxu1 }
 0x110   : > { %7670 = vmatprep.mubr.msk.bf16.mxu1 %vm13028_vm15, %v12964_v4  ;;  %v9290_v20 = vadd.f32 %v7465_v28, %v7431_v30  ;;  %vm13032_vm15 = vmmov %vm13031_vm3  ;;  %v1591_v4 = vpop.f32.mrf.mxu0  ;;  %v2804_v30 = vsel %vm12921_vm14, %v8255_v48, %v8276_v56 }
 0x111   : > { %v9293_v5 = vpop.f32.mrf.mxu1 }
 0x112   : > { %7637 = vmatmul.mubr.msk.bf16.gmra.mxu0 %vm13024_vm13, %v2801_v31  ;;  %vm13038_vm13 = vmmov %vm13031_vm3 }
 0x113   : > { %7640 = vmatprep.mubr.msk.bf16.mxu0 %vm13031_vm3, %v2802_v13  ;;  %v7468_v14 = vpop.f32.mrf.mxu1  ;;  %v13034_v13 = vsel %vm8645_vm12, %v9003_v22, %v8984_v11 }
 0x114   : > { %v9297_v45 = vadd.f32 %v7468_v14, %v7434_v58  ;;  %v7439_v58 = vpop.f32.mrf.mxu0 }
 0x115   : > { %v1787_v42 = vpop.f32.mrf.mxu1 }
 0x116   : > { %v9305_v31 = vadd.f32 %v1787_v42, %v1575_v37  ;;  %v9318_v28 = vpop.f32.mrf.mxu0  ;;  %v13039_v37 = vld [vmem:[#allocation14_spill] sm:$0xff]  ;;  %v13040_v42 = vld [vmem:[#allocation15_spill] sm:$0xff] }
 0x117   : > { %7671 = vmatmul.mubr.msk.bf16.gmra.mxu1 %vm13032_vm15, %v12966_v3  ;;  %v7469_v14 = vpop.f32.mrf.mxu1  ;;  %13037 = vst [vmem:[#allocation10_spill] sm:$0xff] %v9318_v28  ;;  %vm13042_vm15 = vnez %v13041_v61 }
 0x118   : > { %7674 = vmatprep.mubr.msk.bf16.mxu1 %vm13033_vm7, %v8570_v63  ;;  %v9313_v15 = vadd.f32 %v7469_v14, %v7435_v53  ;;  %vm13035_vm7 = vmmov %vm13031_vm3 }
 0x119   : > { %v9316_v63 = vpop.f32.mrf.mxu1 }
 0x11a   : > { %7641 = vmatmul.mubr.msk.bf16.gmra.mxu0 %vm13031_vm3, %v13034_v13  ;;  %13036 = vst [vmem:[#allocation9_spill] sm:$0xff] %v9316_v63  ;;  %v2805_v13 = vsel %vm13042_vm15, %v13040_v42, %v13039_v37 }
 0x11b   : > { %7680 = vmatprep.mubr.msk.bf16.mxu0 %vm13035_vm7, %v2804_v30  ;;  %v2806_v30 = vsel %vm12929_vm5, %v8342_v49, %v8337_v41  ;;  %vm13045_vm7 = vmmov %vm13031_vm3 }
 0x11c   : > { %v7472_v48 = vpop.f32.mrf.mxu1 }
 0x11d   : > { %v9322_v56 = vadd.f32 %v7472_v48, %v7438_v1 }
 0x11e   : > { %v1803_v12 = vpop.f32.mrf.mxu1 }
 0x11f   : > { %7675 = vmatmul.mubr.msk.bf16.gmra.mxu1 %vm13038_vm13, %v12966_v3  ;;  %v9332_v14 = vadd.f32 %v1803_v12, %v1591_v4  ;;  %v13044_v3 = vld [vmem:[#allocation34_spill] sm:$0xff]  ;;  %v13046_v12 = vld [vmem:[#allocation20_spill] sm:$0xff]  ;;  %vm13049_vm13 = vmmov %vm13031_vm3 }
 0x120   : > { %v7473_v28 = vpop.f32.mrf.mxu1 }
 0x121   : > { %v9336_v48 = vadd.f32 %v7473_v28, %v7439_v58 }
 0x122   : > { %v7478_v33 = vpop.f32.mrf.mxu0  ;;  %7681 = vmatmul.mubr.msk.bf16.vlgmr.msra.gmra.mxu0 %vm13031_vm3, %v2805_v13  ;;  %v9339_v37 = vpop.f32.mrf.mxu1 }
 0x123   : > { %v2034_v1 = vadd.f32 %v7478_v33, %v13044_v3  ;;  %7684 = vmatprep.mubr.msk.bf16.mxu0 %vm13045_vm7, %v2806_v30  ;;  %v2807_v33 = vsel %vm8713_vm9, %v13046_v12, %v8353_v57  ;;  %v2808_v30 = vsel %vm12937_vm2, %v8391_v40, %v8383_v26  ;;  %vm13054_vm7 = vmmov %vm13031_vm3 }
 0x124   : > { %v1905_v61 = vpop.f32.mrf.mxu0 }
 0x125   : > { %v2032_v42 = vadd.f32 %v1905_v61, %v9165_v19 }
 0x126   : > { %v7479_v63 = vpop.f32.mrf.mxu0 }
 0x127   : > { %v7512_v53 = vpop.f32.mrf.mxu1  ;;  %v2035_v41 = vadd.f32 %v7479_v63, %v9173_v43 }
 0x128   : > { %v9343_v49 = vadd.f32 %v7512_v53, %v2034_v1  ;;  %v1908_v58 = vpop.f32.mrf.mxu0  ;;  %v13050_v53 = vld [vmem:[#allocation6_spill] sm:$0xff] }
 0x129   : > { %v2183_v28 = vpop.f32.mrf.mxu1  ;;  %v9354_v19 = vadd.f32 %v1908_v58, %v9176_v21 }
 0x12a   : > { %v9356_v61 = vadd.f32 %v2183_v28, %v2032_v42  ;;  %v7482_v43 = vpop.f32.mrf.mxu0  ;;  %7685 = vmatmul.mubr.msk.bf16.gmra.mxu0 %vm13049_vm13, %v2807_v33  ;;  %v13051_v33 = vld [vmem:[#allocation25_spill] sm:$0xff]  ;;  %vm13055_vm13 = vmmov %vm13031_vm3 }
 0x12b   : > { %v7513_v63 = vpop.f32.mrf.mxu1  ;;  %v2038_v3 = vadd.f32 %v7482_v43, %v13050_v53  ;;  %7688 = vmatprep.mubr.msk.bf16.mxu0 %vm13031_vm3, %v2808_v30  ;;  %v2809_v43 = vsel %vm8757_vm6, %v13051_v33, %v8410_v59  ;;  %v2810_v53 = vsel %vm8765_vm4, %v8440_v62, %v8436_v54  ;;  %vm13061_vm12 = vmmov %vm13055_vm13  ;;  %vm13378_vm4 = vsmask.f32 256 }
 0x12c   : > { %v9360_v1 = vadd.f32 %v7513_v63, %v2035_v41  ;;  %v1921_v57 = vpop.f32.mrf.mxu0 }
 0x12d   : > { %v9363_v12 = vpop.f32.mrf.mxu1  ;;  %v2036_v26 = vadd.f32 %v1921_v57, %v9187_v38 }
 0x12e   : > { %v7483_v40 = vpop.f32.mrf.mxu0 }
 0x12f   : > { %v7516_v21 = vpop.f32.mrf.mxu1  ;;  %v2039_v42 = vadd.f32 %v7483_v40, %v9195_v35 }
 0x130   : > { %v9367_v58 = vadd.f32 %v7516_v21, %v2038_v3  ;;  %v1924_v41 = vpop.f32.mrf.mxu0 }
 0x131   : > { %v2199_v63 = vpop.f32.mrf.mxu1  ;;  %v9378_v38 = vadd.f32 %v1924_v41, %v9198_v9 }
 0x132   : > { %v9380_v57 = vadd.f32 %v2199_v63, %v2036_v26  ;;  %v7486_v35 = vpop.f32.mrf.mxu0  ;;  %7689 = vmatmul.mubr.msk.bf16.gmra.mxu0 %vm13054_vm7, %v2809_v43  ;;  %v13056_v43 = vld [vmem:[#allocation31_spill] sm:$0xff] }
 0x133   : > { %v7517_v3 = vpop.f32.mrf.mxu1  ;;  %v2042_v40 = vadd.f32 %v7486_v35, %v9201_v52  ;;  %7692 = vmatprep.mubr.msk.bf16.mxu0 %vm13055_vm13, %v2810_v53  ;;  %v13057_v63 = vld [vmem:[#allocation51_spill] sm:$0xff]  ;;  %v13059_v53 = vld [vmem:[#allocation52_spill] sm:$0xff] }
 0x134   : > { %v9384_v21 = vadd.f32 %v7517_v3, %v2039_v42  ;;  %v1937_v59 = vpop.f32.mrf.mxu0  ;;  %vm13058_vm3 = vnez %v13057_v63  ;;  %vm13060_vm7 = vnez %v13059_v53 }
 0x135   : > { %v9387_v33 = vpop.f32.mrf.mxu1  ;;  %v2040_v54 = vadd.f32 %v1937_v59, %v9209_v36  ;;  %v2811_v52 = vsel %vm13058_vm3, %v13056_v43, %v8451_v17  ;;  %v2812_v3 = vsel %vm13060_vm7, %v8488_v32, %v8491_v2  ;;  %vm13362_vm3 = vcmask 31744  }
 0x136   : > { %v7487_v62 = vpop.f32.mrf.mxu0 }
 0x137   : > { %v7520_v9 = vpop.f32.mrf.mxu1  ;;  %v2043_v26 = vadd.f32 %v7487_v62, %v9217_v51 }
 0x138   : > { %v9391_v41 = vadd.f32 %v7520_v9, %v2042_v40  ;;  %v1940_v42 = vpop.f32.mrf.mxu0 }
 0x139   : > { %v2215_v35 = vpop.f32.mrf.mxu1  ;;  %v9402_v36 = vadd.f32 %v1940_v42, %v9220_v25 }
 0x13a   : > { %v9404_v59 = vadd.f32 %v2215_v35, %v2040_v54  ;;  %v7490_v51 = vpop.f32.mrf.mxu0  ;;  %7693 = vmatmul.mubr.msk.bf16.gmra.mxu0 %vm13055_vm13, %v2811_v52  ;;  %v13062_v52 = vld [vmem:[#allocation36_spill] sm:$0xff] }
 0x13b   : > { %v7521_v40 = vpop.f32.mrf.mxu1  ;;  %v2046_v62 = vadd.f32 %v7490_v51, %v9223_v18  ;;  %7696 = vmatprep.mubr.msk.bf16.mxu0 %vm13061_vm12, %v2812_v3  ;;  %v2813_v18 = vsel %vm12954_vm11, %v13062_v52, %v8510_v23  ;;  %v13064_v3 = vld [vmem:[#allocation54_spill] sm:$0xff]  ;;  %vm13066_vm11 = vmmov %vm13055_vm13 }
 0x13c   : > { %v9408_v9 = vadd.f32 %v7521_v40, %v2043_v26  ;;  %v1953_v17 = vpop.f32.mrf.mxu0  ;;  %vm13065_vm12 = vnez %v13064_v3 }
 0x13d   : > { %v9411_v43 = vpop.f32.mrf.mxu1  ;;  %v2044_v32 = vadd.f32 %v1953_v17, %v9233_v16  ;;  %v2814_v40 = vsel %vm13065_vm12, %v8546_v29, %v8541_v39  ;;  %vm13071_vm12 = vcmask 31744  }
 0x13e   : > { %v7491_v2 = vpop.f32.mrf.mxu0  ;;  %vm13072_vm7 = vmmov %vm13071_vm12 }
 0x13f   : > { %v7524_v25 = vpop.f32.mrf.mxu1  ;;  %v2047_v54 = vadd.f32 %v7491_v2, %v9241_v60 }
 0x140   : > { %v9415_v42 = vadd.f32 %v7524_v25, %v2046_v62  ;;  %v1956_v26 = vpop.f32.mrf.mxu0 }
 0x141   : > { %v2231_v51 = vpop.f32.mrf.mxu1  ;;  %v9426_v16 = vadd.f32 %v1956_v26, %v9244_v55 }
 0x142   : > { %v9428_v17 = vadd.f32 %v2231_v51, %v2044_v32  ;;  %v7494_v60 = vpop.f32.mrf.mxu0  ;;  %7697 = vmatmul.mubr.msk.bf16.gmra.mxu0 %vm13055_vm13, %v2813_v18  ;;  %v13067_v18 = vld [vmem:[#allocation55_spill] sm:$0xff] }
 0x143   : > { %v7525_v62 = vpop.f32.mrf.mxu1  ;;  %v2050_v2 = vadd.f32 %v7494_v60, %v9247_v6  ;;  %7700 = vmatprep.mubr.msk.bf16.mxu0 %vm13066_vm11, %v2814_v40  ;;  %vm13068_vm13 = vnez %v13067_v18  ;;  %v13069_v40 = vld [vmem:[#allocation56_spill] sm:$0xff] }
 0x144   : > { %v9432_v25 = vadd.f32 %v7525_v62, %v2047_v54  ;;  %v1969_v23 = vpop.f32.mrf.mxu0  ;;  %v2815_v6 = vsel %vm13068_vm13, %v8574_v44, %v8567_v27  ;;  %vm13070_vm11 = vnez %v13069_v40  ;;  %vm13262_vm13 = vcmask 31744  }
 0x145   : > { %v9435_v52 = vpop.f32.mrf.mxu1  ;;  %v2048_v39 = vadd.f32 %v1969_v23, %v9257_v46  ;;  %v2816_v60 = vsel %vm13070_vm11, %v8602_v47, %v8597_v24 }
 0x146   : > { %v7495_v29 = vpop.f32.mrf.mxu0 }
 0x147   : > { %v7528_v55 = vpop.f32.mrf.mxu1  ;;  %v2051_v32 = vadd.f32 %v7495_v29, %v9265_v50 }
 0x148   : > { %v9439_v26 = vadd.f32 %v7528_v55, %v2050_v2  ;;  %v9445_v54 = vpop.f32.mrf.mxu0 }
 0x149   : > { %v2247_v51 = vpop.f32.mrf.mxu1 }
 0x14a   : > { %v9451_v46 = vadd.f32 %v2247_v51, %v2048_v39  ;;  %v7498_v62 = vpop.f32.mrf.mxu0  ;;  %7701 = vmatmul.mubr.msk.bf16.gmra.mxu0 %vm13071_vm12, %v2815_v6  ;;  %v13073_v39 = vld [vmem:[#allocation42_spill] sm:$0xff]  ;;  %vm13076_vm12 = vmmov %vm13072_vm7 }
 0x14b   : > { %v7529_v50 = vpop.f32.mrf.mxu1  ;;  %v2054_v2 = vadd.f32 %v7498_v62, %v9275_v10  ;;  %7704 = vmatprep.mubr.msk.bf16.mxu0 %vm13072_vm7, %v2816_v60  ;;  %v2817_v10 = vsel %vm12968_vm0, %v13073_v39, %v8639_v34  ;;  %v2818_v62 = vsel %vm12969_vm1, %v8993_v7, %v8997_v8 }
 0x14c   : > { %v9455_v23 = vadd.f32 %v7529_v50, %v2051_v32  ;;  %v1985_v27 = vpop.f32.mrf.mxu0 }
 0x14d   : > { %v9458_v44 = vpop.f32.mrf.mxu1  ;;  %v2052_v29 = vadd.f32 %v1985_v27, %v9287_v0 }
 0x14e   : > { %v7499_v55 = vpop.f32.mrf.mxu0 }
 0x14f   : > { %v7532_v40 = vpop.f32.mrf.mxu1  ;;  %v2055_v24 = vadd.f32 %v7499_v55, %v9290_v20 }
 0x150   : > { %v9462_v47 = vadd.f32 %v7532_v40, %v2054_v2  ;;  %v9468_v32 = vpop.f32.mrf.mxu0 }
 0x151   : > { %v2263_v51 = vpop.f32.mrf.mxu1 }
 0x152   : > { %v9474_v0 = vadd.f32 %v2263_v51, %v2052_v29  ;;  %v7502_v50 = vpop.f32.mrf.mxu0  ;;  %7705 = vmatmul.mubr.msk.bf16.gmra.mxu0 %vm13072_vm7, %v2817_v10 }
 0x153   : > { %v7533_v20 = vpop.f32.mrf.mxu1  ;;  %v2058_v40 = vadd.f32 %v7502_v50, %v9297_v45  ;;  %7708 = vmatprep.mubr.msk.bf16.mxu0 %vm13076_vm12, %v2818_v62 }
 0x154   : > { %v9478_v2 = vadd.f32 %v7533_v20, %v2055_v24  ;;  %v2001_v34 = vpop.f32.mrf.mxu0  ;;  %v13077_v24 = vld [vmem:[#allocation59_spill] sm:$0xff] }
 0x155   : > { %v9481_v27 = vpop.f32.mrf.mxu1  ;;  %v2056_v55 = vadd.f32 %v2001_v34, %v9305_v31  ;;  %vm13078_vm7 = vnez %v13077_v24 }
 0x156   : > { %v7503_v39 = vpop.f32.mrf.mxu0  ;;  %v13079_v62 = vsel %vm13078_vm7, %v8984_v11, %v9003_v22 }
 0x157   : > { %v7536_v60 = vpop.f32.mrf.mxu1  ;;  %v2059_v7 = vadd.f32 %v7503_v39, %v9313_v15 }
 0x158   : > { %v9485_v8 = vadd.f32 %v7536_v60, %v2058_v40  ;;  %v9487_v29 = vpop.f32.mrf.mxu0 }
 0x159   : > { %v2279_v10 = vpop.f32.mrf.mxu1 }
 0x15a   : > { %v9489_v51 = vadd.f32 %v2279_v10, %v2056_v55  ;;  %v7506_v45 = vpop.f32.mrf.mxu0  ;;  %7709 = vmatmul.mubr.msk.bf16.gmra.mxu0 %vm13076_vm12, %v13079_v62  ;;  %vm13096_vm12 = vcmask 1041408  }
 0x15b   : > { %v7537_v31 = vpop.f32.mrf.mxu1  ;;  %v2062_v50 = vadd.f32 %v7506_v45, %v9322_v56  ;;  %vm13097_vm7 = vmmov %vm13096_vm12 }
 0x15c   : > { %v9498_v20 = vadd.f32 %v7537_v31, %v2059_v7  ;;  %v2017_v15 = vpop.f32.mrf.mxu0 }
 0x15d   : > { %v9500_v60 = vpop.f32.mrf.mxu1  ;;  %v2060_v40 = vadd.f32 %v2017_v15, %v9332_v14 }
 0x15e   : > { %v7507_v34 = vpop.f32.mrf.mxu0 }
 0x15f   : > { %v7540_v55 = vpop.f32.mrf.mxu1  ;;  %v2063_v39 = vadd.f32 %v7507_v34, %v9336_v48 }
 0x160   : > { %v9504_v10 = vadd.f32 %v7540_v55, %v2062_v50  ;;  %v9506_v24 = vpop.f32.mrf.mxu0 }
 0x161   : > { %v2295_v11 = vpop.f32.mrf.mxu1 }
 0x162   : > { %v9508_v22 = vadd.f32 %v2295_v11, %v2060_v40  ;;  %v7546_v62 = vpop.f32.mrf.mxu0 }
 0x163   : > { %v7541_v56 = vpop.f32.mrf.mxu1  ;;  %v2512_v7 = vadd.f32 %v7546_v62, %v9343_v49 }
 0x164   : > { %v9511_v45 = vadd.f32 %v7541_v56, %v2063_v39  ;;  %v2383_v31 = vpop.f32.mrf.mxu0 }
 0x165   : > { %v9513_v6 = vpop.f32.mrf.mxu1  ;;  %v2510_v14 = vadd.f32 %v2383_v31, %v9356_v61 }
 0x166   : > { %v7547_v15 = vpop.f32.mrf.mxu0 }
 0x167   : > { %v7580_v48 = vpop.f32.mrf.mxu1  ;;  %v2513_v50 = vadd.f32 %v7547_v15, %v9360_v1 }
 0x168   : > { %v9517_v34 = vadd.f32 %v7580_v48, %v2512_v7  ;;  %v9519_v55 = vpop.f32.mrf.mxu0 }
 0x169   : > { %v2629_v40 = vpop.f32.mrf.mxu1 }
 0x16a   : > { %v9521_v11 = vadd.f32 %v2629_v40, %v2510_v14  ;;  %v7550_v18 = vpop.f32.mrf.mxu0 }
 0x16b   : > { %v7581_v49 = vpop.f32.mrf.mxu1  ;;  %v2516_v39 = vadd.f32 %v7550_v18, %v9367_v58 }
 0x16c   : > { %v9524_v62 = vadd.f32 %v7581_v49, %v2513_v50  ;;  %v2399_v56 = vpop.f32.mrf.mxu0 }
 0x16d   : > { %v9526_v3 = vpop.f32.mrf.mxu1  ;;  %v9529_v61 = vadd.f32 %v2399_v56, %v9380_v57 }
 0x16e   : > { %v7551_v1 = vpop.f32.mrf.mxu0 }
 0x16f   : > { %v7584_v7 = vpop.f32.mrf.mxu1  ;;  %v2517_v31 = vadd.f32 %v7551_v1, %v9384_v21 }
 0x170   : > { %v9532_v15 = vadd.f32 %v7584_v7, %v2516_v39  ;;  %v9534_v14 = vpop.f32.mrf.mxu0 }
 0x171   : > { %v9536_v48 = vpop.f32.mrf.mxu1 }
 0x172   : > { %v7554_v40 = vpop.f32.mrf.mxu0 }
 0x173   : > { %v7585_v58 = vpop.f32.mrf.mxu1  ;;  %v2520_v18 = vadd.f32 %v7554_v40, %v9391_v41 }
 0x174   : > { %v9539_v50 = vadd.f32 %v7585_v58, %v2517_v31  ;;  %v2415_v49 = vpop.f32.mrf.mxu0 }
 0x175   : > { %v9541_v35 = vpop.f32.mrf.mxu1  ;;  %v9544_v57 = vadd.f32 %v2415_v49, %v9404_v59 }
 0x176   : > { %v7555_v56 = vpop.f32.mrf.mxu0 }
 0x177   : > { %v7588_v21 = vpop.f32.mrf.mxu1  ;;  %v2521_v39 = vadd.f32 %v7555_v56, %v9408_v9 }
 0x178   : > { %v9547_v1 = vadd.f32 %v7588_v21, %v2520_v18  ;;  %v9549_v7 = vpop.f32.mrf.mxu0 }
 0x179   : > { %v9551_v53 = vpop.f32.mrf.mxu1 }
 0x17a   : > { %v7558_v63 = vpop.f32.mrf.mxu0 }
 0x17b   : > { %v7589_v41 = vpop.f32.mrf.mxu1  ;;  %v2524_v31 = vadd.f32 %v7558_v63, %v9415_v42 }
 0x17c   : > { %v9554_v40 = vadd.f32 %v7589_v41, %v2521_v39  ;;  %v2431_v58 = vpop.f32.mrf.mxu0 }
 0x17d   : > { %v9556_v30 = vpop.f32.mrf.mxu1  ;;  %v9559_v59 = vadd.f32 %v2431_v58, %v9428_v17 }
 0x17e   : > { %v7559_v49 = vpop.f32.mrf.mxu0 }
 0x17f   : > { %13080 = vst [vmem:[#allocation11_spill] sm:$0xff] %v9559_v59  ;;  %v7592_v9 = vpop.f32.mrf.mxu1  ;;  %v2525_v18 = vadd.f32 %v7559_v49, %v9432_v25 }
 0x180   : > { %v9562_v56 = vadd.f32 %v7592_v9, %v2524_v31  ;;  %v9564_v21 = vpop.f32.mrf.mxu0 }
 0x181   : > { %v9566_v28 = vpop.f32.mrf.mxu1 }
 0x182   : > { %13081 = vst [vmem:[#allocation17_spill] sm:$0xff] %v9566_v28  ;;  %v7562_v13 = vpop.f32.mrf.mxu0 }
 0x183   : > { %v7593_v63 = vpop.f32.mrf.mxu1  ;;  %v2528_v42 = vadd.f32 %v7562_v13, %v9439_v26 }
 0x184   : > { %v9569_v39 = vadd.f32 %v7593_v63, %v2525_v18  ;;  %v2447_v41 = vpop.f32.mrf.mxu0 }
 0x185   : > { %v9571_v4 = vpop.f32.mrf.mxu1  ;;  %v9574_v17 = vadd.f32 %v2447_v41, %v9451_v46 }
 0x186   : > { %13082 = vst [vmem:[#allocation18_spill] sm:$0xff] %v9571_v4  ;;  %v7563_v58 = vpop.f32.mrf.mxu0 }
 0x187   : > { %13083 = vst [vmem:[#allocation21_spill] sm:$0xff] %v9574_v17  ;;  %v7596_v25 = vpop.f32.mrf.mxu1  ;;  %v2529_v31 = vadd.f32 %v7563_v58, %v9455_v23 }
 0x188   : > { %v9577_v49 = vadd.f32 %v7596_v25, %v2528_v42  ;;  %v9579_v9 = vpop.f32.mrf.mxu0 }
 0x189   : > { %13084 = vst [vmem:[#allocation23_spill] sm:$0xff] %v9579_v9  ;;  %v9581_v28 = vpop.f32.mrf.mxu1 }
 0x18a   : > { %13085 = vst [vmem:[#allocation26_spill] sm:$0xff] %v9581_v28  ;;  %v7566_v59 = vpop.f32.mrf.mxu0 }
 0x18b   : > { %v7597_v13 = vpop.f32.mrf.mxu1  ;;  %v2532_v26 = vadd.f32 %v7566_v59, %v9462_v47 }
 0x18c   : > { %v9584_v18 = vadd.f32 %v7597_v13, %v2529_v31  ;;  %v2463_v63 = vpop.f32.mrf.mxu0 }
 0x18d   : > { %v9586_v4 = vpop.f32.mrf.mxu1  ;;  %v9589_v46 = vadd.f32 %v2463_v63, %v9474_v0 }
 0x18e   : > { %13086 = vst [vmem:[#allocation28_spill] sm:$0xff] %v9586_v4  ;;  %v7567_v41 = vpop.f32.mrf.mxu0 }
 0x18f   : > { %13087 = vst [vmem:[#allocation30_spill] sm:$0xff] %v9589_v46  ;;  %v7600_v23 = vpop.f32.mrf.mxu1  ;;  %v2533_v42 = vadd.f32 %v7567_v41, %v9478_v2 }
 0x190   : > { %v9592_v58 = vadd.f32 %v7600_v23, %v2532_v26  ;;  %v9594_v25 = vpop.f32.mrf.mxu0 }
 0x191   : > { %13088 = vst [vmem:[#allocation33_spill] sm:$0xff] %v9594_v25  ;;  %v9596_v28 = vpop.f32.mrf.mxu1 }
 0x192   : > { %13089 = vst [vmem:[#allocation5_spill] sm:$0xff] %v9596_v28  ;;  %v7570_v17 = vpop.f32.mrf.mxu0 }
 0x193   : > { %v7601_v47 = vpop.f32.mrf.mxu1  ;;  %v2536_v59 = vadd.f32 %v7570_v17, %v9485_v8 }
 0x194   : > { %v9599_v31 = vadd.f32 %v7601_v47, %v2533_v42  ;;  %v2479_v13 = vpop.f32.mrf.mxu0 }
 0x195   : > { %v9601_v4 = vpop.f32.mrf.mxu1  ;;  %v9604_v0 = vadd.f32 %v2479_v13, %v9489_v51  ;;  %v6880_v51 = vld [vmem:[%s12424_s2 + $0x2] sm:$0x3] }
 0x196   : > { %13090 = vst [vmem:[#allocation14_spill] sm:$0xff] %v9601_v4  ;;  %v7571_v63 = vpop.f32.mrf.mxu0  ;;  %8027 = vmatprep.subr.msk.bf16.mxu1 %vm13096_vm12, %v6880_v51  ;;  %vm13122_vm12 = vmmov %vm13097_vm7 }
 0x197   : > { %13091 = vst [vmem:[#allocation15_spill] sm:$0xff] %v9604_v0  ;;  %v7604_v2 = vpop.f32.mrf.mxu1  ;;  %v2537_v26 = vadd.f32 %v7571_v63, %v9498_v20 }
 0x198   : > { %v9607_v41 = vadd.f32 %v7604_v2, %v2536_v59  ;;  %v9609_v23 = vpop.f32.mrf.mxu0  ;;  %v4083_v59 = vsel %vm13097_vm7, %v6880_v51, 0 }
 0x199   : > { %13092 = vst [vmem:[#allocation34_spill] sm:$0xff] %v9609_v23  ;;  %v9611_v28 = vpop.f32.mrf.mxu1  ;;  %7713 = vmatpush3.bf16.msra.mxu1 %v4083_v59 }
 0x19a   : > { %13093 = vst [vmem:[#allocation20_spill] sm:$0xff] %v9611_v28  ;;  %v7574_v46 = vpop.f32.mrf.mxu0 }
 0x19b   : > { %v7605_v8 = vpop.f32.mrf.mxu1  ;;  %v2540_v17 = vadd.f32 %v7574_v46, %v9504_v10 }
 0x19c   : > { %v9614_v42 = vadd.f32 %v7605_v8, %v2537_v26  ;;  %v2495_v47 = vpop.f32.mrf.mxu0 }
 0x19d   : > { %v9616_v4 = vpop.f32.mrf.mxu1  ;;  %v9622_v20 = vadd.f32 %v2495_v47, %v9508_v22 }
 0x19e   : > { %13094 = vst [vmem:[#allocation6_spill] sm:$0xff] %v9616_v4  ;;  %v7575_v13 = vpop.f32.mrf.mxu0 }
 0x19f   : > { %13095 = vst [vmem:[#allocation25_spill] sm:$0xff] %v9622_v20  ;;  %v7608_v63 = vpop.f32.mrf.mxu1  ;;  %v2541_v10 = vadd.f32 %v7575_v13, %v9511_v45 }
 0x1a0   : > { %v9627_v46 = vadd.f32 %v7608_v63, %v2540_v17  ;;  %v9629_v2 = vpop.f32.mrf.mxu0 }
 0x1a1   : > { %13098 = vst [vmem:[#allocation31_spill] sm:$0xff] %v9629_v2  ;;  %v9631_v26 = vpop.f32.mrf.mxu1 }
 0x1a2   : > { %13099 = vst [vmem:[#allocation36_spill] sm:$0xff] %v9631_v26  ;;  %v7614_v8 = vpop.f32.mrf.mxu0 }
 0x1a3   : > { %v7609_v4 = vpop.f32.mrf.mxu1  ;;  %v9634_v22 = vadd.f32 %v7614_v8, %v9517_v34 }
 0x1a4   : > { %v9636_v47 = vadd.f32 %v7609_v4, %v2541_v10  ;;  %v2907_v20 = vpop.f32.mrf.mxu0 }
 0x1a5   : > { %v9638_v51 = vpop.f32.mrf.mxu1  ;;  %v9641_v59 = vadd.f32 %v2907_v20, %v9521_v11 }
 0x1a6   : > { %13100 = vst [vmem:[#allocation42_spill] sm:$0xff] %v9638_v51  ;;  %v7615_v45 = vpop.f32.mrf.mxu0 }
 0x1a7   : > { %v9643_v17 = vpop.f32.mrf.mxu1  ;;  %v9646_v13 = vadd.f32 %v7615_v45, %v9524_v62 }
 0x1a8   : > { %v9648_v63 = vpop.f32.mrf.mxu0 }
 0x1a9   : > { %v9650_v2 = vpop.f32.mrf.mxu1 }
 0x1aa   : > { %v7618_v34 = vpop.f32.mrf.mxu0 }
 0x1ab   : > { %v9652_v8 = vpop.f32.mrf.mxu1  ;;  %v9655_v4 = vadd.f32 %v7618_v34, %v9532_v15 }
 0x1ac   : > { %v9657_v10 = vpop.f32.mrf.mxu0 }
 0x1ad   : > { %v9659_v11 = vpop.f32.mrf.mxu1 }
 0x1ae   : > { %v7619_v20 = vpop.f32.mrf.mxu0 }
 0x1af   : > { %v9662_v51 = vadd.f32 %v7619_v20, %v9539_v50  ;;  %v9664_v62 = vpop.f32.mrf.mxu1 }
 0x1b0   : > { %v9666_v45 = vpop.f32.mrf.mxu0 }
 0x1b1   : > { %13101 = vst [vmem:[#allocation61_spill] sm:$0xff] %v9662_v51  ;;  %v9671_v0 = vpop.f32.mrf.mxu1 }
 0x1b2   : > { %v7622_v26 = vpop.f32.mrf.mxu0 }
 0x1b3   : > { %v9669_v28 = vadd.f32 %v7622_v26, %v9547_v1  ;;  %v9678_v25 = vpop.f32.mrf.mxu1 }
 0x1b4   : > { %v9673_v15 = vpop.f32.mrf.mxu0 }
 0x1b5   : > { %13102 = vst [vmem:[#allocation62_spill] sm:$0xff] %v9669_v28  ;;  %13103 = vst [vmem:[#allocation63_spill] sm:$0xff] %v9673_v15  ;;  %v9682_v9 = vpop.f32.mrf.mxu1 }
 0x1b6   : > { %v7623_v34 = vpop.f32.mrf.mxu0  ;;  %13106 = vst [vmem:[#allocation66_spill] sm:$0xff] %v9682_v9 }
 0x1b7   : > { %v9676_v23 = vadd.f32 %v7623_v34, %v9554_v40  ;;  %v9689_v28 = vpop.f32.mrf.mxu1 }
 0x1b8   : > { %v9680_v50 = vpop.f32.mrf.mxu0 }
 0x1b9   : > { %13104 = vst [vmem:[#allocation64_spill] sm:$0xff] %v9676_v23  ;;  %13105 = vst [vmem:[#allocation65_spill] sm:$0xff] %v9680_v50  ;;  %v9696_v23 = vpop.f32.mrf.mxu1 }
 0x1ba   : > { %v7626_v20 = vpop.f32.mrf.mxu0 }
 0x1bb   : > { %v9685_v51 = vadd.f32 %v7626_v20, %v9562_v56  ;;  %v9703_v20 = vpop.f32.mrf.mxu1 }
 0x1bc   : > { %v9687_v1 = vpop.f32.mrf.mxu0 }
 0x1bd   : > { %13107 = vst [vmem:[#allocation67_spill] sm:$0xff] %v9685_v51  ;;  %13108 = vst [vmem:[#allocation68_spill] sm:$0xff] %v9687_v1 }
 0x1be   : > { %v7627_v26 = vpop.f32.mrf.mxu0 }
 0x1bf   : > { %v9692_v15 = vadd.f32 %v7627_v26, %v9569_v39  ;;  %v9710_v26 = vpop.f32.mrf.mxu1 }
 0x1c0   : > { %v9694_v40 = vpop.f32.mrf.mxu0 }
 0x1c1   : > { %13109 = vst [vmem:[#allocation69_spill] sm:$0xff] %v9692_v15  ;;  %13110 = vst [vmem:[#allocation70_spill] sm:$0xff] %v9694_v40 }
 0x1c2   : > { %v7630_v34 = vpop.f32.mrf.mxu0 }
 0x1c3   : > { %v9699_v50 = vadd.f32 %v7630_v34, %v9577_v49  ;;  %v9717_v34 = vpop.f32.mrf.mxu1 }
 0x1c4   : > { %v9701_v9 = vpop.f32.mrf.mxu0  ;;  %13117 = vst [vmem:[#allocation77_spill] sm:$0xff] %v9717_v34  ;;  %v13134_v34 = vld [vmem:[#allocation10_spill] sm:$0xff] }
 0x1c5   : > { %13111 = vst [vmem:[#allocation71_spill] sm:$0xff] %v9699_v50  ;;  %13112 = vst [vmem:[#allocation72_spill] sm:$0xff] %v9701_v9 }
 0x1c6   : > { %v7631_v56 = vpop.f32.mrf.mxu0 }
 0x1c7   : > { %v9706_v51 = vadd.f32 %v7631_v56, %v9584_v18  ;;  %v4049_v56 = vld [vmem:[%s12424_s2] sm:$0x3] }
 0x1c8   : > { %v9708_v1 = vpop.f32.mrf.mxu0  ;;  %8028 = vmatprep.subr.msk.bf16.mxu0 %vm13097_vm7, %v4049_v56 }
 0x1c9   : > { %13113 = vst [vmem:[#allocation73_spill] sm:$0xff] %v9706_v51  ;;  %13114 = vst [vmem:[#allocation74_spill] sm:$0xff] %v9708_v1  ;;  %v9727_v51 = vpop.f32.mrf.mxu1 }
 0x1ca   : > { %v7634_v39 = vpop.f32.mrf.mxu0 }
 0x1cb   : > { %v9713_v15 = vadd.f32 %v7634_v39, %v9592_v58 }
 0x1cc   : > { %v9715_v40 = vpop.f32.mrf.mxu0 }
 0x1cd   : > { %13115 = vst [vmem:[#allocation75_spill] sm:$0xff] %v9713_v15  ;;  %13116 = vst [vmem:[#allocation76_spill] sm:$0xff] %v9715_v40 }
 0x1ce   : > { %v7635_v49 = vpop.f32.mrf.mxu0 }
 0x1cf   : > { %v9720_v50 = vadd.f32 %v7635_v49, %v9599_v31  ;;  %v4295_v31 = vsel %vm13122_vm12, %v4049_v56, 0  ;;  %v9736_v49 = vpop.f32.mrf.mxu1  ;;  %v2311_v56 = vadd.f32 %v9363_v12, %v9354_v19  ;;  %v1807_v19 = vadd.f32 %v9339_v37, %v13134_v34  ;;  %v9781_v37 = vld [vmem:[%s12424_s2 + $0x4] sm:$0x3] }
 0x1d0   : > { %v9722_v9 = vpop.f32.mrf.mxu0  ;;  %13123 = vst [vmem:[#allocation82_spill] sm:$0xff] %v9736_v49  ;;  %7747 = vmatpush3.bf16.msra.mxu0 %v4295_v31  ;;  %v13130_v31 = vld [vmem:[#allocation2_spill] sm:$0xff]  ;;  %8029 = vmatprep.subr.msk.bf16.mxu1 %vm13097_vm7, %v9781_v37  ;;  %vm13138_vm12 = vcmask 31744  }
 0x1d1   : > { %13118 = vst [vmem:[#allocation78_spill] sm:$0xff] %v9720_v50  ;;  %13119 = vst [vmem:[#allocation79_spill] sm:$0xff] %v9722_v9  ;;  %v9743_v1 = vpop.f32.mrf.mxu1 }
 0x1d2   : > { %v7638_v18 = vpop.f32.mrf.mxu0  ;;  %13126 = vst [vmem:[#allocation85_spill] sm:$0xff] %v9743_v1  ;;  %v2511_v1 = vadd.f32 %v9519_v55, %v2311_v56  ;;  %vm13139_vm7 = vmmov %vm13138_vm12 }
 0x1d3   : > { %v9730_v58 = vadd.f32 %v7638_v18, %v9607_v41  ;;  %vm13140_vm1 = vmmov %vm13139_vm7 }
 0x1d4   : > { %v9733_v39 = vpop.f32.mrf.mxu0  ;;  %v2757_v55 = vadd.f32 %v9526_v3, %v2511_v1  ;;  %v2061_v3 = vadd.f32 %v9506_v24, %v1807_v19  ;;  %vm13141_vm0 = vmmov %vm13140_vm1 }
 0x1d5   : > { %13120 = vst [vmem:[#allocation80_spill] sm:$0xff] %v9730_v58  ;;  %13121 = vst [vmem:[#allocation81_spill] sm:$0xff] %v9733_v39  ;;  %v9752_v39 = vpop.f32.mrf.mxu1 }
 0x1d6   : > { %v7639_v15 = vpop.f32.mrf.mxu0  ;;  %v9806_v24 = vadd.f32 %v9513_v6, %v2061_v3  ;;  %v2764_v6 = vadd.f32 %v9551_v53, %v9544_v57  ;;  %vm13229_vm11 = vmmov %vm13141_vm0 }
 0x1d7   : > { %v9739_v50 = vadd.f32 %v7639_v15, %v9614_v42  ;;  %v13129_v15 = vld [vmem:[#allocation40_spill] sm:$0xff]  ;;  %v9776_v56 = vpop.f32.mrf.mxu1 }
 0x1d8   : > { %v9741_v9 = vpop.f32.mrf.mxu0 }
 0x1d9   : > { %13124 = vst [vmem:[#allocation83_spill] sm:$0xff] %v9739_v50  ;;  %13125 = vst [vmem:[#allocation84_spill] sm:$0xff] %v9741_v9  ;;  %v1759_v50 = vadd.f32 %v13130_v31, %v13129_v15  ;;  %v2319_v15 = vadd.f32 %v9411_v43, %v9402_v36 }
 0x1da   : > { %v7642_v40 = vpop.f32.mrf.mxu0 }
 0x1db   : > { %v9746_v41 = vadd.f32 %v7642_v40, %v9627_v46  ;;  %v13131_v46 = vld [vmem:[#allocation3_spill] sm:$0xff]  ;;  %v2049_v12 = vadd.f32 %v9445_v54, %v1759_v50  ;;  %v2323_v54 = vadd.f32 %v9435_v52, %v9426_v16 }
 0x1dc   : > { %v9748_v18 = vpop.f32.mrf.mxu0  ;;  %v1775_v40 = vadd.f32 %v9293_v5, %v13131_v46  ;;  %v3232_v5 = vadd.f32 %v9650_v2, %v9641_v59  ;;  %v3035_v2 = vadd.f32 %v9648_v63, %v2757_v55  ;;  %v3234_v59 = vadd.f32 %v9643_v17, %v9634_v22  ;;  %v9811_v63 = vpop.f32.mrf.mxu1 }
 0x1dd   : > { %13127 = vst [vmem:[#allocation86_spill] sm:$0xff] %v9746_v41  ;;  %13128 = vst [vmem:[#allocation87_spill] sm:$0xff] %v9748_v18  ;;  %v13132_v41 = vld [vmem:[#allocation4_spill] sm:$0xff]  ;;  %v13133_v18 = vld [vmem:[#allocation9_spill] sm:$0xff]  ;;  %v3235_v22 = vadd.f32 %v9652_v8, %v9646_v13  ;;  %v2523_v1 = vadd.f32 %v9564_v21, %v2323_v54 }
 0x1de   : > { %v7643_v58 = vpop.f32.mrf.mxu0  ;;  %v1791_v49 = vadd.f32 %v13133_v18, %v13132_v41  ;;  %v3233_v17 = vadd.f32 %v9659_v11, %v3035_v2  ;;  %v13137_v21 = vld [vmem:[#allocation18_spill] sm:$0xff]  ;;  %v9836_v53 = vpop.f32.mrf.mxu1  ;;  %v13143_v54 = vld [vmem:[#allocation61_spill] sm:$0xff] }
 0x1df   : > { %v9755_v42 = vadd.f32 %v7643_v58, %v9636_v47  ;;  %v2315_v58 = vadd.f32 %v9387_v33, %v9378_v38  ;;  %v2053_v38 = vadd.f32 %v9468_v32, %v1775_v40  ;;  %v2327_v33 = vadd.f32 %v9458_v44, %v2049_v12 }
 0x1e0   : > { %v9759_v9 = vpop.f32.mrf.mxu0  ;;  %v2057_v36 = vadd.f32 %v9487_v29, %v1791_v49  ;;  %v2760_v32 = vadd.f32 %v9536_v48, %v9529_v61  ;;  %v13136_v49 = vld [vmem:[#allocation17_spill] sm:$0xff]  ;;  %v9833_v41 = vadd.f32 %v13137_v21, %v2523_v1  ;;  %v9860_v3 = vpop.f32.mrf.mxu1  ;;  %v13151_v21 = vld [vmem:[#allocation26_spill] sm:$0xff] }
 0x1e1   : > { %v9797_v16 = vadd.f32 %v9481_v27, %v2053_v38  ;;  %v2515_v44 = vadd.f32 %v9534_v14, %v2315_v58  ;;  %v13144_v38 = vld [vmem:[#allocation66_spill] sm:$0xff] }
 0x1e2   : > { %v7682_v47 = vpop.f32.mrf.mxu0  ;;  %v9800_v52 = vadd.f32 %v9500_v60, %v2057_v36  ;;  %v2519_v60 = vadd.f32 %v9549_v7, %v2319_v15  ;;  %v3038_v61 = vadd.f32 %v9657_v10, %v2760_v32  ;;  %v13135_v7 = vld [vmem:[#allocation11_spill] sm:$0xff] }
 0x1e3   : > { %v9813_v27 = vadd.f32 %v7682_v47, %v3234_v59  ;;  %v2761_v14 = vadd.f32 %v9541_v35, %v2515_v44  ;;  %v9830_v35 = vadd.f32 %v13136_v49, %v13135_v7  ;;  %v13150_v49 = vld [vmem:[#allocation21_spill] sm:$0xff] }
 0x1e4   : > { %v3351_v43 = vpop.f32.mrf.mxu0  ;;  %v2765_v34 = vadd.f32 %v9556_v30, %v2519_v60  ;;  %v3236_v10 = vadd.f32 %v9671_v0, %v3038_v61  ;;  %v3238_v0 = vadd.f32 %v9664_v62, %v9655_v4 }
 0x1e5   : > { %v9794_v50 = vadd.f32 %v3351_v43, %v3232_v5  ;;  %v3582_v57 = vmul.f32 %v9813_v27, %v9813_v27  ;;  %v3039_v40 = vadd.f32 %v9666_v45, %v2761_v14  ;;  %v3513_v19 = vsel %vm13140_vm1, %v9813_v27, 0.0  ;;  %vm13145_vm1 = vmmov %vm13141_vm0 }
 0x1e6   : > { %v7683_v29 = vpop.f32.mrf.mxu0  ;;  %v3239_v45 = vadd.f32 %v9678_v25, %v13143_v54  ;;  %v13147_v25 = vld [vmem:[#allocation63_spill] sm:$0xff] }
 0x1e7   : > { %v3580_v13 = vmul.f32 %v9794_v50, %v9794_v50  ;;  %v9823_v8 = vadd.f32 %v7683_v29, %v3235_v22  ;;  %v3510_v31 = vsel %vm13138_vm12, %v9794_v50, 0.0  ;;  %vm13142_vm12 = vmmov %vm13141_vm0  ;;  %v3237_v36 = vadd.f32 %v13144_v38, %v3039_v40  ;;  %v13146_v29 = vld [vmem:[#allocation23_spill] sm:$0xff] }
 0x1e8   : > { %v3354_v48 = vpop.f32.mrf.mxu0  ;;  %v3615_v2 = vsel %vm13145_vm1, %v3582_v57, 0.0  ;;  %v2527_v22 = vadd.f32 %v13146_v29, %v2327_v33  ;;  %vm13152_vm1 = vmmov %vm13141_vm0 }
 0x1e9   : > { %v9825_v11 = vadd.f32 %v3354_v48, %v3233_v17  ;;  %v3612_v58 = vsel %vm13141_vm0, %v3580_v13, 0.0  ;;  %v3583_v15 = vmul.f32 %v9823_v8, %v9823_v8  ;;  %v3515_v59 = vsel %vm13141_vm0, %v9823_v8, 0.0 }
 0x1ea   : > { %v7686_v18 = vpop.f32.mrf.mxu0  ;;  %v3042_v17 = vadd.f32 %v13147_v25, %v2764_v6 }
 0x1eb   : > { %v3511_v30 = vsel %vm13139_vm7, %v9825_v11, 0.0  ;;  %v3581_v46 = vmul.f32 %v9825_v11, %v9825_v11  ;;  %v9865_v44 = vadd.f32 %v7686_v18, %v3238_v0  ;;  %vm13148_vm7 = vmmov %vm13141_vm0 }
 0x1ec   : > { %v3512_v12 = vadd.f32 %v3511_v30, %v3510_v31  ;;  %v3367_v47 = vpop.f32.mrf.mxu0  ;;  %v3617_v61 = vsel %vm13148_vm7, %v3583_v15, 0.0  ;;  %v3240_v33 = vadd.f32 %v9696_v23, %v3042_v17  ;;  %v9883_v31 = vpop.f32.mrf.mxu1  ;;  %vm13155_vm7 = vmmov %vm13141_vm0 }
 0x1ed   : > { %v3613_v55 = vsel %vm13142_vm12, %v3581_v46, 0.0  ;;  %v9855_v5 = vadd.f32 %v3367_v47, %v3236_v10  ;;  %vm13149_vm12 = vmmov %vm13141_vm0  ;;  %v9880_v10 = vadd.f32 %v13151_v21, %v13150_v49  ;;  %v3586_v30 = vmul.f32 %v9865_v44, %v9865_v44  ;;  %v13154_v47 = vld [vmem:[#allocation62_spill] sm:$0xff] }
 0x1ee   : > { %v3514_v4 = vadd.f32 %v3513_v19, %v3512_v12  ;;  %v3614_v62 = vadd.f32 %v3613_v55, %v3612_v58  ;;  %v7687_v43 = vpop.f32.mrf.mxu0  ;;  %v13153_v19 = vld [vmem:[#allocation65_spill] sm:$0xff]  ;;  %v3242_v23 = vadd.f32 %v9689_v28, %v13154_v47  ;;  %v3521_v54 = vsel %vm13155_vm7, %v9865_v44, 0.0  ;;  %vm13161_vm7 = vmmov %vm13141_vm0 }
 0x1ef   : > { %v3584_v32 = vmul.f32 %v9855_v5, %v9855_v5  ;;  %v3517_v48 = vsel %vm13149_vm12, %v9855_v5, 0.0  ;;  %v9874_v13 = vadd.f32 %v7687_v43, %v3239_v45  ;;  %v3043_v12 = vadd.f32 %v13153_v19, %v2765_v34  ;;  %vm13156_vm12 = vmmov %vm13141_vm0 }
 0x1f0   : > { %v3616_v60 = vadd.f32 %v3615_v2, %v3614_v62  ;;  %v3516_v14 = vadd.f32 %v3515_v59, %v3514_v4  ;;  %v3370_v1 = vpop.f32.mrf.mxu0  ;;  %v13157_v4 = vld [vmem:[#allocation64_spill] sm:$0xff]  ;;  %v9905_v59 = vpop.f32.mrf.mxu1 }
 0x1f1   : > { %v9876_v7 = vadd.f32 %v3370_v1, %v3237_v36  ;;  %v3619_v46 = vsel %vm13152_vm1, %v3584_v32, 0.0  ;;  %v3587_v45 = vmul.f32 %v9874_v13, %v9874_v13  ;;  %v3243_v62 = vadd.f32 %v9703_v20, %v13157_v4  ;;  %vm13158_vm1 = vmmov %vm13141_vm0  ;;  %v13160_v20 = vld [vmem:[#allocation68_spill] sm:$0xff] }
 0x1f2   : > { %v3518_v18 = vadd.f32 %v3517_v48, %v3516_v14  ;;  %v3618_v6 = vadd.f32 %v3617_v61, %v3616_v60  ;;  %v7690_v57 = vpop.f32.mrf.mxu0  ;;  %v3241_v34 = vadd.f32 %v9710_v26, %v3043_v12  ;;  %v3623_v32 = vsel %vm13158_vm1, %v3586_v30, 0.0  ;;  %v13159_v60 = vld [vmem:[#allocation28_spill] sm:$0xff]  ;;  %vm13164_vm1 = vmmov %vm13141_vm0 }
 0x1f3   : > { %v3519_v40 = vsel %vm13141_vm0, %v9876_v7, 0.0  ;;  %v3585_v0 = vmul.f32 %v9876_v7, %v9876_v7  ;;  %v3523_v29 = vsel %vm13141_vm0, %v9874_v13, 0.0  ;;  %v9910_v25 = vadd.f32 %v7690_v57, %v3242_v23 }
 0x1f4   : > { %v3620_v58 = vadd.f32 %v3619_v46, %v3618_v6  ;;  %v3520_v15 = vadd.f32 %v3519_v40, %v3518_v18  ;;  %v3383_v55 = vpop.f32.mrf.mxu0  ;;  %v2773_v14 = vadd.f32 %v13159_v60, %v2527_v22  ;;  %v3046_v26 = vadd.f32 %v13160_v20, %v9830_v35  ;;  %v13163_v6 = vld [vmem:[#allocation33_spill] sm:$0xff]  ;;  %v9927_v40 = vpop.f32.mrf.mxu1 }
 0x1f5   : > { %v3621_v38 = vsel %vm13156_vm12, %v3585_v0, 0.0  ;;  %v9900_v36 = vadd.f32 %v3383_v55, %v3240_v33  ;;  %v3625_v49 = vsel %vm13161_vm7, %v3587_v45, 0.0  ;;  %vm13162_vm12 = vmmov %vm13141_vm0  ;;  %v2531_v57 = vadd.f32 %v13163_v6, %v9797_v16  ;;  %v13165_v16 = vld [vmem:[#allocation70_spill] sm:$0xff] }
 0x1f6   : > { %v3522_v43 = vadd.f32 %v3521_v54, %v3520_v15  ;;  %v3622_v28 = vadd.f32 %v3621_v38, %v3620_v58  ;;  %v7691_v2 = vpop.f32.mrf.mxu0  ;;  %v3244_v22 = vadd.f32 %v9727_v51, %v3046_v26  ;;  %v3590_v0 = vmul.f32 %v9910_v25, %v9910_v25  ;;  %v13166_v51 = vld [vmem:[#allocation67_spill] sm:$0xff]  ;;  %v13167_v58 = vld [vmem:[#allocation77_spill] sm:$0xff]  ;;  %vm13168_vm7 = vmmov %vm13141_vm0  ;;  %v9950_v20 = vpop.f32.mrf.mxu1 }
 0x1f7   : > { %v3588_v17 = vmul.f32 %v9900_v36, %v9900_v36  ;;  %v3525_v21 = vsel %vm13162_vm12, %v9900_v36, 0.0  ;;  %v9920_v33 = vadd.f32 %v7691_v2, %v3243_v62  ;;  %v3047_v23 = vadd.f32 %v13165_v16, %v9833_v41  ;;  %vm13169_vm12 = vmmov %vm13141_vm0  ;;  %v13172_v41 = vld [vmem:[#allocation85_spill] sm:$0xff] }
 0x1f8   : > { %v3624_v1 = vadd.f32 %v3623_v32, %v3622_v28  ;;  %v3524_v61 = vadd.f32 %v3523_v29, %v3522_v43  ;;  %v3386_v48 = vpop.f32.mrf.mxu0  ;;  %v3246_v15 = vadd.f32 %v13167_v58, %v13166_v51  ;;  %v3529_v38 = vsel %vm13168_vm7, %v9910_v25, 0.0  ;;  %v13170_v43 = vld [vmem:[#allocation69_spill] sm:$0xff]  ;;  %v13171_v28 = vld [vmem:[#allocation82_spill] sm:$0xff]  ;;  %vm13177_vm7 = vmmov %vm13141_vm0 }
 0x1f9   : > { %v9922_v18 = vadd.f32 %v3386_v48, %v3241_v34  ;;  %v3627_v19 = vsel %vm13164_vm1, %v3588_v17, 0.0  ;;  %v3591_v4 = vmul.f32 %v9920_v33, %v9920_v33  ;;  %v3247_v2 = vadd.f32 %v13171_v28, %v13170_v43  ;;  %vm13173_vm1 = vmmov %vm13141_vm0  ;;  %v13181_v43 = vld [vmem:[#allocation74_spill] sm:$0xff]  ;;  %v13182_v28 = vld [vmem:[#allocation71_spill] sm:$0xff] }
 0x1fa   : > { %v3526_v30 = vadd.f32 %v3525_v21, %v3524_v61  ;;  %v3626_v46 = vadd.f32 %v3625_v49, %v3624_v1  ;;  %v7694_v35 = vpop.f32.mrf.mxu0  ;;  %v3245_v32 = vadd.f32 %v13172_v41, %v3047_v23  ;;  %v3631_v26 = vsel %vm13173_vm1, %v3590_v0, 0.0  ;;  %v13174_v49 = vld [vmem:[#allocation30_spill] sm:$0xff]  ;;  %v13175_v21 = vld [vmem:[#allocation5_spill] sm:$0xff]  ;;  %vm13180_vm1 = vmmov %vm13141_vm0 }
 0x1fb   : > { %v3527_v12 = vsel %vm13141_vm0, %v9922_v18, 0.0  ;;  %v3589_v47 = vmul.f32 %v9922_v18, %v9922_v18  ;;  %v3531_v1 = vsel %vm13141_vm0, %v9920_v33, 0.0  ;;  %v9955_v61 = vadd.f32 %v7694_v35, %v3246_v15  ;;  %v13179_v23 = vld [vmem:[#allocation14_spill] sm:$0xff] }
 0x1fc   : > { %v3628_v55 = vadd.f32 %v3627_v19, %v3626_v46  ;;  %v3528_v54 = vadd.f32 %v3527_v12, %v3526_v30  ;;  %v3399_v45 = vpop.f32.mrf.mxu0  ;;  %v2776_v6 = vadd.f32 %v13175_v21, %v13174_v49  ;;  %v2777_v51 = vadd.f32 %v13179_v23, %v2531_v57 }
 0x1fd   : > { %v3629_v62 = vsel %vm13169_vm12, %v3589_v47, 0.0  ;;  %v9945_v34 = vadd.f32 %v3399_v45, %v3244_v22  ;;  %v13176_v22 = vld [vmem:[#allocation72_spill] sm:$0xff]  ;;  %v3633_v47 = vsel %vm13177_vm7, %v3591_v4, 0.0  ;;  %vm13178_vm12 = vmmov %vm13141_vm0  ;;  %v3594_v45 = vmul.f32 %v9955_v61, %v9955_v61 }
 0x1fe   : > { %v3530_v29 = vadd.f32 %v3529_v38, %v3528_v54  ;;  %v3630_v17 = vadd.f32 %v3629_v62, %v3628_v55  ;;  %v7695_v60 = vpop.f32.mrf.mxu0  ;;  %v3050_v30 = vadd.f32 %v13176_v22, %v9880_v10  ;;  %v9972_v10 = vpop.f32.mrf.mxu1  ;;  %v3051_v57 = vadd.f32 %v13181_v43, %v2773_v14  ;;  %vm13183_vm7 = vmmov %vm13141_vm0 }
 0x1ff   : > { %v3592_v48 = vmul.f32 %v9945_v34, %v9945_v34  ;;  %v3533_v0 = vsel %vm13178_vm12, %v9945_v34, 0.0  ;;  %v9966_v16 = vadd.f32 %v7695_v60, %v3247_v2  ;;  %vm13184_vm12 = vmmov %vm13141_vm0 }
 0x200   : > { %v3632_v46 = vadd.f32 %v3631_v26, %v3630_v17  ;;  %v3532_v19 = vadd.f32 %v3531_v1, %v3530_v29  ;;  %v3402_v12 = vpop.f32.mrf.mxu0  ;;  %v3248_v58 = vadd.f32 %v9776_v56, %v3050_v30  ;;  %v3250_v56 = vadd.f32 %v9752_v39, %v13182_v28  ;;  %v13185_v1 = vld [vmem:[#allocation73_spill] sm:$0xff]  ;;  %v9994_v22 = vpop.f32.mrf.mxu1 }
 0x201   : > { %v9968_v35 = vadd.f32 %v3402_v12, %v3245_v32  ;;  %v3635_v38 = vsel %vm13180_vm1, %v3592_v48, 0.0  ;;  %v3537_v29 = vsel %vm13183_vm7, %v9955_v61, 0.0  ;;  %v3595_v17 = vmul.f32 %v9966_v16, %v9966_v16  ;;  %vm13186_vm1 = vmmov %vm13141_vm0 }
 0x202   : > { %v3534_v15 = vadd.f32 %v3533_v0, %v3532_v19  ;;  %v3634_v55 = vadd.f32 %v3633_v47, %v3632_v46  ;;  %v7698_v54 = vpop.f32.mrf.mxu0  ;;  %v3251_v48 = vadd.f32 %v9811_v63, %v13185_v1  ;;  %v3249_v14 = vadd.f32 %v9836_v53, %v3051_v57  ;;  %v13187_v47 = vld [vmem:[#allocation34_spill] sm:$0xff]  ;;  %v13188_v0 = vld [vmem:[#allocation76_spill] sm:$0xff]  ;;  %vm13189_vm7 = vmmov %vm13141_vm0 }
 0x203   : > { %v3535_v4 = vsel %vm13141_vm0, %v9968_v35, 0.0  ;;  %v3593_v62 = vmul.f32 %v9968_v35, %v9968_v35  ;;  %v3639_v30 = vsel %vm13186_vm1, %v3594_v45, 0.0  ;;  %v3539_v46 = vsel %vm13141_vm0, %v9966_v16, 0.0  ;;  %vm13193_vm1 = vmmov %vm13141_vm0  ;;  %v13195_v1 = vld [vmem:[#allocation75_spill] sm:$0xff] }
 0x204   : > { %v3636_v2 = vadd.f32 %v3635_v38, %v3634_v55  ;;  %v3536_v41 = vadd.f32 %v3535_v4, %v3534_v15  ;;  %v3415_v32 = vpop.f32.mrf.mxu0  ;;  %v9999_v19 = vadd.f32 %v7698_v54, %v3250_v56  ;;  %v2535_v63 = vadd.f32 %v13187_v47, %v9800_v52  ;;  %v13191_v4 = vld [vmem:[#allocation15_spill] sm:$0xff]  ;;  %v3204_v56 = vpop.f32.mrf.mxu1 }
 0x205   : > { %v3637_v60 = vsel %vm13184_vm12, %v3593_v62, 0.0  ;;  %v9989_v26 = vadd.f32 %v3415_v32, %v3248_v58  ;;  %v3054_v53 = vadd.f32 %v13188_v0, %v2776_v6  ;;  %v3641_v55 = vsel %vm13189_vm7, %v3595_v17, 0.0  ;;  %vm13190_vm12 = vmmov %vm13141_vm0  ;;  %v13192_v62 = vld [vmem:[#allocation20_spill] sm:$0xff]  ;;  %v13194_v17 = vld [vmem:[#allocation79_spill] sm:$0xff] }
 0x206   : > { %v3538_v49 = vadd.f32 %v3537_v29, %v3536_v41  ;;  %v3638_v39 = vadd.f32 %v3637_v60, %v3636_v2  ;;  %v7699_v21 = vpop.f32.mrf.mxu0  ;;  %v2780_v43 = vadd.f32 %v13192_v62, %v13191_v4  ;;  %v3598_v2 = vmul.f32 %v9999_v19, %v9999_v19  ;;  %vm13196_vm7 = vmmov %vm13141_vm0  ;;  %v13200_v4 = vld [vmem:[#allocation6_spill] sm:$0xff] }
 0x207   : > { %v3596_v12 = vmul.f32 %v9989_v26, %v9989_v26  ;;  %v3541_v45 = vsel %vm13190_vm12, %v9989_v26, 0.0  ;;  %v10009_v38 = vadd.f32 %v7699_v21, %v3251_v48  ;;  %v3252_v57 = vadd.f32 %v9883_v31, %v3054_v53  ;;  %vm13197_vm12 = vmmov %vm13141_vm0 }
 0x208   : > { %v3640_v23 = vadd.f32 %v3639_v30, %v3638_v39  ;;  %v3540_v58 = vadd.f32 %v3539_v46, %v3538_v49  ;;  %v3418_v15 = vpop.f32.mrf.mxu0  ;;  %v3055_v60 = vadd.f32 %v13194_v17, %v2777_v51  ;;  %v3254_v31 = vadd.f32 %v9860_v3, %v13195_v1  ;;  %v13205_v17 = vld [vmem:[#allocation36_spill] sm:$0xff] }
 0x209   : > { %v10011_v54 = vadd.f32 %v3418_v15, %v3249_v14  ;;  %v3643_v41 = vsel %vm13193_vm1, %v3596_v12, 0.0  ;;  %v3545_v39 = vsel %vm13196_vm7, %v9999_v19, 0.0  ;;  %v3599_v21 = vmul.f32 %v10009_v38, %v10009_v38  ;;  %v13198_v12 = vld [vmem:[#allocation78_spill] sm:$0xff]  ;;  %vm13199_vm1 = vmmov %vm13141_vm0 }
 0x20a   : > { %v3542_v52 = vadd.f32 %v3541_v45, %v3540_v58  ;;  %v3642_v28 = vadd.f32 %v3641_v55, %v3640_v23  ;;  %v7702_v6 = vpop.f32.mrf.mxu0  ;;  %v3255_v47 = vadd.f32 %v9905_v59, %v13198_v12  ;;  %v3253_v51 = vadd.f32 %v9927_v40, %v3055_v60  ;;  %v10036_v23 = vpop.f32.mrf.mxu1  ;;  %v13201_v59 = vld [vmem:[#allocation81_spill] sm:$0xff]  ;;  %vm13202_vm7 = vmmov %vm13141_vm0 }
 0x20b   : > { %v3543_v32 = vsel %vm13141_vm0, %v10011_v54, 0.0  ;;  %v3597_v29 = vmul.f32 %v10011_v54, %v10011_v54  ;;  %v3647_v58 = vsel %vm13199_vm1, %v3598_v2, 0.0  ;;  %v3547_v15 = vsel %vm13141_vm0, %v10009_v38, 0.0  ;;  %vm13206_vm1 = vmmov %vm13141_vm0 }
 0x20c   : > { %v3644_v48 = vadd.f32 %v3643_v41, %v3642_v28  ;;  %v3544_v14 = vadd.f32 %v3543_v32, %v3542_v52  ;;  %v3431_v49 = vpop.f32.mrf.mxu0  ;;  %v10041_v55 = vadd.f32 %v7702_v6, %v3254_v31  ;;  %v2781_v62 = vadd.f32 %v13200_v4, %v2535_v63  ;;  %v13204_v6 = vld [vmem:[#allocation25_spill] sm:$0xff]  ;;  %v13211_v4 = vld [vmem:[#allocation83_spill] sm:$0xff] }
 0x20d   : > { %v3645_v30 = vsel %vm13197_vm12, %v3597_v29, 0.0  ;;  %v10031_v46 = vadd.f32 %v3431_v49, %v3252_v57  ;;  %v3058_v57 = vadd.f32 %v13201_v59, %v2780_v43  ;;  %v3649_v41 = vsel %vm13202_vm7, %v3599_v21, 0.0  ;;  %vm13203_vm12 = vmmov %vm13141_vm0 }
 0x20e   : > { %v3546_v0 = vadd.f32 %v3545_v39, %v3544_v14  ;;  %v3646_v3 = vadd.f32 %v3645_v30, %v3644_v48  ;;  %v7703_v53 = vpop.f32.mrf.mxu0  ;;  %v2784_v60 = vadd.f32 %v13205_v17, %v13204_v6  ;;  %v3217_v48 = vpop.f32.mrf.mxu1  ;;  %v3602_v14 = vmul.f32 %v10041_v55, %v10041_v55  ;;  %v13207_v30 = vld [vmem:[#allocation84_spill] sm:$0xff]  ;;  %vm13209_vm7 = vmmov %vm13141_vm0  ;;  %v13213_v17 = vld [vmem:[#allocation31_spill] sm:$0xff] }
 0x20f   : > { %v3600_v45 = vmul.f32 %v10031_v46, %v10031_v46  ;;  %v3549_v2 = vsel %vm13203_vm12, %v10031_v46, 0.0  ;;  %v10050_v32 = vadd.f32 %v7703_v53, %v3255_v47  ;;  %v3256_v1 = vadd.f32 %v9972_v10, %v3058_v57  ;;  %v13208_v47 = vld [vmem:[#allocation80_spill] sm:$0xff]  ;;  %vm13210_vm12 = vmmov %vm13141_vm0 }
 0x210   : > { %v3648_v40 = vadd.f32 %v3647_v58, %v3646_v3  ;;  %v3548_v52 = vadd.f32 %v3547_v15, %v3546_v0  ;;  %v3434_v28 = vpop.f32.mrf.mxu0  ;;  %v3059_v12 = vadd.f32 %v13207_v30, %v2781_v62  ;;  %v3258_v10 = vadd.f32 %v9950_v20, %v13208_v47  ;;  %v13217_v30 = vld [vmem:[#allocation42_spill] sm:$0xff] }
 0x211   : > { %v10052_v29 = vadd.f32 %v3434_v28, %v3253_v51  ;;  %v3651_v49 = vsel %vm13206_vm1, %v3600_v45, 0.0  ;;  %v3553_v53 = vsel %vm13209_vm7, %v10041_v55, 0.0  ;;  %v3603_v58 = vmul.f32 %v10050_v32, %v10050_v32  ;;  %vm13212_vm1 = vmmov %vm13141_vm0 }
 0x212   : > { %v3550_v63 = vadd.f32 %v3549_v2, %v3548_v52  ;;  %v3650_v31 = vadd.f32 %v3649_v41, %v3648_v40  ;;  %v7706_v43 = vpop.f32.mrf.mxu0  ;;  %v3259_v59 = vadd.f32 %v9994_v22, %v13211_v4  ;;  %v3257_v62 = vadd.f32 %v3204_v56, %v3059_v12  ;;  %v7677_v52 = vpop.f32.mrf.mxu1  ;;  %vm13215_vm7 = vmmov %vm13141_vm0  ;;  %v13219_v4 = vld [vmem:[#allocation86_spill] sm:$0xff] }
 0x213   : > { %v3551_v39 = vsel %vm13141_vm0, %v10052_v29, 0.0  ;;  %v3601_v21 = vmul.f32 %v10052_v29, %v10052_v29  ;;  %v3655_v28 = vsel %vm13212_vm1, %v3602_v14, 0.0  ;;  %v3555_v41 = vsel %vm13141_vm0, %v10050_v32, 0.0  ;;  %vm13218_vm1 = vmmov %vm13141_vm0 }
 0x214   : > { %v3652_v51 = vadd.f32 %v3651_v49, %v3650_v31  ;;  %v3552_v0 = vadd.f32 %v3551_v39, %v3550_v63  ;;  %v3447_v3 = vpop.f32.mrf.mxu0  ;;  %v10079_v2 = vadd.f32 %v7706_v43, %v3258_v10  ;;  %v13214_v63 = vld [vmem:[#allocation87_spill] sm:$0xff]  ;;  %v3657_v39 = vsel %vm13215_vm7, %v3603_v58, 0.0  ;;  %vm13220_vm7 = vmmov %vm13141_vm0 }
 0x215   : > { %v3653_v15 = vsel %vm13210_vm12, %v3601_v21, 0.0  ;;  %v10072_v45 = vadd.f32 %v3447_v3, %v3256_v1  ;;  %v2539_v1 = vadd.f32 %v13213_v17, %v9806_v24  ;;  %v3062_v22 = vadd.f32 %v13214_v63, %v2784_v60  ;;  %vm13216_vm12 = vmmov %vm13141_vm0 }
 0x216   : > { %v3554_v57 = vadd.f32 %v3553_v53, %v3552_v0  ;;  %v3654_v40 = vadd.f32 %v3653_v15, %v3652_v51  ;;  %v7707_v20 = vpop.f32.mrf.mxu0  ;;  %v3220_v0 = vpop.f32.mrf.mxu1  ;;  %v3606_v60 = vmul.f32 %v10079_v2, %v10079_v2 }
 0x217   : > { %v3604_v6 = vmul.f32 %v10072_v45, %v10072_v45  ;;  %v3557_v14 = vsel %vm13216_vm12, %v10072_v45, 0.0  ;;  %v10089_v21 = vadd.f32 %v7707_v20, %v3259_v59  ;;  %v2785_v12 = vadd.f32 %v13217_v30, %v2539_v1  ;;  %vm13221_vm12 = vmmov %vm13141_vm0 }
 0x218   : > { %v3656_v56 = vadd.f32 %v3655_v28, %v3654_v40  ;;  %v3556_v31 = vadd.f32 %v3555_v41, %v3554_v57  ;;  %v3450_v49 = vpop.f32.mrf.mxu0  ;;  %v3260_v47 = vadd.f32 %v3217_v48, %v3062_v22  ;;  %v3262_v48 = vadd.f32 %v10036_v23, %v13219_v4  ;;  %v10107_v40 = vld [vmem:[%s12424_s2 + $0x6] sm:$0x3] }
 0x219   : > { %v10091_v43 = vadd.f32 %v3450_v49, %v3257_v62  ;;  %v3659_v3 = vsel %vm13218_vm1, %v3604_v6, 0.0  ;;  %v3063_v15 = vadd.f32 %v9759_v9, %v2785_v12  ;;  %v3561_v20 = vsel %vm13220_vm7, %v10079_v2, 0.0  ;;  %vm13223_vm7 = vmmov %vm13141_vm0 }
 0x21a   : > { %v3558_v10 = vadd.f32 %v3557_v14, %v3556_v31  ;;  %v3658_v51 = vadd.f32 %v3657_v39, %v3656_v56  ;;  %v7710_v24 = vpop.f32.mrf.mxu0  ;;  %v3607_v28 = vmul.f32 %v10089_v21, %v10089_v21  ;;  %vm13222_vm1 = vcmask 1041408  }
 0x21b   : > { %v3559_v53 = vsel %vm13141_vm0, %v10091_v43, 0.0  ;;  %v3605_v58 = vmul.f32 %v10091_v43, %v10091_v43  ;;  %8030 = vmatprep.subr.msk.bf16.mxu0 %vm13222_vm1, %v10107_v40  ;;  %v3263_v23 = vadd.f32 %v7677_v52, %v9755_v42  ;;  %v3261_v6 = vadd.f32 %v3220_v0, %v3063_v15  ;;  %vm13225_vm1 = vmmov %vm13141_vm0 }
 0x21c   : > { %v3660_v59 = vadd.f32 %v3659_v3, %v3658_v51  ;;  %v3560_v62 = vadd.f32 %v3559_v53, %v3558_v10  ;;  %v3463_v57 = vpop.f32.mrf.mxu0  ;;  %v3663_v22 = vsel %vm13141_vm0, %v3606_v60, 0.0  ;;  %v3563_v56 = vsel %vm13223_vm7, %v10089_v21, 0.0  ;;  %vm13226_vm7 = vmmov %vm13141_vm0 }
 0x21d   : > { %v3661_v41 = vsel %vm13221_vm12, %v3605_v58, 0.0  ;;  %v10114_v9 = vadd.f32 %v3463_v57, %v3260_v47  ;;  %v10122_v31 = vadd.f32 %v7710_v24, %v3262_v48  ;;  %vm13224_vm12 = vmmov %vm13141_vm0 }
 0x21e   : > { %v3562_v17 = vadd.f32 %v3561_v20, %v3560_v62  ;;  %v3662_v1 = vadd.f32 %v3661_v41, %v3660_v59  ;;  %v7711_v63 = vpop.f32.mrf.mxu0  ;;  %v3665_v12 = vsel %vm13224_vm12, %v3607_v28, 0.0  ;;  %vm13227_vm12 = vmmov %vm13141_vm0 }
 0x21f   : > { %v3608_v49 = vmul.f32 %v10114_v9, %v10114_v9  ;;  %v3565_v42 = vsel %vm13225_vm1, %v10114_v9, 0.0  ;;  %v10129_v52 = vadd.f32 %v7711_v63, %v3263_v23  ;;  %v3610_v24 = vmul.f32 %v10122_v31, %v10122_v31  ;;  %vm13228_vm1 = vmmov %vm13141_vm0 }
 0x220   : > { %v3664_v39 = vadd.f32 %v3663_v22, %v3662_v1  ;;  %v3564_v14 = vadd.f32 %v3563_v56, %v3562_v17  ;;  %v3466_v30 = vpop.f32.mrf.mxu0  ;;  %v3569_v15 = vsel %vm13227_vm12, %v10122_v31, 0.0  ;;  %vm13244_vm12 = vmmov %vm13141_vm0 }
 0x221   : > { %v10131_v47 = vadd.f32 %v3466_v30, %v3261_v6  ;;  %v3667_v0 = vsel %vm13141_vm0, %v3608_v49, 0.0  ;;  %v3611_v4 = vmul.f32 %v10129_v52, %v10129_v52  ;;  %v3671_v57 = vsel %vm13229_vm11, %v3610_v24, 0.0 }
 0x222   : > { %v3566_v10 = vadd.f32 %v3565_v42, %v3564_v14  ;;  %v3666_v51 = vadd.f32 %v3665_v12, %v3664_v39  ;;  %v3571_v20 = vsel %vm13141_vm0, %v10129_v52, 0.0  ;;  %vm13231_vm11 = vcmask 1041408  }
 0x223   : > { %v3567_v60 = vsel %vm13226_vm7, %v10131_v47, 0.0  ;;  %v3609_v3 = vmul.f32 %v10131_v47, %v10131_v47  ;;  %vm13230_vm7 = vmmov %vm13141_vm0 }
 0x224   : > { %v3668_v53 = vadd.f32 %v3667_v0, %v3666_v51  ;;  %v3568_v58 = vadd.f32 %v3567_v60, %v3566_v10  ;;  %v3673_v23 = vsel %vm13230_vm7, %v3611_v4, 0.0  ;;  %vm13251_vm7 = vmmov %vm13231_vm11 }
 0x225   : > { %v3669_v48 = vsel %vm13228_vm1, %v3609_v3, 0.0  ;;  %vm13250_vm1 = vmmov %vm13141_vm0 }
 0x226   : > { %v3570_v59 = vadd.f32 %v3569_v15, %v3568_v58  ;;  %v3670_v62 = vadd.f32 %v3669_v48, %v3668_v53 }
 0x228   : > { %v3572_v28 = vadd.f32 %v3571_v20, %v3570_v59  ;;  %v3672_v41 = vadd.f32 %v3671_v57, %v3670_v62 }
 0x22a   : > { %v3573_v6 = vrot.slane %v3572_v28, 4  ;;  %v3674_v17 = vadd.f32 %v3673_v23, %v3672_v41 }
 0x22c   : > { %v3574_v1 = vadd.f32 %v3573_v6, %v3572_v28  ;;  %v3675_v63 = vrot.slane %v3674_v17, 4 }
 0x22e   : > { %v3575_v22 = vrot.slane %v3574_v1, 2  ;;  %v3676_v56 = vadd.f32 %v3675_v63, %v3674_v17 }
 0x230   : > { %v3576_v49 = vadd.f32 %v3575_v22, %v3574_v1  ;;  %v3677_v39 = vrot.slane %v3676_v56, 2 }
 0x232   : > { %v3577_v14 = vrot.slane %v3576_v49, 1  ;;  %v3678_v30 = vadd.f32 %v3677_v39, %v3676_v56 }
 0x234   : > { %v3578_v12 = vadd.f32 %v3577_v14, %v3576_v49  ;;  %v3679_v42 = vrot.slane %v3678_v30, 1 }
 0x236   : > { %v10149_v10 = vmul.f32 0.00390625, %v3578_v12  ;;  %v3680_v51 = vadd.f32 %v3679_v42, %v3678_v30 }
 0x238   : > { %v3681_v24 = vmul.f32 0.00390625, %v3680_v51  ;;  %v3682_v0 = vmul.f32 %v10149_v10, %v10149_v10  ;;  %v3715_v60 = vsub.f32 %v10114_v9, %v10149_v10  ;;  %v3716_v3 = vsub.f32 %v10131_v47, %v10149_v10 }
 0x239   : > { %v3696_v58 = vsub.f32 %v9922_v18, %v10149_v10  ;;  %v3699_v4 = vsub.f32 %v9945_v34, %v10149_v10  ;;  %v3700_v48 = vsub.f32 %v9968_v35, %v10149_v10  ;;  %v3701_v59 = vsub.f32 %v9955_v61, %v10149_v10 }
 0x23a   : > { %v3683_v53 = vsub.f32 %v3681_v24, %v3682_v0  ;;  %v3702_v9 = vsub.f32 %v9966_v16, %v10149_v10  ;;  %v3703_v47 = vsub.f32 %v9989_v26, %v10149_v10  ;;  %v3704_v62 = vsub.f32 %v10011_v54, %v10149_v10 }
 0x23b   : > { %v3705_v57 = vsub.f32 %v9999_v19, %v10149_v10  ;;  %v3706_v34 = vsub.f32 %v10009_v38, %v10149_v10  ;;  %v3707_v35 = vsub.f32 %v10031_v46, %v10149_v10  ;;  %v3708_v61 = vsub.f32 %v10052_v29, %v10149_v10 }
 0x23c   : > { %v3684_v15 = vmax.f32 %v3683_v53, 0.0  ;;  %v3709_v16 = vsub.f32 %v10041_v55, %v10149_v10  ;;  %v3710_v26 = vsub.f32 %v10050_v32, %v10149_v10  ;;  %v3711_v54 = vsub.f32 %v10072_v45, %v10149_v10 }
 0x23d   : > { %v3712_v19 = vsub.f32 %v10091_v43, %v10149_v10  ;;  %v3713_v38 = vsub.f32 %v10079_v2, %v10149_v10  ;;  %v3714_v46 = vsub.f32 %v10089_v21, %v10149_v10  ;;  %v3717_v29 = vsub.f32 %v10122_v31, %v10149_v10 }
 0x23e   : > { %v3685_v18 = vadd.f32 1e-05, %v3684_v15  ;;  %v3718_v55 = vsub.f32 %v10129_v52, %v10149_v10  ;;  %v3687_v32 = vsub.f32 %v9794_v50, %v10149_v10  ;;  %v3688_v45 = vsub.f32 %v9825_v11, %v10149_v10 }
 0x23f   : > { %v3689_v43 = vsub.f32 %v9813_v27, %v10149_v10  ;;  %v10203_v2 = vsel %vm13231_vm11, %v9781_v37, 0  ;;  %v3690_v21 = vsub.f32 %v9823_v8, %v10149_v10  ;;  %v3691_v31 = vsub.f32 %v9855_v5, %v10149_v10 }
 0x240   : > { %8078 = vrsqrt.f32 %v3685_v18  ;;  %v3692_v52 = vsub.f32 %v9876_v7, %v10149_v10  ;;  %v3693_v50 = vsub.f32 %v9865_v44, %v10149_v10  ;;  %v3694_v27 = vsub.f32 %v9874_v13, %v10149_v10 }
 0x241   : > { %v3695_v37 = vsub.f32 %v9900_v36, %v10149_v10  ;;  %v3697_v20 = vsub.f32 %v9910_v25, %v10149_v10  ;;  %v3698_v8 = vsub.f32 %v9920_v33, %v10149_v10 }
 0x24d   : > { %v8079_v11 = vpop.eup %8078 }
 0x24e   : > { %v3747_v5 = vmul.f32 %v8079_v11, %v3715_v60  ;;  %v3748_v28 = vmul.f32 %v8079_v11, %v3716_v3  ;;  %v10221_v41 = vmul.f32 %v8079_v11, %v3687_v32  ;;  %v10223_v7 = vmul.f32 %v8079_v11, %v3688_v45 }
 0x24f   : > { %v10225_v44 = vmul.f32 %v8079_v11, %v3689_v43  ;;  %v3722_v23 = vmul.f32 %v8079_v11, %v3690_v21  ;;  %v3723_v6 = vmul.f32 %v8079_v11, %v3691_v31  ;;  %v3724_v13 = vmul.f32 %v8079_v11, %v3692_v52 }
 0x250   : > { %v3779_v17 = vmax.f32 %v3747_v5, 0.0  ;;  %v3780_v1 = vmax.f32 %v3748_v28, 0.0  ;;  %v3725_v36 = vmul.f32 %v8079_v11, %v3693_v50  ;;  %v3726_v63 = vmul.f32 %v8079_v11, %v3694_v27 }
 0x251   : > { %v3727_v22 = vmul.f32 %v8079_v11, %v3695_v37  ;;  %v3728_v25 = vmul.f32 %v8079_v11, %v3696_v58  ;;  %v3729_v56 = vmul.f32 %v8079_v11, %v3697_v20  ;;  %v3730_v49 = vmul.f32 %v8079_v11, %v3698_v8 }
 0x252   : > { %v10227_v33 = vpack.c.bf16 %v3780_v1, %v3779_v17  ;;  %v3731_v39 = vmul.f32 %v8079_v11, %v3699_v4  ;;  %v3732_v14 = vmul.f32 %v8079_v11, %v3700_v48  ;;  %v3733_v30 = vmul.f32 %v8079_v11, %v3701_v59 }
 0x253   : > { %v3734_v12 = vmul.f32 %v8079_v11, %v3702_v9  ;;  %v3735_v42 = vmul.f32 %v8079_v11, %v3703_v47  ;;  %v3736_v10 = vmul.f32 %v8079_v11, %v3704_v62  ;;  %v3737_v51 = vmul.f32 %v8079_v11, %v3705_v57 }
 0x254   : > { %13232 = vst [vmem:[#allocation40_spill] sm:$0xff] %v10227_v33  ;;  %v3738_v24 = vmul.f32 %v8079_v11, %v3706_v34  ;;  %v3739_v0 = vmul.f32 %v8079_v11, %v3707_v35  ;;  %v3740_v60 = vmul.f32 %v8079_v11, %v3708_v61  ;;  %v3741_v3 = vmul.f32 %v8079_v11, %v3709_v16 }
 0x255   : > { %v3742_v53 = vmul.f32 %v8079_v11, %v3710_v26  ;;  %v3743_v15 = vmul.f32 %v8079_v11, %v3711_v54  ;;  %v3744_v18 = vmul.f32 %v8079_v11, %v3712_v19  ;;  %v3745_v32 = vmul.f32 %v8079_v11, %v3713_v38 }
 0x256   : > { %v3746_v58 = vmul.f32 %v8079_v11, %v3714_v46  ;;  %v3749_v45 = vmul.f32 %v8079_v11, %v3717_v29  ;;  %v3750_v43 = vmul.f32 %v8079_v11, %v3718_v55  ;;  %v3751_v21 = vmax.f32 %v10221_v41, 0.0 }
 0x257   : > { %v3752_v4 = vmax.f32 %v10223_v7, 0.0  ;;  %v3753_v48 = vmax.f32 %v10225_v44, 0.0  ;;  %v3754_v59 = vmax.f32 %v3722_v23, 0.0  ;;  %v3755_v9 = vmax.f32 %v3723_v6, 0.0 }
 0x258   : > { %v3756_v47 = vmax.f32 %v3724_v13, 0.0  ;;  %v3757_v62 = vmax.f32 %v3725_v36, 0.0  ;;  %v3758_v57 = vmax.f32 %v3726_v63, 0.0  ;;  %v3759_v34 = vmax.f32 %v3727_v22, 0.0 }
 0x259   : > { %v3760_v35 = vmax.f32 %v3728_v25, 0.0  ;;  %v3761_v61 = vmax.f32 %v3729_v56, 0.0  ;;  %v3762_v16 = vmax.f32 %v3730_v49, 0.0  ;;  %v3763_v26 = vmax.f32 %v3731_v39, 0.0  ;;  %v10259_v56 = vld [vmem:[%s12424_s2 + $0x8] sm:$0x3] }
 0x25a   : > { %v3764_v54 = vmax.f32 %v3732_v14, 0.0  ;;  %v3765_v19 = vmax.f32 %v3733_v30, 0.0  ;;  %v3766_v38 = vmax.f32 %v3734_v12, 0.0  ;;  %v3767_v46 = vmax.f32 %v3735_v42, 0.0  ;;  %13245 = vst [vmem:[#allocation63_spill] sm:$0xff] %v10259_v56 }
 0x25b   : > { %v3768_v29 = vmax.f32 %v3736_v10, 0.0  ;;  %v3769_v55 = vmax.f32 %v3737_v51, 0.0  ;;  %v3770_v31 = vmax.f32 %v3738_v24, 0.0  ;;  %v3771_v52 = vmax.f32 %v3739_v0, 0.0 }
 0x25c   : > { %v3772_v50 = vmax.f32 %v3740_v60, 0.0  ;;  %v3773_v11 = vmax.f32 %v3741_v3, 0.0  ;;  %v3774_v27 = vmax.f32 %v3742_v53, 0.0  ;;  %v3775_v37 = vmax.f32 %v3743_v15, 0.0 }
 0x25d   : > { %v3776_v20 = vmax.f32 %v3744_v18, 0.0  ;;  %v3777_v8 = vmax.f32 %v3745_v32, 0.0  ;;  %v3778_v5 = vmax.f32 %v3746_v58, 0.0  ;;  %v3781_v28 = vmax.f32 %v3749_v45, 0.0 }
 0x25e   : > { %v3782_v41 = vmax.f32 %v3750_v43, 0.0  ;;  %v10232_v7 = vpack.c.bf16 %v3752_v4, %v3751_v21  ;;  %v10234_v44 = vpack.c.bf16 %v3754_v59, %v3753_v48  ;;  %v10236_v23 = vpack.c.bf16 %v3756_v47, %v3755_v9  ;;  %v13253_v48 = vld [vmem:[#allocation7_spill] sm:$0xff] }
 0x25f   : > { %v10238_v6 = vpack.c.bf16 %v3758_v57, %v3757_v62  ;;  %v10240_v13 = vpack.c.bf16 %v3760_v35, %v3759_v34  ;;  %v10242_v17 = vpack.c.bf16 %v3762_v16, %v3761_v61  ;;  %v10244_v1 = vpack.c.bf16 %v3764_v54, %v3763_v26  ;;  %v13260_v57 = vld [vmem:[#allocation8_spill] sm:$0xff] }
 0x260   : > { %13233 = vst [vmem:[#allocation2_spill] sm:$0xff] %v10232_v7  ;;  %13234 = vst [vmem:[#allocation3_spill] sm:$0xff] %v10234_v44  ;;  %v10246_v36 = vpack.c.bf16 %v3766_v38, %v3765_v19  ;;  %v10248_v63 = vpack.c.bf16 %v3768_v29, %v3767_v46  ;;  %v10250_v22 = vpack.c.bf16 %v3770_v31, %v3769_v55  ;;  %7714 = vmatprep.mubr.msk.bf16.mxu1 %vm13244_vm12, %v10234_v44  ;;  %vm13255_vm12 = vsmask.f32 7424  ;;  %v10330_v29 = vld [vmem:[%s12424_s2 + $0xa] sm:$0x3] }
 0x261   : > { %13235 = vst [vmem:[#allocation4_spill] sm:$0xff] %v10236_v23  ;;  %13236 = vst [vmem:[#allocation9_spill] sm:$0xff] %v10238_v6  ;;  %v10252_v25 = vpack.c.bf16 %v3772_v50, %v3771_v52  ;;  %v10261_v49 = vpack.c.bf16 %v3774_v27, %v3773_v11  ;;  %v10263_v39 = vpack.c.bf16 %v3776_v20, %v3775_v37  ;;  %7715 = vmatmul.mubr.msk.bf16.vlgmr.msra.gmra.mxu1 %vm13250_vm1, %v10232_v7  ;;  %vm13257_vm1 = vsmask.f32 256 }
 0x262   : > { %13237 = vst [vmem:[#allocation10_spill] sm:$0xff] %v10240_v13  ;;  %13238 = vst [vmem:[#allocation11_spill] sm:$0xff] %v10242_v17  ;;  %v10265_v14 = vpack.c.bf16 %v3778_v5, %v3777_v8  ;;  %v10267_v30 = vpack.c.bf16 %v3782_v41, %v3781_v28  ;;  %7781 = vmatpush3.bf16.msra.mxu1 %v10203_v2  ;;  %7718 = vmatprep.mubr.msk.bf16.mxu1 %vm13141_vm0, %v10234_v44  ;;  %v12604_v12 = vshrl.u32 %v10227_v33, 16 }
 0x263   : > { %13239 = vst [vmem:[#allocation17_spill] sm:$0xff] %v10244_v1  ;;  %13240 = vst [vmem:[#allocation18_spill] sm:$0xff] %v10246_v36  ;;  %v3805_v42 = vshrl.u32 %v10234_v44, 16  ;;  %v3808_v10 = vshll.u32 %v10234_v44, 16  ;;  %v3812_v51 = vshrl.u32 %v10232_v7, 16  ;;  %v3815_v24 = vshll.u32 %v10232_v7, 16  ;;  %8031 = vmatprep.subr.msk.bf16.mxu1 %vm13251_vm7, %v10259_v56 }
 0x264   : > { %13241 = vst [vmem:[#allocation61_spill] sm:$0xff] %v10248_v63  ;;  %13242 = vst [vmem:[#allocation66_spill] sm:$0xff] %v10250_v22  ;;  %v3821_v0 = vshrl.u32 %v10236_v23, 16  ;;  %v10286_v53 = vrot.slane %v12604_v12, 7  ;;  %v3824_v18 = vshll.u32 %v10236_v23, 16  ;;  %vm13254_vm11 = vnez %v13253_v48 }
 0x265   : > { %13243 = vst [vmem:[#allocation23_spill] sm:$0xff] %v10252_v25  ;;  %13246 = vst [vmem:[#allocation21_spill] sm:$0xff] %v10261_v49  ;;  %v3807_v60 = vrot.slane %v3805_v42, 7  ;;  %v3814_v2 = vrot.slane %v3812_v51, 7  ;;  %v10282_v3 = vrot.slane %v3808_v10, 1  ;;  %v3950_v15 = vrot.slane %v3815_v24, 1 }
 0x266   : > { %13247 = vst [vmem:[#allocation26_spill] sm:$0xff] %v10263_v39  ;;  %13248 = vst [vmem:[#allocation65_spill] sm:$0xff] %v10265_v14  ;;  %v3823_v43 = vrot.slane %v3821_v0, 7  ;;  %v3954_v4 = vrot.slane %v3824_v18, 1  ;;  %vm13261_vm7 = vnez %v13260_v57  ;;  %v3832_v46 = vshll.u32 %v10238_v6, 16 }
 0x267   : > { %13249 = vst [vmem:[#allocation62_spill] sm:$0xff] %v10267_v30  ;;  %13252 = vst [vmem:[#allocation64_spill] sm:$0xff] %v10282_v3  ;;  %v3810_v32 = vor.u32 %v3808_v10, %v3807_v60  ;;  %v3817_v58 = vor.u32 %v3815_v24, %v3814_v2  ;;  %v3949_v45 = vor.u32 %v10282_v3, %v3805_v42  ;;  %v3829_v31 = vshrl.u32 %v10238_v6, 16 }
 0x268   : > { %v3952_v21 = vor.u32 %v3950_v15, %v3812_v51  ;;  %vm13259_vm0 = vmmov %vm13257_vm1  ;;  %v3956_v19 = vor.u32 %v3954_v4, %v3821_v0  ;;  %v3826_v38 = vor.u32 %v3824_v18, %v3823_v43  ;;  %13270 = vst [vmem:[#allocation70_spill] sm:$0xff] %v10330_v29  ;;  %v3837_v52 = vshrl.u32 %v10240_v13, 16 }
 0x269   : > { %v10293_v59 = vsel %vm13254_vm11, %v10286_v53, %v3810_v32  ;;  %v10296_v9 = vsel %vm13255_vm12, %v3949_v45, %v3950_v15  ;;  %v10299_v47 = vsel %vm13257_vm1, %v3807_v60, %v3817_v58  ;;  %v10302_v62 = vsel %vm13259_vm0, %v3814_v2, %v3810_v32  ;;  %7719 = vmatmul.mubr.msk.bf16.gmra.mxu1 %vm13262_vm13, %v10236_v23  ;;  %vm13263_vm11 = vmmov %vm13255_vm12 }
 0x26a   : > { %13256 = vst [vmem:[#allocation28_spill] sm:$0xff] %v10296_v9  ;;  %13258 = vst [vmem:[#allocation68_spill] sm:$0xff] %v10299_v47  ;;  %v4017_v34 = vsel %vm13261_vm7, %v10296_v9, %v10293_v59  ;;  %v10312_v35 = vsel %vm13263_vm11, %v3952_v21, %v10282_v3  ;;  %vm13266_vm1 = vcmask 1041408   ;;  %v3840_v50 = vshll.u32 %v10240_v13, 16 }
 0x26b   : > { %13264 = vst [vmem:[#allocation33_spill] sm:$0xff] %v10312_v35  ;;  %vm13265_vm12 = vmmov %vm13263_vm11  ;;  %v4787_v16 = vsel %vm13266_vm1, %v10107_v40, 0  ;;  %v4018_v54 = vsel %vm12977_vm10, %v10312_v35, %v10299_v47  ;;  %v13272_v40 = vld [vmem:[#allocation13_spill] sm:$0xff]  ;;  %v3957_v11 = vrot.slane %v3832_v46, 1  ;;  %v3848_v27 = vshll.u32 %v10242_v17, 16  ;;  %v13360_v47 = vld [vmem:[#allocation55_spill] sm:$0xff] }
 0x26c   : > { %v10315_v61 = vsel %vm13265_vm12, %v3949_v45, %v3954_v4  ;;  %vm13267_vm0 = vmmov %vm13262_vm13  ;;  %vm13273_vm11 = vnez %v13272_v40  ;;  %v3845_v37 = vshrl.u32 %v10242_v17, 16  ;;  %v3831_v20 = vrot.slane %v3829_v31, 7  ;;  %v13284_v45 = vld [vmem:[#allocation19_spill] sm:$0xff] }
 0x26d   : > { %7748 = vmatprep.mubr.msk.bf16.mxu0 %vm13267_vm0, %v4017_v34  ;;  %vm13269_vm7 = vmmov %vm13267_vm0  ;;  %v4019_v55 = vsel %vm13273_vm11, %v10315_v61, %v10302_v62  ;;  %v3959_v8 = vor.u32 %v3957_v11, %v3829_v31  ;;  %v3960_v5 = vrot.slane %v3840_v50, 1  ;;  %v3839_v10 = vrot.slane %v3837_v52, 7 }
 0x26e   : > { %7722 = vmatprep.mubr.msk.bf16.mxu1 %vm13269_vm7, %v10238_v6  ;;  %vm13271_vm13 = vmmov %vm13267_vm0  ;;  %v3834_v42 = vor.u32 %v3832_v46, %v3831_v20  ;;  %v3963_v24 = vrot.slane %v3848_v27, 1  ;;  %v3847_v0 = vrot.slane %v3845_v37, 7  ;;  %v3856_v15 = vshll.u32 %v10244_v1, 16 }
 0x26f   : > { %7749 = vmatmul.mubr.msk.bf16.vlgmr.msra.gmra.mxu0 %vm13271_vm13, %v4018_v54  ;;  %vm13274_vm7 = vmmov %vm13267_vm0  ;;  %vm13277_vm0 = vsmask.f32 7424  ;;  %v3962_v32 = vor.u32 %v3960_v5, %v3837_v52  ;;  %v3853_v58 = vshrl.u32 %v10244_v1, 16  ;;  %v3842_v21 = vor.u32 %v3840_v50, %v3839_v10 }
 0x270   : > { %7752 = vmatprep.mubr.msk.bf16.mxu0 %vm13274_vm7, %v4019_v55  ;;  %7815 = vmatpush3.bf16.msra.mxu0 %v4787_v16  ;;  %vm13275_vm12 = vmmov %vm13266_vm1  ;;  %vm13276_vm1 = vsmask.f32 256  ;;  %v10349_v41 = vsel %vm13277_vm0, %v3956_v19, %v3957_v11  ;;  %v3864_v4 = vshll.u32 %v10246_v36, 16  ;;  %v3861_v48 = vshrl.u32 %v10246_v36, 16 }
 0x271   : > { %8032 = vmatprep.subr.msk.bf16.mxu0 %vm13275_vm12, %v10330_v29  ;;  %v10346_v28 = vsel %vm13276_vm1, %v3807_v60, %v3826_v38  ;;  %vm13278_vm13 = vmmov %vm13277_vm0  ;;  %7723 = vmatmul.mubr.msk.bf16.gmra.mxu1 %vm13274_vm7, %v10240_v13  ;;  %v13280_v60 = vld [vmem:[#allocation16_spill] sm:$0xff]  ;;  %v3850_v34 = vor.u32 %v3848_v27, %v3847_v0  ;;  %v3965_v16 = vor.u32 %v3963_v24, %v3845_v37  ;;  %v3966_v54 = vrot.slane %v3856_v15, 1  ;;  %v13294_v37 = vld [vmem:[#allocation22_spill] sm:$0xff] }
 0x272   : > { %v10352_v51 = vsel %vm13278_vm13, %v3959_v8, %v3960_v5  ;;  %vm13279_vm11 = vmmov %vm13276_vm1  ;;  %vm13281_vm12 = vnez %v13280_v60  ;;  %v3855_v19 = vrot.slane %v3853_v58, 7  ;;  %v3969_v55 = vrot.slane %v3864_v4, 1  ;;  %v13410_v9 = vld [vmem:[#allocation28_spill] sm:$0xff] }
 0x273   : > { %v10357_v2 = vsel %vm13279_vm11, %v3823_v43, %v3834_v42  ;;  %v4020_v18 = vsel %vm13281_vm12, %v10349_v41, %v10346_v28  ;;  %vm13282_vm1 = vmmov %vm13274_vm7  ;;  %vm13285_vm11 = vnez %v13284_v45  ;;  %vm13287_vm7 = vsmask.f32 256 }
 0x274   : > { %7726 = vmatprep.mubr.msk.bf16.mxu1 %vm13282_vm1, %v10242_v17  ;;  %vm13283_vm0 = vmmov %vm13282_vm1  ;;  %v4021_v43 = vsel %vm13285_vm11, %v10352_v51, %v10357_v2  ;;  %v10376_v38 = vsel %vm13287_vm7, %v3831_v20, %v3842_v21  ;;  %vm13289_vm1 = vsmask.f32 7424  ;;  %v10381_v31 = vrot.slane %v3861_v48, 7 }
 0x275   : > { %vm13286_vm13 = vmmov %vm13283_vm0  ;;  %13288 = vst [vmem:[#allocation67_spill] sm:$0xff] %v10376_v38  ;;  %v10379_v46 = vsel %vm13289_vm1, %v3962_v32, %v3963_v24  ;;  %v3872_v11 = vshll.u32 %v10248_v63, 16  ;;  %v3968_v27 = vor.u32 %v3966_v54, %v3853_v58  ;;  %v3858_v8 = vor.u32 %v3856_v15, %v3855_v19 }
 0x276   : > { %13290 = vst [vmem:[#allocation77_spill] sm:$0xff] %v10379_v46  ;;  %vm13292_vm11 = vmmov %vm13289_vm1  ;;  %v3869_v5 = vshrl.u32 %v10248_v63, 16  ;;  %v3880_v42 = vshll.u32 %v10250_v22, 16  ;;  %v3971_v32 = vor.u32 %v3969_v55, %v3861_v48  ;;  %v3877_v58 = vshrl.u32 %v10250_v22, 16 }
 0x277   : > { %7753 = vmatmul.mubr.msk.bf16.gmra.mxu0 %vm13283_vm0, %v4020_v18  ;;  %vm13291_vm0 = vmmov %vm13287_vm7  ;;  %v10387_v50 = vsel %vm13292_vm11, %v3965_v16, %v3966_v54  ;;  %vm13295_vm7 = vnez %v13294_v37  ;;  %v3866_v18 = vor.u32 %v3864_v4, %v10381_v31  ;;  %v3885_v15 = vshrl.u32 %v10252_v25, 16 }
 0x278   : > { %7756 = vmatprep.mubr.msk.bf16.mxu0 %vm13286_vm13, %v4021_v43  ;;  %v10384_v52 = vsel %vm13291_vm0, %v3839_v10, %v3850_v34  ;;  %13293 = vst [vmem:[#allocation69_spill] sm:$0xff] %v10387_v50  ;;  %v4022_v20 = vsel %vm13295_vm7, %v10379_v46, %v10376_v38  ;;  %vm13296_vm1 = vmmov %vm13286_vm13  ;;  %v13298_v10 = vld [vmem:[#allocation24_spill] sm:$0xff]  ;;  %v3972_v43 = vrot.slane %v3872_v11, 1  ;;  %v3888_v21 = vshll.u32 %v10252_v25, 16 }
 0x279   : > { %7727 = vmatmul.mubr.msk.bf16.gmra.mxu1 %vm13286_vm13, %v10244_v1  ;;  %vm13297_vm11 = vmmov %vm13296_vm1  ;;  %vm13299_vm0 = vnez %v13298_v10  ;;  %v3896_v34 = vshll.u32 %v10261_v49, 16  ;;  %v3893_v16 = vshrl.u32 %v10261_v49, 16  ;;  %v3901_v54 = vshrl.u32 %v10263_v39, 16 }
 0x27a   : > { %7730 = vmatprep.mubr.msk.bf16.mxu1 %vm13296_vm1, %v10246_v36  ;;  %v4023_v24 = vsel %vm13299_vm0, %v10387_v50, %v10384_v52  ;;  %vm13300_vm13 = vmmov %vm13296_vm1  ;;  %v3916_v4 = vshll.u32 %v10227_v33, 16  ;;  %vm13301_vm1 = vsmask.f32 256  ;;  %v3871_v12 = vrot.slane %v3869_v5, 7 }
 0x27b   : > { %v10416_v48 = vsel %vm13301_vm1, %v3847_v0, %v3858_v8  ;;  %v3879_v13 = vrot.slane %v3877_v58, 7  ;;  %v3978_v6 = vrot.slane %v3888_v21, 1  ;;  %v3887_v23 = vrot.slane %v3885_v15, 7 }
 0x27c   : > { %v3912_v44 = vshll.u32 %v10265_v14, 16  ;;  %v3909_v7 = vshrl.u32 %v10265_v14, 16  ;;  %v3981_v0 = vrot.slane %v3896_v34, 1  ;;  %v3895_v8 = vrot.slane %v3893_v16, 7 }
 0x27d   : > { %v10431_v29 = vrot.slane %v3916_v4, 1  ;;  %v3874_v3 = vor.u32 %v3872_v11, %v3871_v12  ;;  %v3882_v10 = vor.u32 %v3880_v42, %v3879_v13  ;;  %v3980_v45 = vor.u32 %v3978_v6, %v3885_v15 }
 0x27e   : > { %v3890_v60 = vor.u32 %v3888_v21, %v3887_v23  ;;  %v3911_v40 = vrot.slane %v3909_v7, 7  ;;  %v3898_v26 = vor.u32 %v3896_v34, %v3895_v8  ;;  %v3983_v57 = vor.u32 %v3981_v0, %v3893_v16 }
 0x27f   : > { %7757 = vmatmul.mubr.msk.bf16.gmra.mxu0 %vm13297_vm11, %v4022_v20  ;;  %v3904_v20 = vshll.u32 %v10263_v39, 16  ;;  %vm13302_vm11 = vsmask.f32 7424 }
 0x280   : > { %7760 = vmatprep.mubr.msk.bf16.mxu0 %vm13300_vm13, %v4023_v24  ;;  %v3975_v24 = vrot.slane %v3880_v42, 1  ;;  %v10419_v36 = vsel %vm13302_vm11, %v3968_v27, %v3969_v55  ;;  %vm13303_vm13 = vmmov %vm13301_vm1  ;;  %vm13306_vm1 = vcmask 31744   ;;  %v3903_v27 = vrot.slane %v3901_v54, 7 }
 0x281   : > { %v10422_v1 = vsel %vm13303_vm13, %v3855_v19, %v3866_v18  ;;  %vm13304_vm0 = vmmov %vm13302_vm11  ;;  %7731 = vmatmul.mubr.msk.bf16.gmra.mxu1 %vm13306_vm1, %v10248_v63  ;;  %v3984_v55 = vrot.slane %v3904_v20, 1  ;;  %v13307_v19 = vld [vmem:[#allocation27_spill] sm:$0xff]  ;;  %v13311_v63 = vld [vmem:[#allocation29_spill] sm:$0xff] }
 0x282   : > { %v10425_v17 = vsel %vm13304_vm0, %v3971_v32, %v3972_v43  ;;  %vm13308_vm0 = vnez %v13307_v19  ;;  %vm13309_vm11 = vmmov %vm13306_vm1  ;;  %v3974_v32 = vor.u32 %v3972_v43, %v3869_v5  ;;  %v3977_v37 = vor.u32 %v3975_v24, %v3877_v58 }
 0x283   : > { %13305 = vst [vmem:[#allocation82_spill] sm:$0xff] %v10425_v17  ;;  %v4024_v18 = vsel %vm13308_vm0, %v10419_v36, %v10416_v48  ;;  %7734 = vmatprep.mubr.msk.bf16.mxu1 %vm13309_vm11, %v10250_v22  ;;  %vm13310_vm13 = vmmov %vm13306_vm1  ;;  %vm13312_vm1 = vnez %v13311_v63  ;;  %v3987_v19 = vrot.slane %v3912_v44, 1  ;;  %v3986_v22 = vor.u32 %v3984_v55, %v3901_v54 }
 0x284   : > { %v4025_v56 = vsel %vm13312_vm1, %v10425_v17, %v10422_v1  ;;  %vm13313_vm7 = vmmov %vm13309_vm11  ;;  %v3906_v5 = vor.u32 %v3904_v20, %v3903_v27  ;;  %v3924_v43 = vshll.u32 %v10267_v30, 16  ;;  %v13314_v63 = vshrl.u32 %v10227_v33, 16  ;;  %v13340_v20 = vld [vmem:[#allocation39_spill] sm:$0xff] }
 0x285   : > { %vm13316_vm11 = vsmask.f32 7424  ;;  %v3989_v16 = vor.u32 %v3987_v19, %v3909_v7 }
 0x286   : > { %v10452_v11 = vor.u32 %v10431_v29, %v13314_v63  ;;  %v10459_v42 = vsel %vm13316_vm11, %v3974_v32, %v3975_v24  ;;  %vm13319_vm1 = vmmov %vm13316_vm11  ;;  %v3914_v63 = vor.u32 %v3912_v44, %v3911_v40  ;;  %v13331_v44 = vld [vmem:[#allocation35_spill] sm:$0xff]  ;;  %v13348_v32 = vld [vmem:[#allocation46_spill] sm:$0xff] }
 0x287   : > { %7761 = vmatmul.mubr.msk.bf16.gmra.mxu0 %vm13310_vm13, %v4024_v18  ;;  %v10447_v18 = vor.u32 %v3916_v4, %v10286_v53  ;;  %v10465_v15 = vsel %vm13319_vm1, %v3977_v37, %v3978_v6  ;;  %vm13322_vm12 = vmmov %vm13319_vm1  ;;  %v3993_v37 = vrot.slane %v3924_v43, 1 }
 0x288   : > { %7764 = vmatprep.mubr.msk.bf16.mxu0 %vm13313_vm7, %v4025_v56  ;;  %vm13315_vm7 = vsmask.f32 256  ;;  %13320 = vst [vmem:[#allocation30_spill] sm:$0xff] %v10465_v15  ;;  %v10471_v34 = vsel %vm13322_vm12, %v3980_v45, %v3981_v0  ;;  %vm13325_vm11 = vmmov %vm13319_vm1 }
 0x289   : > { %v10456_v56 = vsel %vm13315_vm7, %v10381_v31, %v3874_v3  ;;  %vm13317_vm13 = vmmov %vm13315_vm7 }
 0x28a   : > { %v10462_v58 = vsel %vm13317_vm13, %v3871_v12, %v3882_v10  ;;  %vm13321_vm0 = vmmov %vm13315_vm7  ;;  %vm13323_vm7 = vcmask 31744   ;;  %v10479_v12 = vsel %vm13325_vm11, %v3983_v57, %v3984_v55  ;;  %v13334_v57 = vld [vmem:[#allocation37_spill] sm:$0xff]  ;;  %v13338_v10 = vld [vmem:[#allocation38_spill] sm:$0xff] }
 0x28b   : > { %13318 = vst [vmem:[#allocation85_spill] sm:$0xff] %v10462_v58  ;;  %v10468_v21 = vsel %vm13321_vm0, %v3879_v13, %v3890_v60  ;;  %7735 = vmatmul.mubr.msk.bf16.gmra.mxu1 %vm13323_vm7, %v10252_v25  ;;  %vm13324_vm10 = vmmov %vm13321_vm0  ;;  %v10485_v13 = vsel %vm13319_vm1, %v3986_v22, %v3987_v19  ;;  %v13328_v60 = vld [vmem:[#allocation32_spill] sm:$0xff]  ;;  %vm13335_vm11 = vnez %v13334_v57  ;;  %v13347_v19 = vld [vmem:[#allocation45_spill] sm:$0xff] }
 0x28c   : > { %v10476_v3 = vsel %vm13324_vm10, %v3887_v23, %v3898_v26  ;;  %13326 = vst [vmem:[#allocation5_spill] sm:$0xff] %v10479_v12  ;;  %vm13327_vm13 = vmmov %vm13321_vm0  ;;  %vm13329_vm12 = vnez %v13328_v60  ;;  %vm13332_vm10 = vnez %v13331_v44  ;;  %v4028_v22 = vsel %vm13335_vm11, %v10471_v34, %v10468_v21  ;;  %v13336_v26 = vld [vmem:[#allocation43_spill] sm:$0xff]  ;;  %v13397_v60 = vld [vmem:[#allocation41_spill] sm:$0xff] }
 0x28d   : > { %v10482_v6 = vsel %vm13327_vm13, %v3895_v8, %v3906_v5  ;;  %v4026_v7 = vsel %vm13329_vm12, %v10459_v42, %v10456_v56  ;;  %vm13330_vm0 = vmmov %vm13323_vm7  ;;  %v4027_v23 = vsel %vm13332_vm10, %v10465_v15, %v10462_v58  ;;  %v10508_v31 = vsel %vm13327_vm13, %v3911_v40, %v10447_v18  ;;  %v13352_v5 = vld [vmem:[#allocation50_spill] sm:$0xff]  ;;  %v13402_v57 = vld [vmem:[#allocation60_spill] sm:$0xff] }
 0x28e   : > { %7738 = vmatprep.mubr.msk.bf16.mxu1 %vm13330_vm0, %v10261_v49  ;;  %vm13333_vm7 = vmmov %vm13330_vm0  ;;  %vm13343_vm11 = vsmask.f32 7424  ;;  %v3921_v8 = vshrl.u32 %v10267_v30, 16  ;;  %v13367_v30 = vld [vmem:[#allocation57_spill] sm:$0xff]  ;;  %vm13398_vm12 = vnez %v13397_v60  ;;  %vm13399_vm10 = vsmask.f32 256 }
 0x28f   : > { %7765 = vmatmul.mubr.msk.bf16.gmra.mxu0 %vm13333_vm7, %v4026_v7  ;;  %vm13337_vm1 = vmmov %vm13330_vm0  ;;  %vm13339_vm0 = vnez %v13338_v10  ;;  %v10524_v40 = vsel %vm13343_vm11, %v3989_v16, %v10431_v29  ;;  %v13353_v16 = vld [vmem:[#allocation51_spill] sm:$0xff] }
 0x290   : > { %7768 = vmatprep.mubr.msk.bf16.mxu0 %vm13337_vm1, %v4027_v23  ;;  %v4029_v54 = vsel %vm13339_vm0, %v10479_v12, %v10476_v3  ;;  %vm13341_vm7 = vmmov %vm13327_vm13  ;;  %13344 = vst [vmem:[#allocation14_spill] sm:$0xff] %v10524_v40  ;;  %v3923_v4 = vrot.slane %v3921_v8, 7  ;;  %v3995_v45 = vor.u32 %v3993_v37, %v3921_v8  ;;  %v13354_v23 = vld [vmem:[#allocation52_spill] sm:$0xff]  ;;  %v13394_v8 = vld [vmem:[#allocation29_spill] sm:$0xff]  ;;  %vm13403_vm1 = vnez %v13402_v57 }
 0x291   : > { %v10520_v24 = vsel %vm13341_vm7, %v3903_v27, %v3914_v63  ;;  %vm13345_vm13 = vmmov %vm13343_vm11  ;;  %v13356_v27 = vld [vmem:[#allocation53_spill] sm:$0xff]  ;;  %vm13363_vm11 = vsmask.f32 7424  ;;  %v13412_v57 = vld [vmem:[#allocation54_spill] sm:$0xff]  ;;  %v13512_v63 = vsel %vm8757_vm6, %v10384_v52, %v10387_v50 }
 0x292   : > { %13342 = vst [vmem:[#allocation72_spill] sm:$0xff] %v10520_v24  ;;  %v10528_v0 = vsel %vm13345_vm13, %v10452_v11, %v3993_v37  ;;  %v3926_v35 = vor.u32 %v3924_v43, %v3923_v4  ;;  %v10583_v25 = vsel %vm13363_vm11, %v3995_v45, %v10431_v29  ;;  %v13365_v37 = vld [vmem:[#allocation56_spill] sm:$0xff]  ;;  %vm13369_vm13 = vmmov %vm13362_vm3  ;;  %v13370_v43 = vld [vmem:[#allocation58_spill] sm:$0xff]  ;;  %v10675_v44 = vsel %vm13399_vm10, %v3923_v4, %v10447_v18 }
 0x293   : > { %13346 = vst [vmem:[#allocation74_spill] sm:$0xff] %v10528_v0  ;;  %7739 = vmatmul.mubr.msk.bf16.gmra.mxu1 %vm13362_vm3, %v10263_v39  ;;  %13364 = vst [vmem:[#allocation71_spill] sm:$0xff] %v10583_v25  ;;  %vm13371_vm3 = vnez %v13370_v43  ;;  %v13380_v29 = vld [vmem:[#allocation16_spill] sm:$0xff]  ;;  %vm13405_vm10 = vcmask 31744   ;;  %v13411_v18 = vsel %vm12921_vm14, %v10293_v59, %v13410_v9  ;;  %vm13413_vm0 = vnez %v13412_v57  ;;  %v13419_v4 = vld [vmem:[#allocation63_spill] sm:$0xff] }
 0x294   : > { %7742 = vmatprep.mubr.msk.bf16.mxu1 %vm13369_vm13, %v10265_v14  ;;  %v10614_v49 = vsel %vm13378_vm4, %v10286_v53, %v3926_v35  ;;  %v13386_v53 = vld [vmem:[#allocation44_spill] sm:$0xff]  ;;  %v13392_v14 = vld [vmem:[#allocation27_spill] sm:$0xff]  ;;  %13400 = vst [vmem:[#allocation34_spill] sm:$0xff] %v10675_v44  ;;  %vm13415_vm7 = vnez %v13365_v37  ;;  %v13417_v9 = vsel %vm13027_vm8, %v10485_v13, %v10482_v6  ;;  %vm13418_vm14 = vmmov %vm13405_vm10  ;;  %vm13420_vm8 = vcmask 1041408  }
 0x295   : > { %13379 = vst [vmem:[#allocation73_spill] sm:$0xff] %v10614_v49  ;;  %vm13387_vm4 = vnez %v13386_v53  ;;  %v13390_v39 = vld [vmem:[#allocation24_spill] sm:$0xff]  ;;  %v13421_v45 = vld [vmem:[#allocation33_spill] sm:$0xff]  ;;  %v13493_v53 = vld [vmem:[#allocation10_spill] sm:$0xff] }
 0x296   : > { %v13425_v59 = vld [vmem:[#allocation8_spill] sm:$0xff]  ;;  %v13519_v7 = vld [vmem:[#allocation23_spill] sm:$0xff] }
 0x297   : > { %7769 = vmatmul.mubr.msk.bf16.gmra.mxu0 %vm13369_vm13, %v4028_v22  ;;  %v13388_v22 = vld [vmem:[#allocation59_spill] sm:$0xff]  ;;  %v13432_v44 = vld [vmem:[#allocation12_spill] sm:$0xff] }
 0x298   : > { %7772 = vmatprep.mubr.msk.bf16.mxu0 %vm13369_vm13, %v4029_v54  ;;  %vm13389_vm11 = vnez %v13388_v22  ;;  %v13401_v54 = vld [vmem:[#allocation64_spill] sm:$0xff]  ;;  %vm13414_vm13 = vnez %v13360_v47 }
 0x299   : > { %v10681_v10 = vsel %vm13403_vm1, %v10452_v11, %v13401_v54  ;;  %vm13406_vm1 = vnez %v13352_v5  ;;  %v13422_v11 = vld [vmem:[#allocation68_spill] sm:$0xff]  ;;  %v4036_v54 = vsel %vm8713_vm9, %v10346_v28, %v10349_v41 }
 0x29a   : > { %13404 = vst [vmem:[#allocation76_spill] sm:$0xff] %v10681_v10  ;;  %v4034_v35 = vsel %vm13042_vm15, %v13422_v11, %v13421_v45  ;;  %vm13426_vm15 = vnez %v13425_v59  ;;  %v6998_v10 = vld [vmem:[%s12424_s2 + $0xe] sm:$0x3]  ;;  %v13545_v57 = vld [vmem:[#allocation8_spill] sm:$0xff] }
 0x29b   : > { %7743 = vmatmul.mubr.msk.bf16.gmra.mxu1 %vm13405_vm10, %v10227_v33  ;;  %v10779_v33 = vld [vmem:[%s12424_s2 + $0xc] sm:$0x3] }
 0x29c   : > { %7782 = vmatprep.mubr.msk.bf16.mxu1 %vm13405_vm10, %v13411_v18  ;;  %v4031_v18 = vsel %vm13398_vm12, %v10524_v40, %v10520_v24 }
 0x29f   : > { %7773 = vmatmul.mubr.msk.bf16.gmra.mxu0 %vm13405_vm10, %v13417_v9  ;;  %v4987_v9 = vsel %vm13420_vm8, %v13419_v4, 0  ;;  %v4032_v4 = vsel %vm13387_vm4, %v10528_v0, %v10508_v31  ;;  %vm13424_vm8 = vmmov %vm13405_vm10 }
 0x2a0   : > { %7776 = vmatprep.mubr.msk.bf16.mxu0 %vm13418_vm14, %v4031_v18  ;;  %v4035_v18 = vsel %vm12929_vm5, %v10302_v62, %v10315_v61  ;;  %vm13423_vm14 = vmmov %vm13405_vm10 }
 0x2a1   : > { %vm13428_vm12 = vmmov %vm13424_vm8 }
 0x2a2   : > { %vm13429_vm5 = vmmov %vm13424_vm8 }
 0x2a3   : > { %7783 = vmatmul.mubr.msk.bf16.vlgmr.msra.gmra.mxu1 %vm13405_vm10, %v4034_v35  ;;  %v4704_v35 = vsel %vm13426_vm15, %v13421_v45, %v13422_v11  ;;  %vm13427_vm10 = vcmask 1041408   ;;  %vm13437_vm15 = vmmov %vm13429_vm5 }
 0x2a4   : > { %7849 = vmatpush3.bf16.msra.mxu1 %v4987_v9  ;;  %7786 = vmatprep.mubr.msk.bf16.mxu1 %vm13423_vm14, %v4035_v18  ;;  %v4037_v9 = vsel %vm12937_vm2, %v10357_v2, %v10352_v51  ;;  %v13430_v18 = vld [vmem:[#allocation70_spill] sm:$0xff]  ;;  %vm13431_vm14 = vmmov %vm13427_vm10 }
 0x2a5   : > { %8033 = vmatprep.subr.msk.bf16.mxu1 %vm13427_vm10, %v10779_v33 }
 0x2a7   : > { %7777 = vmatmul.mubr.msk.bf16.gmra.mxu0 %vm13424_vm8, %v4032_v4  ;;  %v5233_v4 = vsel %vm13431_vm14, %v13430_v18, 0  ;;  %vm13433_vm8 = vnez %v13432_v44  ;;  %v4039_v18 = vsel %vm13406_vm1, %v10384_v52, %v10387_v50 }
 0x2a8   : > { %7816 = vmatprep.mubr.msk.bf16.mxu0 %vm13428_vm12, %v4704_v35  ;;  %v4705_v35 = vsel %vm13433_vm8, %v10315_v61, %v10302_v62  ;;  %vm13434_vm12 = vmmov %vm13429_vm5  ;;  %vm13444_vm8 = vnez %v13353_v16 }
 0x2ab   : > { %7787 = vmatmul.mubr.msk.bf16.gmra.mxu1 %vm13429_vm5, %v4036_v54  ;;  %v13435_v54 = vld [vmem:[#allocation13_spill] sm:$0xff] }
 0x2ac   : > { %7790 = vmatprep.mubr.msk.bf16.mxu1 %vm13434_vm12, %v4037_v9  ;;  %vm13436_vm10 = vnez %v13435_v54  ;;  %v4038_v9 = vsel %vm8757_vm6, %v10376_v38, %v10379_v46  ;;  %vm13438_vm12 = vmmov %vm13429_vm5 }
 0x2ad   : > { %v4706_v59 = vsel %vm13436_vm10, %v10349_v41, %v10346_v28  ;;  %vm13445_vm1 = vmmov %vm13438_vm12 }
 0x2af   : > { %7817 = vmatmul.mubr.msk.bf16.vlgmr.msra.gmra.mxu0 %vm13429_vm5, %v4705_v35  ;;  %vm13439_vm5 = vnez %v13380_v29 }
 0x2b0   : > { %7820 = vmatprep.mubr.msk.bf16.mxu0 %vm13437_vm15, %v4706_v59  ;;  %7883 = vmatpush3.bf16.msra.mxu0 %v5233_v4  ;;  %v4707_v59 = vsel %vm13439_vm5, %v10352_v51, %v10357_v2  ;;  %vm13440_vm15 = vmmov %vm13438_vm12  ;;  %v13442_v4 = vld [vmem:[#allocation19_spill] sm:$0xff]  ;;  %vm13451_vm5 = vnez %v13390_v39 }
 0x2b1   : > { %8034 = vmatprep.subr.msk.bf16.mxu0 %vm13431_vm14, %v6998_v10  ;;  %vm13441_vm14 = vmmov %vm13438_vm12  ;;  %vm13443_vm10 = vnez %v13442_v4 }
 0x2b2   : > { %v4708_v35 = vsel %vm13443_vm10, %v10379_v46, %v10376_v38  ;;  %vm13449_vm10 = vmmov %vm13445_vm1 }
 0x2b3   : > { %7791 = vmatmul.mubr.msk.bf16.gmra.mxu1 %vm13438_vm12, %v4038_v9  ;;  %v4040_v9 = vsel %vm13444_vm8, %v10416_v48, %v10419_v36  ;;  %vm13453_vm8 = vmmov %vm13445_vm1 }
 0x2b4   : > { %7794 = vmatprep.mubr.msk.bf16.mxu1 %vm13440_vm15, %v4039_v18  ;;  %vm13446_vm15 = vnez %v13354_v23 }
 0x2b5   : > { %v4041_v18 = vsel %vm13446_vm15, %v10422_v1, %v10425_v17  ;;  %vm13452_vm15 = vnez %v13356_v27  ;;  %v13538_v27 = vsel %vm13414_vm13, %v10476_v3, %v10479_v12 }
 0x2b7   : > { %7821 = vmatmul.mubr.msk.bf16.gmra.mxu0 %vm13441_vm14, %v4707_v59  ;;  %v13447_v59 = vld [vmem:[#allocation22_spill] sm:$0xff] }
 0x2b8   : > { %7824 = vmatprep.mubr.msk.bf16.mxu0 %vm13438_vm12, %v4708_v35  ;;  %vm13448_vm14 = vnez %v13447_v59  ;;  %vm13450_vm12 = vmmov %vm13445_vm1  ;;  %v4710_v35 = vsel %vm13451_vm5, %v10419_v36, %v10416_v48  ;;  %vm13456_vm5 = vnez %v13394_v8 }
 0x2b9   : > { %v4709_v4 = vsel %vm13448_vm14, %v10387_v50, %v10384_v52  ;;  %vm13458_vm14 = vmmov %vm13445_vm1 }
 0x2bb   : > { %7795 = vmatmul.mubr.msk.bf16.gmra.mxu1 %vm13445_vm1, %v4040_v9  ;;  %v4042_v9 = vsel %vm13452_vm15, %v10456_v56, %v10459_v42 }
 0x2bc   : > { %7798 = vmatprep.mubr.msk.bf16.mxu1 %vm13449_vm10, %v4041_v18  ;;  %v4043_v18 = vsel %vm13413_vm0, %v10462_v58, %v10465_v15  ;;  %vm13454_vm10 = vnez %v13392_v14 }
 0x2bf   : > { %7825 = vmatmul.mubr.msk.bf16.gmra.mxu0 %vm13450_vm12, %v4709_v4  ;;  %v4711_v4 = vsel %vm13454_vm10, %v10425_v17, %v10422_v1  ;;  %vm13455_vm12 = vmmov %vm13445_vm1  ;;  %vm13465_vm10 = vnez %v13367_v30 }
 0x2c0   : > { %7828 = vmatprep.mubr.msk.bf16.mxu0 %vm13445_vm1, %v4710_v35  ;;  %v4712_v35 = vsel %vm13456_vm5, %v10459_v42, %v10456_v56 }
 0x2c3   : > { %7799 = vmatmul.mubr.msk.bf16.gmra.mxu1 %vm13453_vm8, %v4042_v9  ;;  %vm13457_vm8 = vmmov %vm13445_vm1  ;;  %v4044_v9 = vsel %vm13414_vm13, %v10468_v21, %v10471_v34 }
 0x2c4   : > { %7802 = vmatprep.mubr.msk.bf16.mxu1 %vm13455_vm12, %v4043_v18  ;;  %v4045_v18 = vsel %vm13415_vm7, %v10476_v3, %v10479_v12  ;;  %vm13466_vm7 = vmmov %vm13445_vm1 }
 0x2c7   : > { %7829 = vmatmul.mubr.msk.bf16.gmra.mxu0 %vm13445_vm1, %v4711_v4  ;;  %v13459_v4 = vld [vmem:[#allocation32_spill] sm:$0xff] }
 0x2c8   : > { %7832 = vmatprep.mubr.msk.bf16.mxu0 %vm13457_vm8, %v4712_v35  ;;  %vm13460_vm12 = vnez %v13459_v4  ;;  %vm13461_vm8 = vmmov %vm13445_vm1  ;;  %v13462_v35 = vld [vmem:[#allocation35_spill] sm:$0xff] }
 0x2c9   : > { %v4713_v8 = vsel %vm13460_vm12, %v10465_v15, %v10462_v58  ;;  %vm13463_vm5 = vnez %v13462_v35  ;;  %vm13473_vm12 = vmmov %vm13466_vm7 }
 0x2ca   : > { %v4714_v14 = vsel %vm13463_vm5, %v10471_v34, %v10468_v21 }
 0x2cb   : > { %7803 = vmatmul.mubr.msk.bf16.gmra.mxu1 %vm13458_vm14, %v4044_v9  ;;  %vm13464_vm14 = vmmov %vm13445_vm1  ;;  %v4046_v9 = vsel %vm13465_vm10, %v10482_v6, %v10485_v13 }
 0x2cc   : > { %7806 = vmatprep.mubr.msk.bf16.mxu1 %vm13445_vm1, %v4045_v18  ;;  %v4047_v18 = vsel %vm13371_vm3, %v10520_v24, %v10524_v40 }
 0x2cf   : > { %7833 = vmatmul.mubr.msk.bf16.gmra.mxu0 %vm13461_vm8, %v4713_v8  ;;  %v13467_v8 = vld [vmem:[#allocation37_spill] sm:$0xff]  ;;  %vm13469_vm8 = vmmov %vm13466_vm7 }
 0x2d0   : > { %7836 = vmatprep.mubr.msk.bf16.mxu0 %vm13464_vm14, %v4714_v14  ;;  %vm13468_vm1 = vnez %v13467_v8  ;;  %vm13470_vm14 = vmmov %vm13466_vm7  ;;  %v13471_v14 = vld [vmem:[#allocation38_spill] sm:$0xff] }
 0x2d1   : > { %v4715_v35 = vsel %vm13468_vm1, %v10479_v12, %v10476_v3  ;;  %vm13472_vm5 = vnez %v13471_v14  ;;  %vm13477_vm1 = vmmov %vm13466_vm7  ;;  %v13481_v14 = vld [vmem:[#allocation3_spill] sm:$0xff] }
 0x2d2   : > { %v4716_v4 = vsel %vm13472_vm5, %v10485_v13, %v10482_v6  ;;  %vm13479_vm5 = vmmov %vm13477_vm1 }
 0x2d3   : > { %7807 = vmatmul.mubr.msk.bf16.gmra.mxu1 %vm13466_vm7, %v4046_v9  ;;  %v4048_v9 = vsel %vm13389_vm11, %v10508_v31, %v10528_v0  ;;  %vm13480_vm11 = vcmask 1041408  }
 0x2d4   : > { %7810 = vmatprep.mubr.msk.bf16.mxu1 %vm13469_vm8, %v4047_v18  ;;  %vm13474_vm8 = vnez %v13340_v20  ;;  %v7015_v20 = vld [vmem:[%s12424_s2 + $0x10] sm:$0x3] }
 0x2d5   : > { %v4717_v18 = vsel %vm13474_vm8, %v10524_v40, %v10520_v24 }
 0x2d7   : > { %7837 = vmatmul.mubr.msk.bf16.gmra.mxu0 %vm13470_vm14, %v4715_v35  ;;  %v13475_v35 = vld [vmem:[#allocation2_spill] sm:$0xff]  ;;  %vm13476_vm14 = vmmov %vm13466_vm7 }
 0x2d8   : > { %7840 = vmatprep.mubr.msk.bf16.mxu0 %vm13466_vm7, %v4716_v4  ;;  %vm13478_vm7 = vnez %v13397_v60 }
 0x2d9   : > { %v4718_v4 = vsel %vm13478_vm7, %v10528_v0, %v10508_v31  ;;  %vm13489_vm7 = vmmov %vm13477_vm1 }
 0x2db   : > { %7811 = vmatmul.mubr.msk.bf16.gmra.mxu1 %vm13473_vm12, %v4048_v9  ;;  %v5511_v9 = vsel %vm13480_vm11, %v10779_v33, 0  ;;  %vm13482_vm12 = vmmov %vm13477_vm1 }
 0x2dc   : > { %7850 = vmatprep.mubr.msk.bf16.mxu1 %vm13476_vm14, %v13475_v35  ;;  %v13483_v35 = vld [vmem:[#allocation4_spill] sm:$0xff]  ;;  %vm13486_vm14 = vmmov %vm13480_vm11  ;;  %vm13487_vm11 = vnez %v13336_v26 }
 0x2dd   : > { %v13488_v33 = vsel %vm13487_vm11, %v13422_v11, %v13421_v45  ;;  %v13500_v11 = vld [vmem:[#allocation11_spill] sm:$0xff] }
 0x2df   : > { %7841 = vmatmul.mubr.msk.bf16.gmra.mxu0 %vm13477_vm1, %v4717_v18  ;;  %v13484_v18 = vsel %vm13387_vm4, %v10583_v25, %v10614_v49  ;;  %vm13495_vm4 = vnez %v13347_v19 }
 0x2e0   : > { %7844 = vmatprep.mubr.msk.bf16.mxu0 %vm13479_vm5, %v4718_v4  ;;  %vm13485_vm5 = vmmov %vm13477_vm1  ;;  %v13490_v4 = vld [vmem:[#allocation9_spill] sm:$0xff] }
 0x2e1   : > { %vm13494_vm8 = vmmov %vm13485_vm5 }
 0x2e3   : > { %7851 = vmatmul.mubr.msk.bf16.vlgmr.msra.gmra.mxu1 %vm13482_vm12, %v13481_v14  ;;  %vm13491_vm12 = vmmov %vm13477_vm1 }
 0x2e4   : > { %7917 = vmatpush3.bf16.msra.mxu1 %v5511_v9  ;;  %7854 = vmatprep.mubr.msk.bf16.mxu1 %vm13477_vm1, %v13483_v35  ;;  %vm13492_vm1 = vmmov %vm13486_vm14 }
 0x2e5   : > { %8035 = vmatprep.subr.msk.bf16.mxu1 %vm13486_vm14, %v7015_v20  ;;  %v5709_v9 = vsel %vm13492_vm1, %v6998_v10, 0  ;;  %vm13497_vm14 = vnez %v13348_v32  ;;  %v13502_v10 = vld [vmem:[#allocation17_spill] sm:$0xff]  ;;  %vm13505_vm1 = vmmov %vm13485_vm5 }
 0x2e6   : > { %v13498_v45 = vsel %vm13497_vm14, %v10346_v28, %v10349_v41 }
 0x2e7   : > { %7845 = vmatmul.mubr.msk.bf16.gmra.mxu0 %vm13485_vm5, %v13484_v18  ;;  %v13496_v18 = vsel %vm13495_vm4, %v10302_v62, %v10315_v61 }
 0x2e8   : > { %7884 = vmatprep.mubr.msk.bf16.mxu0 %vm13489_vm7, %v13488_v33  ;;  %vm13499_vm7 = vmmov %vm13485_vm5  ;;  %v13504_v33 = vsel %vm8713_vm9, %v10357_v2, %v10352_v51 }
 0x2eb   : > { %7855 = vmatmul.mubr.msk.bf16.gmra.mxu1 %vm13491_vm12, %v13490_v4  ;;  %vm13501_vm12 = vmmov %vm13485_vm5 }
 0x2ec   : > { %7858 = vmatprep.mubr.msk.bf16.mxu1 %vm13494_vm8, %v13493_v53  ;;  %vm13503_vm8 = vmmov %vm13485_vm5 }
 0x2ef   : > { %7885 = vmatmul.mubr.msk.bf16.vlgmr.msra.gmra.mxu0 %vm13485_vm5, %v13496_v18  ;;  %v13506_v18 = vsel %vm12937_vm2, %v10376_v38, %v10379_v46  ;;  %vm13507_vm5 = vmmov %vm13505_vm1 }
 0x2f0   : > { %7888 = vmatprep.mubr.msk.bf16.mxu0 %vm13499_vm7, %v13498_v45  ;;  %7951 = vmatpush3.bf16.msra.mxu0 %v5709_v9  ;;  %v13508_v9 = vld [vmem:[#allocation18_spill] sm:$0xff]  ;;  %vm13509_vm7 = vmmov %vm13505_vm1  ;;  %v13510_v45 = vld [vmem:[#allocation61_spill] sm:$0xff] }
 0x2f1   : > { %vm13516_vm2 = vmmov %vm13507_vm5 }
 0x2f2   : > { %vm13523_vm6 = vmmov %vm13516_vm2 }
 0x2f3   : > { %7859 = vmatmul.mubr.msk.bf16.gmra.mxu1 %vm13501_vm12, %v13500_v11  ;;  %vm13511_vm12 = vmmov %vm13505_vm1 }
 0x2f4   : > { %7862 = vmatprep.mubr.msk.bf16.mxu1 %vm13503_vm8, %v13502_v10  ;;  %vm13513_vm8 = vmmov %vm13505_vm1 }
 0x2f7   : > { %7889 = vmatmul.mubr.msk.bf16.gmra.mxu0 %vm13505_vm1, %v13504_v33  ;;  %vm13514_vm1 = vnez %v13352_v5  ;;  %v13529_v5 = vld [vmem:[#allocation26_spill] sm:$0xff] }
 0x2f8   : > { %7892 = vmatprep.mubr.msk.bf16.mxu0 %vm13507_vm5, %v13506_v18  ;;  %v13515_v33 = vsel %vm13514_vm1, %v10416_v48, %v10419_v36  ;;  %v13517_v18 = vld [vmem:[#allocation66_spill] sm:$0xff]  ;;  %vm13518_vm5 = vmmov %vm13516_vm2 }
 0x2f9   : > { %vm13526_vm1 = vmmov %vm13516_vm2 }
 0x2fb   : > { %7863 = vmatmul.mubr.msk.bf16.gmra.mxu1 %vm13509_vm7, %v13508_v9  ;;  %vm13520_vm7 = vmmov %vm13516_vm2 }
 0x2fc   : > { %7866 = vmatprep.mubr.msk.bf16.mxu1 %vm13511_vm12, %v13510_v45  ;;  %vm13521_vm12 = vnez %v13353_v16  ;;  %v13531_v16 = vsel %vm13452_vm15, %v10462_v58, %v10465_v15 }
 0x2fd   : > { %v13522_v55 = vsel %vm13521_vm12, %v10422_v1, %v10425_v17 }
 0x2ff   : > { %7893 = vmatmul.mubr.msk.bf16.gmra.mxu0 %vm13513_vm8, %v13512_v63  ;;  %vm13524_vm8 = vnez %v13354_v23  ;;  %v13536_v23 = vld [vmem:[#allocation40_spill] sm:$0xff] }
 0x300   : > { %7896 = vmatprep.mubr.msk.bf16.mxu0 %vm13516_vm2, %v13515_v33  ;;  %v13525_v63 = vsel %vm13524_vm8, %v10456_v56, %v10459_v42  ;;  %v13527_v33 = vld [vmem:[#allocation21_spill] sm:$0xff]  ;;  %vm13528_vm2 = vmmov %vm13526_vm1 }
 0x303   : > { %7867 = vmatmul.mubr.msk.bf16.gmra.mxu1 %vm13518_vm5, %v13517_v18  ;;  %vm13530_vm5 = vmmov %vm13526_vm1 }
 0x304   : > { %7870 = vmatprep.mubr.msk.bf16.mxu1 %vm13520_vm7, %v13519_v7  ;;  %vm13532_vm7 = vmmov %vm13526_vm1 }
 0x307   : > { %7897 = vmatmul.mubr.msk.bf16.gmra.mxu0 %vm13523_vm6, %v13522_v55  ;;  %v13533_v55 = vsel %vm13413_vm0, %v10468_v21, %v10471_v34  ;;  %vm13534_vm6 = vmmov %vm13526_vm1 }
 0x308   : > { %7900 = vmatprep.mubr.msk.bf16.mxu0 %vm13526_vm1, %v13525_v63  ;;  %v13535_v63 = vld [vmem:[#allocation65_spill] sm:$0xff]  ;;  %vm13542_vm0 = vmmov %vm13526_vm1 }
 0x30b   : > { %7871 = vmatmul.mubr.msk.bf16.gmra.mxu1 %vm13528_vm2, %v13527_v33  ;;  %vm13537_vm2 = vmmov %vm13526_vm1 }
 0x30c   : > { %7874 = vmatprep.mubr.msk.bf16.mxu1 %vm13530_vm5, %v13529_v5  ;;  %vm13539_vm5 = vmmov %vm13526_vm1 }
 0x30f   : > { %7901 = vmatmul.mubr.msk.bf16.gmra.mxu0 %vm13532_vm7, %v13531_v16  ;;  %vm13540_vm7 = vnez %v13365_v37 }
 0x310   : > { %7904 = vmatprep.mubr.msk.bf16.mxu0 %vm13534_vm6, %v13533_v55  ;;  %v13541_v16 = vsel %vm13540_vm7, %v10482_v6, %v10485_v13  ;;  %v13543_v55 = vld [vmem:[#allocation62_spill] sm:$0xff]  ;;  %vm13544_vm6 = vmmov %vm13542_vm0 }
 0x313   : > { %7875 = vmatmul.mubr.msk.bf16.gmra.mxu1 %vm13526_vm1, %v13535_v63  ;;  %vm13546_vm1 = vnez %v13545_v57 }
 0x314   : > { %7878 = vmatprep.mubr.msk.bf16.mxu1 %vm13537_vm2, %v13536_v23  ;;  %v13547_v47 = vsel %vm13546_vm1, %v10315_v61, %v10302_v62  ;;  %vm13548_vm2 = vmmov %vm13542_vm0  ;;  %vm13553_vm1 = vnez %v13432_v44 }
 0x317   : > { %7905 = vmatmul.mubr.msk.bf16.gmra.mxu0 %vm13539_vm5, %v13538_v27  ;;  %v13549_v27 = vsel %vm13465_vm10, %v10520_v24, %v10524_v40  ;;  %vm13550_vm5 = vmmov %vm13542_vm0 }
 0x318   : > { %7908 = vmatprep.mubr.msk.bf16.mxu0 %vm13542_vm0, %v13541_v16  ;;  %v13551_v16 = vsel %vm13371_vm3, %v10508_v31, %v10528_v0  ;;  %vm13558_vm10 = vmmov %vm13542_vm0 }
 0x31b   : > { %7879 = vmatmul.mubr.msk.bf16.gmra.mxu1 %vm13544_vm6, %v13543_v55  ;;  %vm13552_vm6 = vcmask 1041408  }
 0x31c   : > { %7918 = vmatprep.mubr.msk.bf16.mxu1 %vm13548_vm2, %v13547_v47  ;;  %v5955_v57 = vsel %vm13552_vm6, %v7015_v20, 0  ;;  %v13554_v47 = vsel %vm13553_vm1, %v10349_v41, %v10346_v28  ;;  %vm13555_vm2 = vmmov %vm13542_vm0 }
 0x31d   : > { %vm13561_vm6 = vmmov %vm13555_vm2 }
 0x31e   : > { %vm13562_vm1 = vmmov %vm13555_vm2 }
 0x31f   : > { %7909 = vmatmul.mubr.msk.bf16.gmra.mxu0 %vm13550_vm5, %v13549_v27  ;;  %vm13556_vm5 = vnez %v13435_v54 }
 0x320   : > { %7912 = vmatprep.mubr.msk.bf16.mxu0 %vm13542_vm0, %v13551_v16  ;;  %v13557_v27 = vsel %vm13556_vm5, %v10352_v51, %v10357_v2  ;;  %vm13559_vm0 = vnez %v13388_v22 }
 0x321   : > { %v7716_v37 = vpop.f32.mrf.mxu1  ;;  %v13560_v20 = vsel %vm13559_vm0, %v10614_v49, %v10583_v25  ;;  %vm13570_vm0 = vmmov %vm13562_vm1 }
 0x323   : > { %7919 = vmatmul.mubr.msk.bf16.vlgmr.msra.gmra.mxu1 %vm13555_vm2, %v13554_v47  ;;  %v4119_v44 = vpop.f32.mrf.mxu1  ;;  %vm13563_vm2 = vnez %v13380_v29 }
 0x324   : > { %7985 = vmatpush3.bf16.msra.mxu1 %v5955_v57  ;;  %7922 = vmatprep.mubr.msk.bf16.mxu1 %vm13558_vm10, %v13557_v27  ;;  %v13564_v54 = vsel %vm13563_vm2, %v10379_v46, %v10376_v38  ;;  %vm13565_vm10 = vmmov %vm13562_vm1  ;;  %v13566_v27 = vld [vmem:[#allocation19_spill] sm:$0xff]  ;;  %vm13571_vm2 = vnez %v13447_v59 }
 0x325   : > { %v7717_v16 = vpop.f32.mrf.mxu1  ;;  %vm13567_vm5 = vnez %v13566_v27 }
 0x326   : > { %v13568_v22 = vsel %vm13567_vm5, %v10387_v50, %v10384_v52  ;;  %vm13576_vm5 = vmmov %vm13562_vm1 }
 0x327   : > { %7913 = vmatmul.mubr.msk.bf16.gmra.mxu0 %vm13561_vm6, %v13560_v20  ;;  %v4122_v57 = vpop.f32.mrf.mxu1  ;;  %vm13569_vm6 = vmmov %vm13562_vm1 }
 0x328   : > { %7952 = vmatprep.mubr.msk.bf16.mxu0 %vm13562_vm1, %v13481_v14 }
 0x329   : > { %v7720_v47 = vpop.f32.mrf.mxu1 }
 0x32b   : > { %7923 = vmatmul.mubr.msk.bf16.gmra.mxu1 %vm13565_vm10, %v13564_v54  ;;  %v4135_v14 = vpop.f32.mrf.mxu1  ;;  %vm13573_vm10 = vmmov %vm13570_vm0 }
 0x32c   : > { %7926 = vmatprep.mubr.msk.bf16.mxu1 %vm13569_vm6, %v13568_v22  ;;  %vm13577_vm6 = vmmov %vm13562_vm1 }
 0x32d   : > { %v7721_v30 = vpop.f32.mrf.mxu1 }
 0x32f   : > { %v7750_v20 = vpop.f32.mrf.mxu0  ;;  %7953 = vmatmul.mubr.msk.bf16.vlgmr.msra.gmra.mxu0 %vm13562_vm1, %v13483_v35  ;;  %v4138_v46 = vpop.f32.mrf.mxu1  ;;  %v13572_v35 = vsel %vm13571_vm2, %v10419_v36, %v10416_v48 }
 0x330   : > { %v11116_v43 = vadd.f32 %v7750_v20, %v7716_v37  ;;  %7956 = vmatprep.mubr.msk.bf16.mxu0 %vm13570_vm0, %v13490_v4  ;;  %vm13574_vm0 = vnez %v13390_v39 }
 0x331   : > { %v4331_v29 = vpop.f32.mrf.mxu0  ;;  %v7724_v22 = vpop.f32.mrf.mxu1  ;;  %v13575_v4 = vsel %vm13574_vm0, %v10425_v17, %v10422_v1  ;;  %v13578_v17 = vld [vmem:[#allocation27_spill] sm:$0xff] }
 0x332   : > { %v11120_v54 = vadd.f32 %v4331_v29, %v4119_v44  ;;  %vm13579_vm2 = vnez %v13578_v17 }
 0x333   : > { %v7751_v27 = vpop.f32.mrf.mxu0  ;;  %7927 = vmatmul.mubr.msk.bf16.gmra.mxu1 %vm13573_vm10, %v13572_v35  ;;  %vm13581_vm10 = vmmov %vm13562_vm1 }
 0x334   : > { %v11122_v38 = vadd.f32 %v7751_v27, %v7717_v16  ;;  %7930 = vmatprep.mubr.msk.bf16.mxu1 %vm13576_vm5, %v13575_v4  ;;  %v4151_v16 = vpop.f32.mrf.mxu1  ;;  %vm13585_vm5 = vmmov %vm13562_vm1 }
 0x335   : > { %v4334_v50 = vpop.f32.mrf.mxu0 }
 0x336   : > { %v11130_v37 = vadd.f32 %v4334_v50, %v4122_v57  ;;  %v7725_v50 = vpop.f32.mrf.mxu1 }
 0x337   : > { %v7754_v44 = vpop.f32.mrf.mxu0  ;;  %7957 = vmatmul.mubr.msk.bf16.gmra.mxu0 %vm13577_vm6, %v13493_v53  ;;  %v13580_v53 = vsel %vm13579_vm2, %v10459_v42, %v10456_v56  ;;  %vm13586_vm6 = vmmov %vm13562_vm1 }
 0x338   : > { %v11140_v59 = vadd.f32 %v7754_v44, %v7720_v47  ;;  %7960 = vmatprep.mubr.msk.bf16.mxu0 %vm13562_vm1, %v13500_v11  ;;  %v4154_v29 = vpop.f32.mrf.mxu1  ;;  %v13582_v11 = vld [vmem:[#allocation29_spill] sm:$0xff] }
 0x339   : > { %v4347_v20 = vpop.f32.mrf.mxu0  ;;  %vm13583_vm0 = vnez %v13582_v11 }
 0x33a   : > { %v11144_v57 = vadd.f32 %v4347_v20, %v4135_v14  ;;  %v7728_v4 = vpop.f32.mrf.mxu1  ;;  %v13584_v14 = vsel %vm13583_vm0, %v10465_v15, %v10462_v58  ;;  %v13587_v58 = vld [vmem:[#allocation32_spill] sm:$0xff] }
 0x33b   : > { %v7755_v39 = vpop.f32.mrf.mxu0  ;;  %7931 = vmatmul.mubr.msk.bf16.gmra.mxu1 %vm13581_vm10, %v13580_v53  ;;  %vm13588_vm2 = vnez %v13587_v58  ;;  %vm13590_vm10 = vmmov %vm13562_vm1 }
 0x33c   : > { %v11146_v27 = vadd.f32 %v7755_v39, %v7721_v30  ;;  %7934 = vmatprep.mubr.msk.bf16.mxu1 %vm13585_vm5, %v13584_v14  ;;  %v4167_v44 = vpop.f32.mrf.mxu1  ;;  %vm13594_vm5 = vmmov %vm13562_vm1 }
 0x33d   : > { %v4350_v35 = vpop.f32.mrf.mxu0 }
 0x33e   : > { %v11154_v47 = vadd.f32 %v4350_v35, %v4138_v46  ;;  %v7729_v46 = vpop.f32.mrf.mxu1 }
 0x33f   : > { %v7758_v30 = vpop.f32.mrf.mxu0  ;;  %7961 = vmatmul.mubr.msk.bf16.gmra.mxu0 %vm13586_vm6, %v13502_v10  ;;  %v13589_v10 = vsel %vm13588_vm2, %v10471_v34, %v10468_v21  ;;  %vm13595_vm6 = vmmov %vm13562_vm1  ;;  %vm13596_vm2 = vnez %v13467_v8 }
 0x340   : > { %v11164_v17 = vadd.f32 %v7758_v30, %v7724_v22  ;;  %7964 = vmatprep.mubr.msk.bf16.mxu0 %vm13562_vm1, %v13508_v9  ;;  %v4170_v53 = vpop.f32.mrf.mxu1  ;;  %v13591_v9 = vld [vmem:[#allocation35_spill] sm:$0xff] }
 0x341   : > { %v4363_v20 = vpop.f32.mrf.mxu0  ;;  %vm13592_vm0 = vnez %v13591_v9 }
 0x342   : > { %v11168_v39 = vadd.f32 %v4363_v20, %v4151_v16  ;;  %v7732_v14 = vpop.f32.mrf.mxu1  ;;  %v13593_v16 = vsel %vm13592_vm0, %v10479_v12, %v10476_v3 }
 0x343   : > { %v7759_v35 = vpop.f32.mrf.mxu0  ;;  %7935 = vmatmul.mubr.msk.bf16.gmra.mxu1 %vm13590_vm10, %v13589_v10  ;;  %vm13598_vm10 = vmmov %vm13562_vm1 }
 0x344   : > { %v11170_v11 = vadd.f32 %v7759_v35, %v7725_v50  ;;  %7938 = vmatprep.mubr.msk.bf16.mxu1 %vm13594_vm5, %v13593_v16  ;;  %v4183_v30 = vpop.f32.mrf.mxu1  ;;  %vm13602_vm5 = vmmov %vm13562_vm1 }
 0x345   : > { %v4366_v15 = vpop.f32.mrf.mxu0 }
 0x346   : > { %v11178_v22 = vadd.f32 %v4366_v15, %v4154_v29  ;;  %v7733_v15 = vpop.f32.mrf.mxu1 }
 0x347   : > { %v7762_v50 = vpop.f32.mrf.mxu0  ;;  %7965 = vmatmul.mubr.msk.bf16.gmra.mxu0 %vm13595_vm6, %v13510_v45  ;;  %v13597_v45 = vsel %vm13596_vm2, %v10485_v13, %v10482_v6  ;;  %vm13603_vm6 = vmmov %vm13562_vm1 }
 0x348   : > { %v11188_v58 = vadd.f32 %v7762_v50, %v7728_v4  ;;  %7968 = vmatprep.mubr.msk.bf16.mxu0 %vm13562_vm1, %v13517_v18  ;;  %v4186_v10 = vpop.f32.mrf.mxu1  ;;  %v13599_v18 = vld [vmem:[#allocation38_spill] sm:$0xff] }
 0x349   : > { %v4379_v20 = vpop.f32.mrf.mxu0  ;;  %vm13600_vm0 = vnez %v13599_v18 }
 0x34a   : > { %v11192_v29 = vadd.f32 %v4379_v20, %v4167_v44  ;;  %v13601_v44 = vsel %vm13600_vm0, %v10524_v40, %v10520_v24  ;;  %v13604_v24 = vld [vmem:[#allocation39_spill] sm:$0xff]  ;;  %vm13608_vm0 = vnez %v13397_v60 }
 0x34b   : > { %v7763_v35 = vpop.f32.mrf.mxu0  ;;  %v7736_v16 = vpop.f32.mrf.mxu1  ;;  %7939 = vmatmul.mubr.msk.bf16.gmra.mxu1 %vm13598_vm10, %v13597_v45  ;;  %vm13605_vm2 = vnez %v13604_v24  ;;  %vm13607_vm10 = vmmov %vm13562_vm1 }
 0x34c   : > { %v11194_v9 = vadd.f32 %v7763_v35, %v7729_v46  ;;  %7942 = vmatprep.mubr.msk.bf16.mxu1 %vm13602_vm5, %v13601_v44  ;;  %vm13610_vm5 = vmmov %vm13562_vm1 }
 0x34d   : > { %v4382_v12 = vpop.f32.mrf.mxu0  ;;  %v4199_v50 = vpop.f32.mrf.mxu1 }
 0x34e   : > { %v11202_v4 = vadd.f32 %v4382_v12, %v4170_v53 }
 0x34f   : > { %v7766_v46 = vpop.f32.mrf.mxu0  ;;  %7969 = vmatmul.mubr.msk.bf16.gmra.mxu0 %vm13603_vm6, %v13519_v7  ;;  %v7737_v12 = vpop.f32.mrf.mxu1  ;;  %v13606_v7 = vsel %vm13605_vm2, %v10528_v0, %v10508_v31  ;;  %vm13611_vm6 = vmmov %vm13562_vm1 }
 0x350   : > { %v11212_v8 = vadd.f32 %v7766_v46, %v7732_v14  ;;  %7972 = vmatprep.mubr.msk.bf16.mxu0 %vm13562_vm1, %v13527_v33  ;;  %v13609_v33 = vsel %vm13608_vm0, %v10583_v25, %v10614_v49  ;;  %v13612_v25 = vld [vmem:[#allocation44_spill] sm:$0xff]  ;;  %vm13619_vm0 = vmmov %vm13562_vm1 }
 0x351   : > { %v4395_v20 = vpop.f32.mrf.mxu0  ;;  %v4202_v45 = vpop.f32.mrf.mxu1  ;;  %vm13613_vm2 = vnez %v13612_v25  ;;  %v13614_v49 = vld [vmem:[#allocation76_spill] sm:$0xff] }
 0x352   : > { %v11216_v53 = vadd.f32 %v4395_v20, %v4183_v30 }
 0x353   : > { %v7767_v35 = vpop.f32.mrf.mxu0  ;;  %v7740_v44 = vpop.f32.mrf.mxu1  ;;  %7943 = vmatmul.mubr.msk.bf16.gmra.mxu1 %vm13607_vm10, %v13606_v7  ;;  %vm13617_vm10 = vmmov %vm13562_vm1 }
 0x354   : > { %v11218_v18 = vadd.f32 %v7767_v35, %v7733_v15  ;;  %7946 = vmatprep.mubr.msk.bf16.mxu1 %vm13610_vm5, %v13609_v33  ;;  %vm13620_vm5 = vmmov %vm13619_vm0 }
 0x355   : > { %v4398_v40 = vpop.f32.mrf.mxu0  ;;  %v4215_v15 = vpop.f32.mrf.mxu1 }
 0x356   : > { %v11226_v14 = vadd.f32 %v4398_v40, %v4186_v10 }
 0x357   : > { %v7770_v30 = vpop.f32.mrf.mxu0  ;;  %7973 = vmatmul.mubr.msk.bf16.gmra.mxu0 %vm13611_vm6, %v13529_v5  ;;  %v7741_v40 = vpop.f32.mrf.mxu1  ;;  %v13615_v5 = vld [vmem:[#allocation34_spill] sm:$0xff]  ;;  %vm13621_vm6 = vmmov %vm13619_vm0 }
 0x358   : > { %v11236_v24 = vadd.f32 %v7770_v30, %v7736_v16  ;;  %7976 = vmatprep.mubr.msk.bf16.mxu0 %vm13562_vm1, %v13535_v63  ;;  %v13616_v0 = vsel %vm13613_vm2, %v13614_v49, %v13615_v5  ;;  %v13618_v63 = vsel %vm13487_vm11, %v10302_v62, %v10315_v61  ;;  %vm13623_vm11 = vmmov %vm13619_vm0 }
 0x359   : > { %v4411_v46 = vpop.f32.mrf.mxu0  ;;  %v4218_v20 = vpop.f32.mrf.mxu1  ;;  %vm13625_vm1 = vmmov %vm13619_vm0 }
 0x35a   : > { %v11240_v10 = vadd.f32 %v4411_v46, %v4199_v50  ;;  %vm13626_vm2 = vmmov %vm13619_vm0 }
 0x35b   : > { %v7771_v60 = vpop.f32.mrf.mxu0  ;;  %v7744_v33 = vpop.f32.mrf.mxu1  ;;  %7947 = vmatmul.mubr.msk.bf16.gmra.mxu1 %vm13617_vm10, %v13616_v0  ;;  %vm13636_vm10 = vmmov %vm13619_vm0 }
 0x35c   : > { %v11242_v35 = vadd.f32 %v7771_v60, %v7737_v12  ;;  %7986 = vmatprep.mubr.msk.bf16.mxu1 %vm13619_vm0, %v13618_v63 }
 0x35d   : > { %v4414_v7 = vpop.f32.mrf.mxu0  ;;  %v4231_v12 = vpop.f32.mrf.mxu1 }
 0x35e   : > { %v11250_v16 = vadd.f32 %v4414_v7, %v4202_v45  ;;  %v13622_v7 = vsel %vm13495_vm4, %v10346_v28, %v10349_v41  ;;  %vm13631_vm4 = vmmov %vm13619_vm0 }
 0x35f   : > { %v7774_v50 = vpop.f32.mrf.mxu0  ;;  %7977 = vmatmul.mubr.msk.bf16.gmra.mxu0 %vm13620_vm5, %v13536_v23  ;;  %v7745_v45 = vpop.f32.mrf.mxu1 }
 0x360   : > { %v11260_v25 = vadd.f32 %v7774_v50, %v7740_v44  ;;  %7980 = vmatprep.mubr.msk.bf16.mxu0 %vm13621_vm6, %v13543_v55  ;;  %vm13644_vm6 = vmmov %vm13619_vm0 }
 0x361   : > { %v4427_v0 = vpop.f32.mrf.mxu0  ;;  %v4234_v46 = vpop.f32.mrf.mxu1 }
 0x362   : > { %v11264_v30 = vadd.f32 %v4427_v0, %v4215_v15  ;;  %v13624_v15 = vsel %vm13497_vm14, %v10357_v2, %v10352_v51 }
 0x363   : > { %v7775_v26 = vpop.f32.mrf.mxu0  ;;  %v7784_v61 = vpop.f32.mrf.mxu1  ;;  %7987 = vmatmul.mubr.msk.bf16.vlgmr.msra.gmra.mxu1 %vm13623_vm11, %v13622_v7  ;;  %vm13647_vm11 = vmmov %vm13619_vm0 }
 0x364   : > { %v11266_v60 = vadd.f32 %v7775_v26, %v7741_v40  ;;  %v4674_v55 = vadd.f32 %v7784_v61, %v11116_v43  ;;  %7990 = vmatprep.mubr.msk.bf16.mxu1 %vm13625_vm1, %v13624_v15  ;;  %v13629_v61 = vld [vmem:[#allocation77_spill] sm:$0xff]  ;;  %vm13652_vm1 = vmmov %vm13619_vm0 }
 0x365   : > { %v4430_v62 = vpop.f32.mrf.mxu0  ;;  %v4545_v19 = vpop.f32.mrf.mxu1 }
 0x366   : > { %v11274_v44 = vadd.f32 %v4430_v62, %v4218_v20  ;;  %v4672_v28 = vadd.f32 %v4545_v19, %v11120_v54 }
 0x367   : > { %v7778_v40 = vpop.f32.mrf.mxu0  ;;  %7981 = vmatmul.mubr.msk.bf16.gmra.mxu0 %vm13626_vm2, %v13536_v23  ;;  %v7785_v20 = vpop.f32.mrf.mxu1  ;;  %vm13660_vm2 = vmmov %vm13619_vm0 }
 0x368   : > { %v11285_v63 = vadd.f32 %v7778_v40, %v7744_v33  ;;  %v4675_v32 = vadd.f32 %v7785_v20, %v11122_v38  ;;  %v13628_v33 = vld [vmem:[#allocation67_spill] sm:$0xff]  ;;  %v13632_v38 = vld [vmem:[#allocation48_spill] sm:$0xff] }
 0x369   : > { %v4443_v41 = vpop.f32.mrf.mxu0  ;;  %v4548_v0 = vpop.f32.mrf.mxu1  ;;  %v13630_v7 = vsel %vm8713_vm9, %v13628_v33, %v13629_v61  ;;  %vm13633_vm14 = vnez %v13632_v38  ;;  %v13637_v61 = vld [vmem:[#allocation49_spill] sm:$0xff] }
 0x36a   : > { %v11288_v50 = vadd.f32 %v4443_v41, %v4231_v12  ;;  %v4673_v2 = vadd.f32 %v4548_v0, %v11130_v37  ;;  %vm13638_vm9 = vnez %v13637_v61 }
 0x36b   : > { %v7779_v43 = vpop.f32.mrf.mxu0  ;;  %v7788_v62 = vpop.f32.mrf.mxu1  ;;  %7991 = vmatmul.mubr.msk.bf16.gmra.mxu1 %vm13631_vm4, %v13630_v7  ;;  %vm13668_vm4 = vmmov %vm13619_vm0 }
 0x36c   : > { %v11291_v51 = vadd.f32 %v7779_v43, %v7745_v45  ;;  %v4678_v12 = vadd.f32 %v7788_v62, %v11140_v59  ;;  %v13634_v45 = vld [vmem:[#allocation69_spill] sm:$0xff] }
 0x36d   : > { %v4446_v26 = vpop.f32.mrf.mxu0  ;;  %v13635_v15 = vsel %vm13633_vm14, %v10384_v52, %v13634_v45  ;;  %v4561_v40 = vpop.f32.mrf.mxu1  ;;  %vm13678_vm14 = vmmov %vm13619_vm0 }
 0x36e   : > { %v11300_v54 = vadd.f32 %v4446_v26, %v4234_v46  ;;  %7994 = vmatprep.mubr.msk.bf16.mxu1 %vm13636_vm10, %v13635_v15  ;;  %v4676_v41 = vadd.f32 %v4561_v40, %v11144_v57  ;;  %vm13682_vm10 = vmmov %vm13619_vm0 }
 0x36f   : > { %v7818_v37 = vpop.f32.mrf.mxu0  ;;  %v7789_v43 = vpop.f32.mrf.mxu1 }
 0x370   : > { %v11309_v19 = vadd.f32 %v7818_v37, %v4674_v55  ;;  %v4679_v46 = vadd.f32 %v7789_v43, %v11146_v27  ;;  %v13639_v55 = vsel %vm13638_vm9, %v10416_v48, %v10419_v36  ;;  %v13640_v27 = vld [vmem:[#allocation50_spill] sm:$0xff]  ;;  %vm13710_vm9 = vmmov %vm13619_vm0 }
 0x371   : > { %v4823_v20 = vpop.f32.mrf.mxu0  ;;  %v4564_v26 = vpop.f32.mrf.mxu1  ;;  %vm13641_vm5 = vnez %v13640_v27 }
 0x372   : > { %v11312_v0 = vadd.f32 %v4823_v20, %v4672_v28  ;;  %v4677_v52 = vadd.f32 %v4564_v26, %v11154_v47 }
 0x373   : > { %v7819_v59 = vpop.f32.mrf.mxu0  ;;  %v7792_v33 = vpop.f32.mrf.mxu1  ;;  %7995 = vmatmul.mubr.msk.bf16.gmra.mxu1 %vm13619_vm0, %v13639_v55 }
 0x374   : > { %v11315_v62 = vadd.f32 %v7819_v59, %v4675_v32  ;;  %v4682_v28 = vadd.f32 %v7792_v33, %v11164_v17  ;;  %v13642_v32 = vld [vmem:[#allocation82_spill] sm:$0xff] }
 0x375   : > { %v4826_v23 = vpop.f32.mrf.mxu0  ;;  %v13643_v7 = vsel %vm13641_vm5, %v10422_v1, %v13642_v32  ;;  %v4577_v38 = vpop.f32.mrf.mxu1  ;;  %vm13711_vm5 = vmmov %vm13619_vm0 }
 0x376   : > { %v11324_v57 = vadd.f32 %v4826_v23, %v4673_v2  ;;  %7998 = vmatprep.mubr.msk.bf16.mxu1 %vm13644_vm6, %v13643_v7  ;;  %v4680_v15 = vadd.f32 %v4577_v38, %v11168_v39  ;;  %v13649_v23 = vld [vmem:[#allocation85_spill] sm:$0xff]  ;;  %vm13712_vm6 = vmmov %vm13619_vm0 }
 0x377   : > { %v7822_v47 = vpop.f32.mrf.mxu0  ;;  %v7793_v48 = vpop.f32.mrf.mxu1 }
 0x378   : > { %v11333_v45 = vadd.f32 %v7822_v47, %v4678_v12  ;;  %v4683_v2 = vadd.f32 %v7793_v48, %v11170_v11  ;;  %v13646_v12 = vsel %vm13521_vm12, %v10456_v56, %v10459_v42  ;;  %vm13655_vm12 = vmmov %vm13619_vm0 }
 0x379   : > { %v4839_v36 = vpop.f32.mrf.mxu0  ;;  %v4580_v40 = vpop.f32.mrf.mxu1 }
 0x37a   : > { %v11336_v37 = vadd.f32 %v4839_v36, %v4676_v41  ;;  %v4681_v1 = vadd.f32 %v4580_v40, %v11178_v22 }
 0x37b   : > { %v7823_v17 = vpop.f32.mrf.mxu0  ;;  %v7796_v59 = vpop.f32.mrf.mxu1  ;;  %7999 = vmatmul.mubr.msk.bf16.gmra.mxu1 %vm13647_vm11, %v13646_v12  ;;  %vm13713_vm11 = vmmov %vm13619_vm0 }
 0x37c   : > { %v11339_v20 = vadd.f32 %v7823_v17, %v4679_v46  ;;  %v4686_v41 = vadd.f32 %v7796_v59, %v11188_v58  ;;  %v13650_v46 = vld [vmem:[#allocation30_spill] sm:$0xff] }
 0x37d   : > { %v4842_v43 = vpop.f32.mrf.mxu0  ;;  %v13651_v33 = vsel %vm13524_vm8, %v13649_v23, %v13650_v46  ;;  %v4593_v61 = vpop.f32.mrf.mxu1 }
 0x37e   : > { %v11348_v39 = vadd.f32 %v4842_v43, %v4677_v52  ;;  %8002 = vmatprep.mubr.msk.bf16.mxu1 %vm13652_vm1, %v13651_v33  ;;  %v4684_v27 = vadd.f32 %v4593_v61, %v11192_v29  ;;  %vm13714_vm1 = vmmov %vm13619_vm0 }
 0x37f   : > { %v7826_v22 = vpop.f32.mrf.mxu0  ;;  %v7797_v42 = vpop.f32.mrf.mxu1 }
 0x380   : > { %v11357_v55 = vadd.f32 %v7826_v22, %v4682_v28  ;;  %v4687_v52 = vadd.f32 %v7797_v42, %v11194_v9  ;;  %v13654_v28 = vsel %vm13452_vm15, %v10468_v21, %v10471_v34  ;;  %v13656_v9 = vld [vmem:[#allocation54_spill] sm:$0xff]  ;;  %vm13663_vm15 = vmmov %vm13619_vm0 }
 0x381   : > { %v4855_v56 = vpop.f32.mrf.mxu0  ;;  %v4596_v7 = vpop.f32.mrf.mxu1  ;;  %vm13657_vm8 = vnez %v13656_v9 }
 0x382   : > { %v11360_v32 = vadd.f32 %v4855_v56, %v4680_v15  ;;  %v4685_v38 = vadd.f32 %v4596_v7, %v11202_v4  ;;  %v13666_v56 = vld [vmem:[#allocation14_spill] sm:$0xff] }
 0x383   : > { %v7827_v58 = vpop.f32.mrf.mxu0  ;;  %v7800_v48 = vpop.f32.mrf.mxu1  ;;  %8003 = vmatmul.mubr.msk.bf16.gmra.mxu1 %vm13655_vm12, %v13654_v28  ;;  %vm13715_vm12 = vmmov %vm13619_vm0 }
 0x384   : > { %v11363_v47 = vadd.f32 %v7827_v58, %v4683_v2  ;;  %v4690_v15 = vadd.f32 %v7800_v48, %v11212_v8  ;;  %v13658_v2 = vld [vmem:[#allocation5_spill] sm:$0xff] }
 0x385   : > { %v4858_v36 = vpop.f32.mrf.mxu0  ;;  %v13659_v40 = vsel %vm13657_vm8, %v10476_v3, %v13658_v2  ;;  %v4609_v43 = vpop.f32.mrf.mxu1  ;;  %vm13716_vm8 = vmmov %vm13619_vm0 }
 0x386   : > { %v11372_v29 = vadd.f32 %v4858_v36, %v4681_v1  ;;  %8006 = vmatprep.mubr.msk.bf16.mxu1 %vm13660_vm2, %v13659_v40  ;;  %v4688_v26 = vadd.f32 %v4609_v43, %v11216_v53  ;;  %v13669_v40 = vld [vmem:[#allocation57_spill] sm:$0xff]  ;;  %vm13717_vm2 = vmmov %vm13619_vm0 }
 0x387   : > { %v7830_v4 = vpop.f32.mrf.mxu0  ;;  %v7801_v34 = vpop.f32.mrf.mxu1 }
 0x388   : > { %v11381_v59 = vadd.f32 %v7830_v4, %v4686_v41  ;;  %v4691_v1 = vadd.f32 %v7801_v34, %v11218_v18  ;;  %v13662_v41 = vsel %vm13414_vm13, %v10482_v6, %v10485_v13  ;;  %vm13670_vm13 = vnez %v13669_v40 }
 0x389   : > { %v4871_v21 = vpop.f32.mrf.mxu0  ;;  %v4612_v11 = vpop.f32.mrf.mxu1 }
 0x38a   : > { %v11384_v12 = vadd.f32 %v4871_v21, %v4684_v27  ;;  %v4689_v3 = vadd.f32 %v4612_v11, %v11226_v14  ;;  %v13665_v27 = vld [vmem:[#allocation72_spill] sm:$0xff]  ;;  %v13676_v21 = vld [vmem:[#allocation71_spill] sm:$0xff] }
 0x38b   : > { %v7831_v8 = vpop.f32.mrf.mxu0  ;;  %v7804_v33 = vpop.f32.mrf.mxu1  ;;  %8007 = vmatmul.mubr.msk.bf16.gmra.mxu1 %vm13663_vm15, %v13662_v41  ;;  %v13667_v42 = vsel %vm13540_vm7, %v13665_v27, %v13666_v56  ;;  %vm13673_vm7 = vmmov %vm13619_vm0 }
 0x38c   : > { %v11387_v23 = vadd.f32 %v7831_v8, %v4687_v52  ;;  %v4694_v61 = vadd.f32 %v7804_v33, %v11236_v24  ;;  %8010 = vmatprep.mubr.msk.bf16.mxu1 %vm13668_vm4, %v13667_v42  ;;  %v13679_v42 = vld [vmem:[#allocation59_spill] sm:$0xff]  ;;  %vm13718_vm15 = vmmov %vm13619_vm0 }
 0x38d   : > { %v4874_v46 = vpop.f32.mrf.mxu0  ;;  %v4625_v52 = vpop.f32.mrf.mxu1  ;;  %vm13719_vm4 = vmmov %vm13619_vm0 }
 0x38e   : > { %v11396_v53 = vadd.f32 %v4874_v46, %v4685_v38  ;;  %v4692_v7 = vadd.f32 %v4625_v52, %v11240_v10 }
 0x38f   : > { %v7834_v14 = vpop.f32.mrf.mxu0  ;;  %v7805_v13 = vpop.f32.mrf.mxu1 }
 0x390   : > { %v11405_v58 = vadd.f32 %v7834_v14, %v4690_v15  ;;  %v4695_v38 = vadd.f32 %v7805_v13, %v11242_v35  ;;  %v13671_v15 = vld [vmem:[#allocation74_spill] sm:$0xff] }
 0x391   : > { %v4887_v6 = vpop.f32.mrf.mxu0  ;;  %v4628_v48 = vpop.f32.mrf.mxu1  ;;  %v13672_v4 = vsel %vm13670_vm13, %v10508_v31, %v13671_v15  ;;  %vm13720_vm13 = vmmov %vm13619_vm0 }
 0x392   : > { %v11408_v36 = vadd.f32 %v4887_v6, %v4688_v26  ;;  %v4693_v28 = vadd.f32 %v4628_v48, %v11250_v16  ;;  %v13675_v26 = vld [vmem:[#allocation73_spill] sm:$0xff] }
 0x393   : > { %v7835_v24 = vpop.f32.mrf.mxu0  ;;  %v7808_v2 = vpop.f32.mrf.mxu1  ;;  %8011 = vmatmul.mubr.msk.bf16.gmra.mxu1 %vm13673_vm7, %v13672_v4  ;;  %v13677_v34 = vsel %vm13371_vm3, %v13675_v26, %v13676_v21  ;;  %vm13680_vm3 = vnez %v13679_v42  ;;  %vm13721_vm7 = vmmov %vm13619_vm0 }
 0x394   : > { %v11411_v17 = vadd.f32 %v7835_v24, %v4691_v1  ;;  %v4698_v43 = vadd.f32 %v7808_v2, %v11260_v25  ;;  %8014 = vmatprep.mubr.msk.bf16.mxu1 %vm13678_vm14, %v13677_v34  ;;  %vm13722_vm14 = vmmov %vm13619_vm0 }
 0x395   : > { %v4890_v9 = vpop.f32.mrf.mxu0  ;;  %v4641_v1 = vpop.f32.mrf.mxu1 }
 0x396   : > { %v11420_v10 = vadd.f32 %v4890_v9, %v4689_v3  ;;  %v4696_v11 = vadd.f32 %v4641_v1, %v11264_v30 }
 0x397   : > { %v7838_v16 = vpop.f32.mrf.mxu0  ;;  %v7809_v46 = vpop.f32.mrf.mxu1 }
 0x398   : > { %v11429_v8 = vadd.f32 %v7838_v16, %v4694_v61  ;;  %v4699_v3 = vadd.f32 %v7809_v46, %v11266_v60  ;;  %v13681_v61 = vsel %vm13680_vm3, %v13615_v5, %v13614_v49  ;;  %vm13723_vm3 = vmmov %vm13619_vm0 }
 0x399   : > { %v4903_v31 = vpop.f32.mrf.mxu0  ;;  %v4644_v22 = vpop.f32.mrf.mxu1 }
 0x39a   : > { %v11432_v33 = vadd.f32 %v4903_v31, %v4692_v7  ;;  %v4697_v18 = vadd.f32 %v4644_v22, %v11274_v44 }
 0x39b   : > { %v7839_v25 = vpop.f32.mrf.mxu0  ;;  %v7812_v56 = vpop.f32.mrf.mxu1  ;;  %8015 = vmatmul.mubr.msk.bf16.gmra.mxu1 %vm13682_vm10, %v13681_v61  ;;  %vm13724_vm10 = vmmov %vm13619_vm0 }
 0x39c   : > { %v11435_v41 = vadd.f32 %v7839_v25, %v4695_v38  ;;  %v4702_v14 = vadd.f32 %v7812_v56, %v11285_v63 }
 0x39d   : > { %v4906_v27 = vpop.f32.mrf.mxu0  ;;  %v4657_v52 = vpop.f32.mrf.mxu1 }
 0x39e   : > { %v11444_v30 = vadd.f32 %v4906_v27, %v4693_v28  ;;  %v4700_v6 = vadd.f32 %v4657_v52, %v11288_v50 }
 0x39f   : > { %v7842_v60 = vpop.f32.mrf.mxu0  ;;  %v7813_v13 = vpop.f32.mrf.mxu1 }
 0x3a0   : > { %v11447_v7 = vadd.f32 %v7842_v60, %v4698_v43  ;;  %v4703_v24 = vadd.f32 %v7813_v13, %v11291_v51 }
 0x3a1   : > { %v4919_v44 = vpop.f32.mrf.mxu0  ;;  %v4660_v49 = vpop.f32.mrf.mxu1 }
 0x3a2   : > { %v11450_v38 = vadd.f32 %v4919_v44, %v4696_v11  ;;  %v4701_v28 = vadd.f32 %v4660_v49, %v11300_v54 }
 0x3a3   : > { %v7843_v48 = vpop.f32.mrf.mxu0  ;;  %v7852_v63 = vpop.f32.mrf.mxu1 }
 0x3a4   : > { %v11453_v5 = vadd.f32 %v7843_v48, %v4699_v3  ;;  %v5152_v40 = vadd.f32 %v7852_v63, %v11309_v19 }
 0x3a5   : > { %v4922_v9 = vpop.f32.mrf.mxu0  ;;  %v5023_v50 = vpop.f32.mrf.mxu1 }
 0x3a6   : > { %v11456_v2 = vadd.f32 %v4922_v9, %v4697_v18  ;;  %v5150_v43 = vadd.f32 %v5023_v50, %v11312_v0 }
 0x3a7   : > { %v7846_v15 = vpop.f32.mrf.mxu0  ;;  %v7853_v51 = vpop.f32.mrf.mxu1 }
 0x3a8   : > { %v11459_v4 = vadd.f32 %v7846_v15, %v4702_v14  ;;  %v5153_v21 = vadd.f32 %v7853_v51, %v11315_v62 }
 0x3a9   : > { %v4935_v35 = vpop.f32.mrf.mxu0  ;;  %v5026_v54 = vpop.f32.mrf.mxu1 }
 0x3aa   : > { %v11462_v26 = vadd.f32 %v4935_v35, %v4700_v6  ;;  %v11468_v1 = vadd.f32 %v5026_v54, %v11324_v57 }
 0x3ab   : > { %v7847_v34 = vpop.f32.mrf.mxu0  ;;  %v7856_v11 = vpop.f32.mrf.mxu1 }
 0x3ac   : > { %v11465_v16 = vadd.f32 %v7847_v34, %v4703_v24  ;;  %v5156_v46 = vadd.f32 %v7856_v11, %v11333_v45 }
 0x3ad   : > { %v4938_v19 = vpop.f32.mrf.mxu0  ;;  %v5039_v3 = vpop.f32.mrf.mxu1 }
 0x3ae   : > { %v11470_v31 = vadd.f32 %v4938_v19, %v4701_v28  ;;  %v11476_v22 = vadd.f32 %v5039_v3, %v11336_v37 }
 0x3af   : > { %v7886_v0 = vpop.f32.mrf.mxu0  ;;  %v7857_v18 = vpop.f32.mrf.mxu1 }
 0x3b0   : > { %v11473_v25 = vadd.f32 %v7886_v0, %v5152_v40  ;;  %v5157_v57 = vadd.f32 %v7857_v18, %v11339_v20 }
 0x3b1   : > { %v5269_v62 = vpop.f32.mrf.mxu0  ;;  %v5042_v42 = vpop.f32.mrf.mxu1 }
 0x3b2   : > { %v11478_v27 = vadd.f32 %v5269_v62, %v5150_v43  ;;  %v11484_v14 = vadd.f32 %v5042_v42, %v11348_v39 }
 0x3b3   : > { %v7887_v56 = vpop.f32.mrf.mxu0  ;;  %v7860_v60 = vpop.f32.mrf.mxu1 }
 0x3b4   : > { %v11481_v61 = vadd.f32 %v7887_v56, %v5153_v21  ;;  %v5160_v52 = vadd.f32 %v7860_v60, %v11357_v55 }
 0x3b5   : > { %v11486_v45 = vpop.f32.mrf.mxu0  ;;  %v5055_v6 = vpop.f32.mrf.mxu1 }
 0x3b6   : > { %v11492_v13 = vadd.f32 %v5055_v6, %v11360_v32 }
 0x3b7   : > { %v7890_v37 = vpop.f32.mrf.mxu0  ;;  %v7861_v24 = vpop.f32.mrf.mxu1 }
 0x3b8   : > { %v11489_v44 = vadd.f32 %v7890_v37, %v5156_v46  ;;  %v5161_v48 = vadd.f32 %v7861_v24, %v11363_v47 }
 0x3b9   : > { %v11494_v20 = vpop.f32.mrf.mxu0  ;;  %v5058_v39 = vpop.f32.mrf.mxu1 }
 0x3ba   : > { %v11500_v9 = vadd.f32 %v5058_v39, %v11372_v29 }
 0x3bb   : > { %v7891_v49 = vpop.f32.mrf.mxu0  ;;  %v7864_v63 = vpop.f32.mrf.mxu1 }
 0x3bc   : > { %v11497_v28 = vadd.f32 %v7891_v49, %v5157_v57  ;;  %v5164_v40 = vadd.f32 %v7864_v63, %v11381_v59 }
 0x3bd   : > { %v11502_v55 = vpop.f32.mrf.mxu0  ;;  %v5071_v32 = vpop.f32.mrf.mxu1 }
 0x3be   : > { %v11508_v43 = vadd.f32 %v5071_v32, %v11384_v12 }
 0x3bf   : > { %v7894_v15 = vpop.f32.mrf.mxu0  ;;  %v7865_v35 = vpop.f32.mrf.mxu1 }
 0x3c0   : > { %v11505_v50 = vadd.f32 %v7894_v15, %v5160_v52  ;;  %v5165_v51 = vadd.f32 %v7865_v35, %v11387_v23 }
 0x3c1   : > { %v11510_v47 = vpop.f32.mrf.mxu0  ;;  %v5074_v29 = vpop.f32.mrf.mxu1 }
 0x3c2   : > { %v11516_v54 = vadd.f32 %v5074_v29, %v11396_v53 }
 0x3c3   : > { %v7895_v21 = vpop.f32.mrf.mxu0  ;;  %v7868_v19 = vpop.f32.mrf.mxu1 }
 0x3c4   : > { %v11513_v34 = vadd.f32 %v7895_v21, %v5161_v48  ;;  %v5168_v11 = vadd.f32 %v7868_v19, %v11405_v58 }
 0x3c5   : > { %v11518_v59 = vpop.f32.mrf.mxu0  ;;  %v5087_v12 = vpop.f32.mrf.mxu1 }
 0x3c6   : > { %v11524_v3 = vadd.f32 %v5087_v12, %v11408_v36 }
 0x3c7   : > { %v7898_v46 = vpop.f32.mrf.mxu0  ;;  %v7869_v62 = vpop.f32.mrf.mxu1 }
 0x3c8   : > { %v11521_v0 = vadd.f32 %v7898_v46, %v5164_v40  ;;  %v5169_v18 = vadd.f32 %v7869_v62, %v11411_v17 }
 0x3c9   : > { %v11526_v23 = vpop.f32.mrf.mxu0  ;;  %v5090_v53 = vpop.f32.mrf.mxu1 }
 0x3ca   : > { %v11532_v42 = vadd.f32 %v5090_v53, %v11420_v10 }
 0x3cb   : > { %v7899_v57 = vpop.f32.mrf.mxu0  ;;  %v7872_v60 = vpop.f32.mrf.mxu1 }
 0x3cc   : > { %v11529_v56 = vadd.f32 %v7899_v57, %v5165_v51  ;;  %v5172_v52 = vadd.f32 %v7872_v60, %v11429_v8 }
 0x3cd   : > { %v11534_v58 = vpop.f32.mrf.mxu0  ;;  %v5103_v36 = vpop.f32.mrf.mxu1 }
 0x3ce   : > { %v11540_v24 = vadd.f32 %v5103_v36, %v11432_v33 }
 0x3cf   : > { %v7902_v37 = vpop.f32.mrf.mxu0  ;;  %v7873_v48 = vpop.f32.mrf.mxu1 }
 0x3d0   : > { %v11537_v6 = vadd.f32 %v7902_v37, %v5168_v11  ;;  %13683 = vst [vmem:[#allocation15_spill] sm:$0xff] %v11540_v24  ;;  %v5173_v49 = vadd.f32 %v7873_v48, %v11435_v41 }
 0x3d1   : > { %v11542_v17 = vpop.f32.mrf.mxu0  ;;  %v5106_v10 = vpop.f32.mrf.mxu1 }
 0x3d2   : > { %v11548_v40 = vadd.f32 %v5106_v10, %v11444_v30 }
 0x3d3   : > { %v7903_v39 = vpop.f32.mrf.mxu0  ;;  %v7876_v15 = vpop.f32.mrf.mxu1 }
 0x3d4   : > { %v11545_v63 = vadd.f32 %v7903_v39, %v5169_v18  ;;  %13684 = vst [vmem:[#allocation20_spill] sm:$0xff] %v11548_v40  ;;  %v5176_v32 = vadd.f32 %v7876_v15, %v11447_v7 }
 0x3d5   : > { %v11550_v8 = vpop.f32.mrf.mxu0  ;;  %v5119_v33 = vpop.f32.mrf.mxu1 }
 0x3d6   : > { %v11556_v21 = vadd.f32 %v5119_v33, %v11450_v38 }
 0x3d7   : > { %v7906_v35 = vpop.f32.mrf.mxu0  ;;  %v7877_v29 = vpop.f32.mrf.mxu1 }
 0x3d8   : > { %v11553_v51 = vadd.f32 %v7906_v35, %v5172_v52  ;;  %13685 = vst [vmem:[#allocation79_spill] sm:$0xff] %v11556_v21  ;;  %v5177_v19 = vadd.f32 %v7877_v29, %v11453_v5 }
 0x3d9   : > { %v11558_v41 = vpop.f32.mrf.mxu0  ;;  %v5122_v30 = vpop.f32.mrf.mxu1 }
 0x3da   : > { %13686 = vst [vmem:[#allocation75_spill] sm:$0xff] %v11558_v41  ;;  %v11564_v12 = vadd.f32 %v5122_v30, %v11456_v2 }
 0x3db   : > { %v7907_v11 = vpop.f32.mrf.mxu0  ;;  %v7880_v62 = vpop.f32.mrf.mxu1 }
 0x3dc   : > { %v11561_v46 = vadd.f32 %v7907_v11, %v5173_v49  ;;  %13687 = vst [vmem:[#allocation78_spill] sm:$0xff] %v11564_v12  ;;  %v5180_v18 = vadd.f32 %v7880_v62, %v11459_v4 }
 0x3dd   : > { %v11566_v7 = vpop.f32.mrf.mxu0  ;;  %v5135_v38 = vpop.f32.mrf.mxu1 }
 0x3de   : > { %13688 = vst [vmem:[#allocation6_spill] sm:$0xff] %v11566_v7  ;;  %v11572_v60 = vadd.f32 %v5135_v38, %v11462_v26 }
 0x3df   : > { %v7910_v57 = vpop.f32.mrf.mxu0  ;;  %v7881_v52 = vpop.f32.mrf.mxu1 }
 0x3e0   : > { %v11569_v53 = vadd.f32 %v7910_v57, %v5176_v32  ;;  %13689 = vst [vmem:[#allocation81_spill] sm:$0xff] %v11572_v60  ;;  %v5181_v37 = vadd.f32 %v7881_v52, %v11465_v16 }
 0x3e1   : > { %v11574_v5 = vpop.f32.mrf.mxu0  ;;  %v5138_v2 = vpop.f32.mrf.mxu1 }
 0x3e2   : > { %13690 = vst [vmem:[#allocation25_spill] sm:$0xff] %v11574_v5  ;;  %v11580_v49 = vadd.f32 %v5138_v2, %v11470_v31 }
 0x3e3   : > { %v7911_v36 = vpop.f32.mrf.mxu0  ;;  %v7920_v39 = vpop.f32.mrf.mxu1 }
 0x3e4   : > { %v11577_v48 = vadd.f32 %v7911_v36, %v5177_v19  ;;  %13691 = vst [vmem:[#allocation36_spill] sm:$0xff] %v11580_v49  ;;  %v11585_v10 = vadd.f32 %v7920_v39, %v11473_v25 }
 0x3e5   : > { %v11582_v4 = vpop.f32.mrf.mxu0  ;;  %v5547_v15 = vpop.f32.mrf.mxu1 }
 0x3e6   : > { %13692 = vst [vmem:[#allocation84_spill] sm:$0xff] %v11582_v4  ;;  %v11588_v35 = vadd.f32 %v5547_v15, %v11478_v27 }
 0x3e7   : > { %v7914_v26 = vpop.f32.mrf.mxu0  ;;  %v7921_v33 = vpop.f32.mrf.mxu1 }
 0x3e8   : > { %v5426_v32 = vadd.f32 %v7914_v26, %v5180_v18  ;;  %v11593_v29 = vadd.f32 %v7921_v33, %v11481_v61 }
 0x3e9   : > { %v11590_v16 = vpop.f32.mrf.mxu0  ;;  %v11595_v19 = vpop.f32.mrf.mxu1 }
 0x3ea   : > { %13693 = vst [vmem:[#allocation80_spill] sm:$0xff] %v11590_v16 }
 0x3eb   : > { %v7915_v31 = vpop.f32.mrf.mxu0  ;;  %v7924_v25 = vpop.f32.mrf.mxu1 }
 0x3ec   : > { %v5427_v11 = vadd.f32 %v7915_v31, %v5181_v37  ;;  %v11600_v62 = vadd.f32 %v7924_v25, %v11489_v44 }
 0x3ed   : > { %v11597_v30 = vpop.f32.mrf.mxu0  ;;  %v11604_v27 = vpop.f32.mrf.mxu1 }
 0x3ee   : > { %13694 = vst [vmem:[#allocation83_spill] sm:$0xff] %v11597_v30 }
 0x3ef   : > { %v11602_v18 = vpop.f32.mrf.mxu0  ;;  %v7925_v38 = vpop.f32.mrf.mxu1 }
 0x3f0   : > { %v11607_v52 = vadd.f32 %v7925_v38, %v11497_v28 }
 0x3f1   : > { %v5745_v57 = vpop.f32.mrf.mxu0  ;;  %v11609_v36 = vpop.f32.mrf.mxu1 }
 0x3f3   : > { %v7955_v61 = vpop.f32.mrf.mxu0  ;;  %v7928_v37 = vpop.f32.mrf.mxu1 }
 0x3f4   : > { %v11612_v39 = vadd.f32 %v7928_v37, %v11505_v50 }
 0x3f5   : > { %v5748_v2 = vpop.f32.mrf.mxu0  ;;  %v11616_v44 = vpop.f32.mrf.mxu1 }
 0x3f7   : > { %v11614_v26 = vpop.f32.mrf.mxu0  ;;  %v7929_v33 = vpop.f32.mrf.mxu1 }
 0x3f8   : > { %v11621_v31 = vadd.f32 %v7929_v33, %v11513_v34 }
 0x3f9   : > { %v11618_v15 = vpop.f32.mrf.mxu0  ;;  %v11625_v25 = vpop.f32.mrf.mxu1 }
 0x3fb   : > { %v11623_v28 = vpop.f32.mrf.mxu0  ;;  %v7932_v38 = vpop.f32.mrf.mxu1 }
 0x3fc   : > { %v11630_v50 = vadd.f32 %v7932_v38, %v11521_v0 }
 0x3fd   : > { %v11627_v30 = vpop.f32.mrf.mxu0  ;;  %v11632_v37 = vpop.f32.mrf.mxu1 }
 0x3ff   : > { %v7933_v49 = vpop.f32.mrf.mxu1  ;;  %v11634_v16 = vpop.f32.mrf.mxu0 }
 0x400   : > { %v11637_v60 = vadd.f32 %v7933_v49, %v11529_v56 }
 0x401   : > { %v11639_v34 = vpop.f32.mrf.mxu1  ;;  %v11641_v4 = vpop.f32.mrf.mxu0 }
 0x403   : > { %v7936_v33 = vpop.f32.mrf.mxu1  ;;  %v11648_v38 = vpop.f32.mrf.mxu0 }
 0x404   : > { %v11644_v12 = vadd.f32 %v7936_v33, %v11537_v6 }
 0x405   : > { %v11646_v5 = vpop.f32.mrf.mxu1  ;;  %v11655_v49 = vpop.f32.mrf.mxu0 }
 0x406   : > { %13695 = vst [vmem:[#allocation31_spill] sm:$0xff] %v11644_v12  ;;  %13696 = vst [vmem:[#allocation87_spill] sm:$0xff] %v11646_v5 }
 0x407   : > { %v7937_v0 = vpop.f32.mrf.mxu1  ;;  %v11662_v33 = vpop.f32.mrf.mxu0 }
 0x408   : > { %v11651_v21 = vadd.f32 %v7937_v0, %v11545_v63 }
 0x409   : > { %v11653_v7 = vpop.f32.mrf.mxu1  ;;  %v11669_v0 = vpop.f32.mrf.mxu0 }
 0x40a   : > { %13697 = vst [vmem:[#allocation42_spill] sm:$0xff] %v11651_v21  ;;  %13698 = vst [vmem:[#allocation86_spill] sm:$0xff] %v11653_v7 }
 0x40b   : > { %v7940_v56 = vpop.f32.mrf.mxu1 }
 0x40c   : > { %v11658_v40 = vadd.f32 %v7940_v56, %v11553_v51  ;;  %v11676_v56 = vpop.f32.mrf.mxu0 }
 0x40d   : > { %v11660_v41 = vpop.f32.mrf.mxu1 }
 0x40e   : > { %13699 = vst [vmem:[#allocation7_spill] sm:$0xff] %v11658_v40  ;;  %13700 = vst [vmem:[#allocation43_spill] sm:$0xff] %v11660_v41 }
 0x40f   : > { %v7941_v6 = vpop.f32.mrf.mxu1 }
 0x410   : > { %v11665_v12 = vadd.f32 %v7941_v6, %v11561_v46  ;;  %v11683_v6 = vpop.f32.mrf.mxu0 }
 0x411   : > { %v11667_v24 = vpop.f32.mrf.mxu1 }
 0x412   : > { %13701 = vst [vmem:[#allocation45_spill] sm:$0xff] %v11665_v12  ;;  %13702 = vst [vmem:[#allocation46_spill] sm:$0xff] %v11667_v24 }
 0x413   : > { %v7944_v63 = vpop.f32.mrf.mxu1 }
 0x414   : > { %v11672_v21 = vadd.f32 %v7944_v63, %v11569_v53  ;;  %v11689_v53 = vpop.f32.mrf.mxu0 }
 0x415   : > { %v11674_v7 = vpop.f32.mrf.mxu1 }
 0x416   : > { %13703 = vst [vmem:[#allocation16_spill] sm:$0xff] %v11672_v21  ;;  %13704 = vst [vmem:[#allocation24_spill] sm:$0xff] %v11674_v7 }
 0x417   : > { %v7945_v51 = vpop.f32.mrf.mxu1 }
 0x418   : > { %v11679_v40 = vadd.f32 %v7945_v51, %v11577_v48  ;;  %v5397_v48 = vadd.f32 %v11486_v45, %v11468_v1  ;;  %v5872_v51 = vadd.f32 %v5745_v57, %v11588_v35 }
 0x419   : > { %v11681_v41 = vpop.f32.mrf.mxu1 }
 0x41a   : > { %13705 = vst [vmem:[#allocation41_spill] sm:$0xff] %v11679_v40  ;;  %13706 = vst [vmem:[#allocation64_spill] sm:$0xff] %v11681_v41  ;;  %v11698_v40 = vpop.f32.mrf.mxu0 }
 0x41b   : > { %v7948_v46 = vpop.f32.mrf.mxu1 }
 0x41c   : > { %v11685_v12 = vadd.f32 %v7948_v46, %v5426_v32  ;;  %v5675_v32 = vadd.f32 %v11595_v19, %v5397_v48  ;;  %v5874_v46 = vadd.f32 %v11602_v18, %v11585_v10  ;;  %v11708_v1 = vpop.f32.mrf.mxu0 }
 0x41d   : > { %v11687_v24 = vpop.f32.mrf.mxu1 }
 0x41e   : > { %13707 = vst [vmem:[#allocation60_spill] sm:$0xff] %v11685_v12  ;;  %v11724_v18 = vpop.f32.mrf.mxu0 }
 0x41f   : > { %v7949_v5 = vpop.f32.mrf.mxu1 }
 0x420   : > { %v11691_v63 = vadd.f32 %v7949_v5, %v5427_v11  ;;  %v5400_v5 = vadd.f32 %v11494_v20, %v11476_v22  ;;  %v5401_v22 = vadd.f32 %v11502_v55, %v11484_v14  ;;  %v5404_v20 = vadd.f32 %v11510_v47, %v11492_v13 }
 0x421   : > { %v11693_v21 = vpop.f32.mrf.mxu1  ;;  %v5878_v13 = vadd.f32 %v11614_v26, %v11600_v62 }
 0x422   : > { %13708 = vst [vmem:[#allocation28_spill] sm:$0xff] %v11691_v63  ;;  %13709 = vst [vmem:[#allocation63_spill] sm:$0xff] %v11693_v21  ;;  %v5875_v63 = vadd.f32 %v7955_v61, %v11593_v29  ;;  %v5873_v21 = vadd.f32 %v5748_v2, %v5675_v32  ;;  %v5678_v35 = vadd.f32 %v11604_v27, %v5400_v5 }
 0x423   : > { %v7988_v7 = vpop.f32.mrf.mxu1  ;;  %v5679_v55 = vadd.f32 %v11609_v36, %v5401_v22  ;;  %v5879_v36 = vadd.f32 %v11623_v28, %v11607_v52  ;;  %v5405_v52 = vadd.f32 %v11518_v59, %v11500_v9 }
 0x424   : > { %v11710_v45 = vadd.f32 %v7988_v7, %v5874_v46  ;;  %v5876_v29 = vadd.f32 %v11618_v15, %v5678_v35 }
 0x425   : > { %v5991_v41 = vpop.f32.mrf.mxu1  ;;  %v5877_v46 = vadd.f32 %v11627_v30, %v5679_v55  ;;  %v5682_v30 = vadd.f32 %v11616_v44, %v5404_v20  ;;  %v5408_v55 = vadd.f32 %v11526_v23, %v11508_v43  ;;  %v5683_v43 = vadd.f32 %v11625_v25, %v5405_v52 }
 0x426   : > { %v11703_v12 = vadd.f32 %v5991_v41, %v5872_v51  ;;  %v6222_v27 = vmul.f32 %v11710_v45, %v11710_v45  ;;  %v6153_v47 = vsel %vm13711_vm5, %v11710_v45, 0.0  ;;  %v5882_v23 = vadd.f32 %v11634_v16, %v11612_v39  ;;  %vm13726_vm5 = vmmov %vm13619_vm0 }
 0x427   : > { %v7989_v11 = vpop.f32.mrf.mxu1  ;;  %v5881_v25 = vadd.f32 %v11655_v49, %v5683_v43 }
 0x428   : > { %v6220_v19 = vmul.f32 %v11703_v12, %v11703_v12  ;;  %v11715_v10 = vadd.f32 %v7989_v11, %v5875_v63  ;;  %v6150_v61 = vsel %vm13710_vm9, %v11703_v12, 0.0  ;;  %v11748_v11 = vpop.f32.mrf.mxu0  ;;  %v6255_v35 = vsel %vm13714_vm1, %v6222_v27, 0.0  ;;  %vm13725_vm9 = vmmov %vm13619_vm0 }
 0x429   : > { %v5994_v57 = vpop.f32.mrf.mxu1  ;;  %vm13729_vm1 = vmmov %vm13619_vm0 }
 0x42a   : > { %v11717_v41 = vadd.f32 %v5994_v57, %v5873_v21  ;;  %v6252_v63 = vsel %vm13712_vm6, %v6220_v19, 0.0  ;;  %v6223_v48 = vmul.f32 %v11715_v10, %v11715_v10  ;;  %v6155_v57 = vsel %vm13715_vm12, %v11715_v10, 0.0  ;;  %v11770_v20 = vpop.f32.mrf.mxu0  ;;  %vm13727_vm6 = vmmov %vm13619_vm0 }
 0x42b   : > { %v7992_v7 = vpop.f32.mrf.mxu1  ;;  %vm13730_vm12 = vmmov %vm13619_vm0 }
 0x42c   : > { %v6151_v21 = vsel %vm13619_vm0, %v11717_v41, 0.0  ;;  %v6221_v14 = vmul.f32 %v11717_v41, %v11717_v41  ;;  %v11753_v19 = vadd.f32 %v7992_v7, %v5878_v13  ;;  %v5880_v13 = vadd.f32 %v11641_v4, %v5682_v30 }
 0x42d   : > { %v6152_v2 = vadd.f32 %v6151_v21, %v6150_v61  ;;  %v6007_v15 = vpop.f32.mrf.mxu1  ;;  %v6257_v21 = vsel %vm13716_vm8, %v6223_v48, 0.0  ;;  %vm13732_vm8 = vmmov %vm13619_vm0 }
 0x42e   : > { %v6253_v51 = vsel %vm13713_vm11, %v6221_v14, 0.0  ;;  %v11743_v32 = vadd.f32 %v6007_v15, %v5876_v29  ;;  %vm13728_vm11 = vmmov %vm13619_vm0 }
 0x42f   : > { %v6154_v62 = vadd.f32 %v6153_v47, %v6152_v2  ;;  %v6254_v26 = vadd.f32 %v6253_v51, %v6252_v63  ;;  %v7993_v5 = vpop.f32.mrf.mxu1  ;;  %v6226_v47 = vmul.f32 %v11753_v19, %v11753_v19 }
 0x430   : > { %v6224_v22 = vmul.f32 %v11743_v32, %v11743_v32  ;;  %v6157_v27 = vsel %vm13717_vm2, %v11743_v32, 0.0  ;;  %v11763_v14 = vadd.f32 %v7993_v5, %v5879_v36  ;;  %v6161_v36 = vsel %vm13720_vm13, %v11753_v19, 0.0  ;;  %vm13733_vm2 = vmmov %vm13619_vm0 }
 0x431   : > { %v6256_v28 = vadd.f32 %v6255_v35, %v6254_v26  ;;  %v6156_v29 = vadd.f32 %v6155_v57, %v6154_v62  ;;  %v6010_v61 = vpop.f32.mrf.mxu1  ;;  %v5883_v5 = vadd.f32 %v11648_v38, %v11621_v31  ;;  %v11792_v57 = vpop.f32.mrf.mxu0  ;;  %v5409_v31 = vadd.f32 %v11534_v58, %v11516_v54  ;;  %vm13740_vm13 = vmmov %vm13619_vm0 }
 0x432   : > { %v11765_v7 = vadd.f32 %v6010_v61, %v5877_v46  ;;  %v6259_v2 = vsel %vm13718_vm15, %v6224_v22, 0.0  ;;  %v6227_v46 = vmul.f32 %v11763_v14, %v11763_v14  ;;  %v6263_v22 = vsel %vm13722_vm14, %v6226_v47, 0.0  ;;  %vm13736_vm15 = vmmov %vm13619_vm0 }
 0x433   : > { %v6158_v9 = vadd.f32 %v6157_v27, %v6156_v29  ;;  %v6258_v59 = vadd.f32 %v6257_v21, %v6256_v28  ;;  %v7996_v44 = vpop.f32.mrf.mxu1  ;;  %v6163_v52 = vsel %vm13723_vm3, %v11763_v14, 0.0  ;;  %v5686_v38 = vadd.f32 %v11632_v37, %v5408_v55  ;;  %v11814_v55 = vpop.f32.mrf.mxu0  ;;  %vm13743_vm14 = vmmov %vm13619_vm0 }
 0x434   : > { %v6159_v15 = vsel %vm13719_vm4, %v11765_v7, 0.0  ;;  %v6225_v63 = vmul.f32 %v11765_v7, %v11765_v7  ;;  %v11797_v30 = vadd.f32 %v7996_v44, %v5882_v23  ;;  %v6265_v21 = vsel %vm13724_vm10, %v6227_v46, 0.0  ;;  %vm13737_vm4 = vmmov %vm13619_vm0 }
 0x435   : > { %v6260_v4 = vadd.f32 %v6259_v2, %v6258_v59  ;;  %v6160_v48 = vadd.f32 %v6159_v15, %v6158_v9  ;;  %v6023_v51 = vpop.f32.mrf.mxu1  ;;  %v5412_v59 = vadd.f32 %v11542_v17, %v11524_v3  ;;  %v5884_v44 = vadd.f32 %v11669_v0, %v5686_v38  ;;  %vm13744_vm3 = vmmov %vm13619_vm0 }
 0x436   : > { %v6261_v62 = vsel %vm13721_vm7, %v6225_v63, 0.0  ;;  %v11787_v26 = vadd.f32 %v6023_v51, %v5880_v13  ;;  %v6230_v47 = vmul.f32 %v11797_v30, %v11797_v30  ;;  %v5687_v3 = vadd.f32 %v11639_v34, %v5409_v31  ;;  %vm13741_vm7 = vmmov %vm13619_vm0 }
 0x437   : > { %v6162_v35 = vadd.f32 %v6161_v36, %v6160_v48  ;;  %v6262_v16 = vadd.f32 %v6261_v62, %v6260_v4  ;;  %v7997_v39 = vpop.f32.mrf.mxu1  ;;  %v5886_v17 = vadd.f32 %v11662_v33, %v11630_v50  ;;  %v6169_v4 = vsel %vm13727_vm6, %v11797_v30, 0.0  ;;  %vm13748_vm10 = vmmov %vm13619_vm0 }
 0x438   : > { %v6228_v28 = vmul.f32 %v11787_v26, %v11787_v26  ;;  %v6165_v27 = vsel %vm13725_vm9, %v11787_v26, 0.0  ;;  %v11807_v13 = vadd.f32 %v7997_v39, %v5883_v5  ;;  %v5887_v46 = vadd.f32 %v11676_v56, %v11637_v60  ;;  %v11836_v5 = vpop.f32.mrf.mxu0  ;;  %v13731_v56 = vld [vmem:[#allocation87_spill] sm:$0xff]  ;;  %vm13749_vm9 = vmmov %vm13619_vm0 }
 0x439   : > { %v6264_v49 = vadd.f32 %v6263_v22, %v6262_v16  ;;  %v6164_v29 = vadd.f32 %v6163_v52, %v6162_v35  ;;  %v6026_v61 = vpop.f32.mrf.mxu1  ;;  %v5885_v34 = vadd.f32 %v11683_v6, %v5687_v3  ;;  %v5413_v60 = vadd.f32 %v11550_v8, %v11532_v42  ;;  %v13739_v3 = vld [vmem:[#allocation31_spill] sm:$0xff]  ;;  %vm13755_vm6 = vmmov %vm13619_vm0 }
 0x43a   : > { %v11809_v9 = vadd.f32 %v6026_v61, %v5881_v25  ;;  %v6267_v2 = vsel %vm13619_vm0, %v6228_v28, 0.0  ;;  %v6231_v48 = vmul.f32 %v11807_v13, %v11807_v13  ;;  %v6271_v25 = vsel %vm13729_vm1, %v6230_v47, 0.0  ;;  %v13734_v61 = vld [vmem:[#allocation15_spill] sm:$0xff]  ;;  %vm13758_vm1 = vmmov %vm13619_vm0 }
 0x43b   : > { %v6166_v54 = vadd.f32 %v6165_v27, %v6164_v29  ;;  %v6266_v58 = vadd.f32 %v6265_v21, %v6264_v49  ;;  %v8000_v37 = vpop.f32.mrf.mxu1  ;;  %v6171_v35 = vsel %vm13730_vm12, %v11807_v13, 0.0  ;;  %v5690_v6 = vadd.f32 %v13731_v56, %v5412_v59  ;;  %v13735_v21 = vld [vmem:[#allocation75_spill] sm:$0xff]  ;;  %vm13759_vm12 = vmmov %vm13619_vm0 }
 0x43c   : > { %v6167_v15 = vsel %vm13726_vm5, %v11809_v9, 0.0  ;;  %v6229_v63 = vmul.f32 %v11809_v9, %v11809_v9  ;;  %v11841_v16 = vadd.f32 %v8000_v37, %v5886_v17  ;;  %v6273_v31 = vsel %vm13732_vm8, %v6231_v48, 0.0  ;;  %vm13752_vm5 = vmmov %vm13619_vm0 }
 0x43d   : > { %v6268_v0 = vadd.f32 %v6267_v2, %v6266_v58  ;;  %v6168_v43 = vadd.f32 %v6167_v15, %v6166_v54  ;;  %v6039_v23 = vpop.f32.mrf.mxu1  ;;  %v5416_v27 = vadd.f32 %v13735_v21, %v13734_v61  ;;  %v11858_v54 = vpop.f32.mrf.mxu0  ;;  %v13738_v15 = vld [vmem:[#allocation86_spill] sm:$0xff]  ;;  %vm13763_vm8 = vmmov %vm13619_vm0 }
 0x43e   : > { %v6269_v51 = vsel %vm13728_vm11, %v6229_v63, 0.0  ;;  %v11831_v36 = vadd.f32 %v6039_v23, %v5884_v44  ;;  %v5888_v44 = vadd.f32 %v11698_v40, %v5690_v6  ;;  %v6234_v58 = vmul.f32 %v11841_v16, %v11841_v16  ;;  %v13745_v6 = vld [vmem:[#allocation20_spill] sm:$0xff]  ;;  %vm13756_vm11 = vmmov %vm13619_vm0 }
 0x43f   : > { %v6170_v62 = vadd.f32 %v6169_v4, %v6168_v43  ;;  %v6270_v50 = vadd.f32 %v6269_v51, %v6268_v0  ;;  %v8001_v33 = vpop.f32.mrf.mxu1  ;;  %v5691_v63 = vadd.f32 %v13738_v15, %v5413_v60  ;;  %v5890_v40 = vadd.f32 %v11689_v53, %v13739_v3 }
 0x440   : > { %v6232_v39 = vmul.f32 %v11831_v36, %v11831_v36  ;;  %v6173_v38 = vsel %vm13733_vm2, %v11831_v36, 0.0  ;;  %v11851_v49 = vadd.f32 %v8001_v33, %v5887_v46  ;;  %v6177_v23 = vsel %vm13740_vm13, %v11841_v16, 0.0  ;;  %v13742_v46 = vld [vmem:[#allocation42_spill] sm:$0xff]  ;;  %vm13764_vm2 = vmmov %vm13619_vm0 }
 0x441   : > { %v6272_v22 = vadd.f32 %v6271_v25, %v6270_v50  ;;  %v6172_v52 = vadd.f32 %v6171_v35, %v6170_v62  ;;  %v6042_v28 = vpop.f32.mrf.mxu1  ;;  %v5889_v62 = vadd.f32 %v11724_v18, %v5691_v63  ;;  %v11880_v25 = vpop.f32.mrf.mxu0  ;;  %v6279_v35 = vsel %vm13743_vm14, %v6234_v58, 0.0  ;;  %vm13771_vm13 = vmmov %vm13619_vm0 }
 0x442   : > { %v11853_v29 = vadd.f32 %v6042_v28, %v5885_v34  ;;  %v6275_v37 = vsel %vm13736_vm15, %v6232_v39, 0.0  ;;  %v6235_v4 = vmul.f32 %v11851_v49, %v11851_v49  ;;  %v5891_v34 = vadd.f32 %v11708_v1, %v13742_v46  ;;  %vm13767_vm15 = vmmov %vm13619_vm0 }
 0x443   : > { %v6174_v42 = vadd.f32 %v6173_v38, %v6172_v52  ;;  %v6274_v8 = vadd.f32 %v6273_v31, %v6272_v22  ;;  %v8004_v59 = vpop.f32.mrf.mxu1  ;;  %v6179_v39 = vsel %vm13744_vm3, %v11851_v49, 0.0  ;;  %v13746_v22 = vld [vmem:[#allocation6_spill] sm:$0xff]  ;;  %v13747_v52 = vld [vmem:[#allocation43_spill] sm:$0xff]  ;;  %v5844_v15 = vpop.f32.mrf.mxu0  ;;  %vm13774_vm14 = vmmov %vm13619_vm0 }
 0x444   : > { %v6175_v47 = vsel %vm13737_vm4, %v11853_v29, 0.0  ;;  %v6233_v2 = vmul.f32 %v11853_v29, %v11853_v29  ;;  %v11885_v60 = vadd.f32 %v8004_v59, %v5890_v40  ;;  %v5417_v1 = vadd.f32 %v13746_v22, %v13745_v6  ;;  %v13751_v59 = vld [vmem:[#allocation25_spill] sm:$0xff]  ;;  %vm13768_vm4 = vmmov %vm13619_vm0 }
 0x445   : > { %v6276_v17 = vadd.f32 %v6275_v37, %v6274_v8  ;;  %v6176_v0 = vadd.f32 %v6175_v47, %v6174_v42  ;;  %v6055_v43 = vpop.f32.mrf.mxu1  ;;  %v5694_v18 = vadd.f32 %v13747_v52, %v5416_v27  ;;  %v6281_v61 = vsel %vm13748_vm10, %v6235_v4, 0.0  ;;  %v13750_v8 = vld [vmem:[#allocation79_spill] sm:$0xff]  ;;  %v7982_v22 = vpop.f32.mrf.mxu0  ;;  %vm13775_vm3 = vmmov %vm13619_vm0 }
 0x446   : > { %v6277_v48 = vsel %vm13741_vm7, %v6233_v2, 0.0  ;;  %v11875_v51 = vadd.f32 %v6055_v43, %v5888_v44  ;;  %v5420_v58 = vadd.f32 %v13751_v59, %v13750_v8  ;;  %v6238_v63 = vmul.f32 %v11885_v60, %v11885_v60  ;;  %vm13772_vm7 = vmmov %vm13619_vm0 }
 0x447   : > { %v6178_v50 = vadd.f32 %v6177_v23, %v6176_v0  ;;  %v6278_v53 = vadd.f32 %v6277_v48, %v6276_v17  ;;  %v8005_v33 = vpop.f32.mrf.mxu1  ;;  %v5892_v37 = vadd.f32 %v11770_v20, %v5694_v18  ;;  %v13753_v0 = vld [vmem:[#allocation46_spill] sm:$0xff]  ;;  %v13754_v23 = vld [vmem:[#allocation7_spill] sm:$0xff]  ;;  %vm13776_vm10 = vmmov %vm13619_vm0 }
 0x448   : > { %v6236_v56 = vmul.f32 %v11875_v51, %v11875_v51  ;;  %v6181_v21 = vsel %vm13749_vm9, %v11875_v51, 0.0  ;;  %v11895_v44 = vadd.f32 %v8005_v33, %v5891_v34  ;;  %v5695_v43 = vadd.f32 %v13753_v0, %v5417_v1  ;;  %v13757_v33 = vld [vmem:[#allocation45_spill] sm:$0xff]  ;;  %vm13777_vm9 = vmmov %vm13619_vm0 }
 0x449   : > { %v6280_v28 = vadd.f32 %v6279_v35, %v6278_v53  ;;  %v6180_v31 = vadd.f32 %v6179_v39, %v6178_v50  ;;  %v6058_v38 = vpop.f32.mrf.mxu1  ;;  %v5894_v20 = vadd.f32 %v11748_v11, %v13754_v23  ;;  %v6185_v34 = vsel %vm13755_vm6, %v11885_v60, 0.0  ;;  %v5857_v23 = vpop.f32.mrf.mxu0  ;;  %vm13783_vm6 = vmmov %vm13619_vm0 }
 0x44a   : > { %v11897_v42 = vadd.f32 %v6058_v38, %v5889_v62  ;;  %v6283_v3 = vsel %vm13619_vm0, %v6236_v56, 0.0  ;;  %v6239_v62 = vmul.f32 %v11895_v44, %v11895_v44  ;;  %v5895_v35 = vadd.f32 %v11792_v57, %v13757_v33  ;;  %v13761_v38 = vld [vmem:[#allocation84_spill] sm:$0xff] }
 0x44b   : > { %v6182_v47 = vadd.f32 %v6181_v21, %v6180_v31  ;;  %v6282_v2 = vadd.f32 %v6281_v61, %v6280_v28  ;;  %v8008_v27 = vpop.f32.mrf.mxu1  ;;  %v5893_v39 = vadd.f32 %v11814_v55, %v5695_v43  ;;  %v6287_v1 = vsel %vm13758_vm1, %v6238_v63, 0.0  ;;  %v13760_v31 = vld [vmem:[#allocation78_spill] sm:$0xff]  ;;  %v13762_v57 = vld [vmem:[#allocation24_spill] sm:$0xff]  ;;  %v13765_v63 = vld [vmem:[#allocation81_spill] sm:$0xff] }
 0x44c   : > { %v6183_v40 = vsel %vm13752_vm5, %v11897_v42, 0.0  ;;  %v6237_v17 = vmul.f32 %v11897_v42, %v11897_v42  ;;  %v6187_v52 = vsel %vm13759_vm12, %v11895_v44, 0.0  ;;  %v11925_v18 = vadd.f32 %v8008_v27, %v5894_v20  ;;  %vm13780_vm5 = vmmov %vm13619_vm0 }
 0x44d   : > { %v6284_v4 = vadd.f32 %v6283_v3, %v6282_v2  ;;  %v6184_v48 = vadd.f32 %v6183_v40, %v6182_v47  ;;  %v6071_v46 = vpop.f32.mrf.mxu1  ;;  %v5421_v61 = vadd.f32 %v13761_v38, %v13760_v31  ;;  %v5698_v21 = vadd.f32 %v13762_v57, %v5420_v58  ;;  %v13766_v3 = vld [vmem:[#allocation80_spill] sm:$0xff]  ;;  %v7983_v57 = vpop.f32.mrf.mxu0  ;;  %vm13786_vm1 = vmmov %vm13619_vm0 }
 0x44e   : > { %v6285_v50 = vsel %vm13756_vm11, %v6237_v17, 0.0  ;;  %v11917_v53 = vadd.f32 %v6071_v46, %v5892_v37  ;;  %v6289_v37 = vsel %vm13763_vm8, %v6239_v62, 0.0  ;;  %v5424_v40 = vadd.f32 %v13766_v3, %v13765_v63  ;;  %vm13784_vm11 = vmmov %vm13619_vm0 }
 0x44f   : > { %v6186_v56 = vadd.f32 %v6185_v34, %v6184_v48  ;;  %v6286_v11 = vadd.f32 %v6285_v50, %v6284_v4  ;;  %v8009_v6 = vpop.f32.mrf.mxu1  ;;  %v5896_v17 = vadd.f32 %v11858_v54, %v5698_v21  ;;  %v6242_v20 = vmul.f32 %v11925_v18, %v11925_v18  ;;  %v13769_v34 = vld [vmem:[#allocation64_spill] sm:$0xff]  ;;  %vm13787_vm12 = vmmov %vm13619_vm0 }
 0x450   : > { %v6240_v28 = vmul.f32 %v11917_v53, %v11917_v53  ;;  %v6189_v47 = vsel %vm13764_vm2, %v11917_v53, 0.0  ;;  %v11935_v2 = vadd.f32 %v8009_v6, %v5895_v35  ;;  %v5699_v62 = vadd.f32 %v13769_v34, %v5421_v61  ;;  %v13770_v50 = vld [vmem:[#allocation16_spill] sm:$0xff]  ;;  %vm13788_vm8 = vmmov %vm13619_vm0 }
 0x451   : > { %v6288_v55 = vadd.f32 %v6287_v1, %v6286_v11  ;;  %v6188_v8 = vadd.f32 %v6187_v52, %v6186_v56  ;;  %v6074_v59 = vpop.f32.mrf.mxu1  ;;  %v5898_v54 = vadd.f32 %v11836_v5, %v13770_v50  ;;  %v6193_v56 = vsel %vm13771_vm13, %v11925_v18, 0.0  ;;  %v13773_v52 = vld [vmem:[#allocation41_spill] sm:$0xff]  ;;  %vm13789_vm2 = vmmov %vm13619_vm0 }
 0x452   : > { %v11937_v27 = vadd.f32 %v6074_v59, %v5893_v39  ;;  %v6291_v4 = vsel %vm13767_vm15, %v6240_v28, 0.0  ;;  %v6243_v11 = vmul.f32 %v11935_v2, %v11935_v2  ;;  %v5899_v28 = vadd.f32 %v11880_v25, %v13773_v52  ;;  %vm13790_vm15 = vmmov %vm13619_vm0 }
 0x453   : > { %v6190_v0 = vadd.f32 %v6189_v47, %v6188_v8  ;;  %v6290_v43 = vadd.f32 %v6289_v37, %v6288_v55  ;;  %v8012_v58 = vpop.f32.mrf.mxu1  ;;  %v5897_v31 = vadd.f32 %v5844_v15, %v5699_v62  ;;  %v6295_v21 = vsel %vm13774_vm14, %v6242_v20, 0.0  ;;  %vm13792_vm13 = vmmov %vm13619_vm0 }
 0x454   : > { %v6191_v48 = vsel %vm13768_vm4, %v11937_v27, 0.0  ;;  %v6241_v46 = vmul.f32 %v11937_v27, %v11937_v27  ;;  %v6195_v55 = vsel %vm13775_vm3, %v11935_v2, 0.0  ;;  %v11964_v8 = vadd.f32 %v8012_v58, %v5898_v54  ;;  %v13779_v58 = vld [vmem:[#allocation83_spill] sm:$0xff]  ;;  %vm13791_vm4 = vmmov %vm13619_vm0 }
 0x455   : > { %v6292_v33 = vadd.f32 %v6291_v4, %v6290_v43  ;;  %v6192_v35 = vadd.f32 %v6191_v48, %v6190_v0  ;;  %v6087_v39 = vpop.f32.mrf.mxu1  ;;  %v5702_v37 = vadd.f32 %v11687_v24, %v5424_v40  ;;  %v6297_v15 = vsel %vm13776_vm10, %v6243_v11, 0.0  ;;  %v13778_v43 = vld [vmem:[#allocation36_spill] sm:$0xff]  ;;  %v5860_v24 = vpop.f32.mrf.mxu0  ;;  %vm13794_vm14 = vmmov %vm13619_vm0 }
 0x456   : > { %v6293_v6 = vsel %vm13772_vm7, %v6241_v46, 0.0  ;;  %v11957_v1 = vadd.f32 %v6087_v39, %v5896_v17  ;;  %v5425_v20 = vadd.f32 %v13779_v58, %v13778_v43  ;;  %v6246_v40 = vmul.f32 %v11964_v8, %v11964_v8  ;;  %v13782_v39 = vld [vmem:[#allocation60_spill] sm:$0xff]  ;;  %vm13793_vm7 = vmmov %vm13619_vm0 }
 0x457   : > { %v6194_v38 = vadd.f32 %v6193_v56, %v6192_v35  ;;  %v6294_v61 = vadd.f32 %v6293_v6, %v6292_v33  ;;  %v8013_v5 = vpop.f32.mrf.mxu1  ;;  %v5900_v4 = vadd.f32 %v5857_v23, %v5702_v37  ;;  %v13781_v33 = vld [vmem:[#allocation63_spill] sm:$0xff]  ;;  %v5902_v56 = vadd.f32 %v7982_v22, %v13782_v39  ;;  %vm13795_vm3 = vmmov %vm13619_vm0 }
 0x458   : > { %v6244_v59 = vmul.f32 %v11957_v1, %v11957_v1  ;;  %v6197_v3 = vsel %vm13777_vm9, %v11957_v1, 0.0  ;;  %v11972_v17 = vadd.f32 %v8013_v5, %v5899_v28  ;;  %v5703_v35 = vadd.f32 %v13781_v33, %v5425_v20  ;;  %vm13796_vm10 = vmmov %vm13619_vm0 }
 0x459   : > { %v6296_v47 = vadd.f32 %v6295_v21, %v6294_v61  ;;  %v6196_v63 = vadd.f32 %v6195_v55, %v6194_v38  ;;  %v6090_v25 = vpop.f32.mrf.mxu1  ;;  %v6201_v52 = vsel %vm13783_vm6, %v11964_v8, 0.0  ;;  %v13785_v61 = vld [vmem:[#allocation28_spill] sm:$0xff]  ;;  %v6303_v22 = vsel %vm13786_vm1, %v6246_v40, 0.0 }
 0x45a   : > { %v11974_v0 = vadd.f32 %v6090_v25, %v5897_v31  ;;  %v6299_v62 = vsel %vm13619_vm0, %v6244_v59, 0.0  ;;  %v6247_v28 = vmul.f32 %v11972_v17, %v11972_v17  ;;  %v5903_v5 = vadd.f32 %v7983_v57, %v13785_v61 }
 0x45b   : > { %v6198_v48 = vadd.f32 %v6197_v3, %v6196_v63  ;;  %v6298_v46 = vadd.f32 %v6297_v15, %v6296_v47  ;;  %v8016_v34 = vpop.f32.mrf.mxu1  ;;  %v5901_v21 = vadd.f32 %v5860_v24, %v5703_v35  ;;  %v6203_v47 = vsel %vm13787_vm12, %v11972_v17, 0.0 }
 0x45c   : > { %v6199_v50 = vsel %vm13780_vm5, %v11974_v0, 0.0  ;;  %v6245_v54 = vmul.f32 %v11974_v0, %v11974_v0  ;;  %v11998_v63 = vadd.f32 %v8016_v34, %v5902_v56  ;;  %v6305_v58 = vsel %vm13788_vm8, %v6247_v28, 0.0 }
 0x45d   : > { %v6300_v23 = vadd.f32 %v6299_v62, %v6298_v46  ;;  %v6200_v11 = vadd.f32 %v6199_v50, %v6198_v48  ;;  %v6103_v6 = vpop.f32.mrf.mxu1  ;;  %vm6583_vm9 = vcmask 27648  }
 0x45e   : > { %v6301_v31 = vsel %vm13784_vm11, %v6245_v54, 0.0  ;;  %v11992_v38 = vadd.f32 %v6103_v6, %v5900_v4  ;;  %v6250_v34 = vmul.f32 %v11998_v63, %v11998_v63  ;;  %v6209_v33 = vsel %vm13792_vm13, %v11998_v63, 0.0 }
 0x45f   : > { %v6202_v55 = vadd.f32 %v6201_v52, %v6200_v11  ;;  %v6302_v59 = vadd.f32 %v6301_v31, %v6300_v23  ;;  %v8017_v37 = vpop.f32.mrf.mxu1 }
 0x460   : > { %v6248_v25 = vmul.f32 %v11992_v38, %v11992_v38  ;;  %v6205_v57 = vsel %vm13789_vm2, %v11992_v38, 0.0  ;;  %v12005_v20 = vadd.f32 %v8017_v37, %v5903_v5  ;;  %v6311_v11 = vsel %vm13794_vm14, %v6250_v34, 0.0 }
 0x461   : > { %v6304_v15 = vadd.f32 %v6303_v22, %v6302_v59  ;;  %v6204_v3 = vadd.f32 %v6203_v47, %v6202_v55  ;;  %v6106_v43 = vpop.f32.mrf.mxu1 }
 0x462   : > { %v12007_v4 = vadd.f32 %v6106_v43, %v5901_v21  ;;  %v6307_v24 = vsel %vm13790_vm15, %v6248_v25, 0.0  ;;  %v6251_v35 = vmul.f32 %v12005_v20, %v12005_v20  ;;  %v6211_v6 = vsel %vm13795_vm3, %v12005_v20, 0.0 }
 0x463   : > { %v6206_v48 = vadd.f32 %v6205_v57, %v6204_v3  ;;  %v6306_v46 = vadd.f32 %v6305_v58, %v6304_v15 }
 0x464   : > { %v6207_v40 = vsel %vm13791_vm4, %v12007_v4, 0.0  ;;  %v6249_v62 = vmul.f32 %v12007_v4, %v12007_v4  ;;  %v6313_v31 = vsel %vm13796_vm10, %v6251_v35, 0.0 }
 0x465   : > { %v6308_v50 = vadd.f32 %v6307_v24, %v6306_v46  ;;  %v6208_v54 = vadd.f32 %v6207_v40, %v6206_v48 }
 0x466   : > { %v6309_v39 = vsel %vm13793_vm7, %v6249_v62, 0.0 }
 0x467   : > { %v6210_v56 = vadd.f32 %v6209_v33, %v6208_v54  ;;  %v6310_v23 = vadd.f32 %v6309_v39, %v6308_v50 }
 0x469   : > { %v6212_v52 = vadd.f32 %v6211_v6, %v6210_v56  ;;  %v6312_v28 = vadd.f32 %v6311_v11, %v6310_v23  ;;  %v12141_v6 = vld [vmem:[%s8168_s25 + $0x68] sm:$0xff]   ;;  %v12146_v23 = vld [vmem:[%s8168_s25 + $0x78] sm:$0xff]  }
 0x46a   : > { %13798 = vst [vmem:[#allocation68_spill] sm:$0xff] %v12146_v23 }
 0x46b   : > { %v6213_v61 = vrot.slane %v6212_v52, 4  ;;  %v6314_v5 = vadd.f32 %v6313_v31, %v6312_v28  ;;  %v12131_v31 = vld [vmem:[%s8168_s25 + $0x58] sm:$0xff]  }
 0x46d   : > { %v6214_v21 = vadd.f32 %v6213_v61, %v6212_v52  ;;  %v6315_v55 = vrot.slane %v6314_v5, 4  ;;  %v12126_v61 = vld [vmem:[%s8168_s25 + $0x50] sm:$0xff]  }
 0x46f   : > { %v6215_v59 = vrot.slane %v6214_v21, 2  ;;  %v6316_v37 = vadd.f32 %v6315_v55, %v6314_v5  ;;  %v12111_v55 = vld [vmem:[%s8168_s25 + $0x38] sm:$0xff]   ;;  %v12121_v5 = vld [vmem:[%s8168_s25 + $0x48] sm:$0xff]  }
 0x471   : > { %v6216_v22 = vadd.f32 %v6215_v59, %v6214_v21  ;;  %v6317_v47 = vrot.slane %v6316_v37, 2  ;;  %v12106_v59 = vld [vmem:[%s8168_s25 + $0x30] sm:$0xff]   ;;  %v12116_v21 = vld [vmem:[%s8168_s25 + $0x40] sm:$0xff]  }
 0x473   : > { %v6217_v25 = vrot.slane %v6216_v22, 1  ;;  %v6318_v15 = vadd.f32 %v6317_v47, %v6316_v37 }
 0x475   : > { %v6218_v3 = vadd.f32 %v6217_v25, %v6216_v22  ;;  %v6319_v43 = vrot.slane %v6318_v15, 1  ;;  %v12072_v25 = vld [vmem:[%s8168_s25 + $0x8] sm:$0xff]  }
 0x477   : > { %v12025_v58 = vmul.f32 0.00390625, %v6218_v3  ;;  %v6320_v57 = vadd.f32 %v6319_v43, %v6318_v15  ;;  %v12077_v43 = vld [vmem:[%s8168_s25] sm:$0xff]   ;;  %v12091_v3 = vld [vmem:[%s8168_s25 + $0x18] sm:$0xff]  }
 0x478   : > { %v12136_v15 = vld [vmem:[%s8168_s25 + $0x60] sm:$0xff]  }
 0x479   : > { %v6321_v48 = vmul.f32 0.00390625, %v6320_v57  ;;  %v6322_v46 = vmul.f32 %v12025_v58, %v12025_v58  ;;  %v6368_v24 = vsub.f32 %v11809_v9, %v12025_v58  ;;  %v6359_v56 = vsub.f32 %v11703_v12, %v12025_v58 }
 0x47a   : > { %v6360_v47 = vsub.f32 %v11717_v41, %v12025_v58  ;;  %v6361_v52 = vsub.f32 %v11710_v45, %v12025_v58  ;;  %v6362_v22 = vsub.f32 %v11715_v10, %v12025_v58  ;;  %v6363_v57 = vsub.f32 %v11743_v32, %v12025_v58 }
 0x47b   : > { %v6323_v34 = vsub.f32 %v6321_v48, %v6322_v46  ;;  %v12082_v46 = vld [vmem:[%s8168_s25 + $0x10] sm:$0xff]   ;;  %v12096_v48 = vld [vmem:[%s8168_s25 + $0x20] sm:$0xff]   ;;  %v6364_v28 = vsub.f32 %v11765_v7, %v12025_v58  ;;  %v6366_v12 = vsub.f32 %v11763_v14, %v12025_v58  ;;  %v6367_v41 = vsub.f32 %v11787_v26, %v12025_v58 }
 0x47c   : > { %v6369_v45 = vsub.f32 %v11797_v30, %v12025_v58  ;;  %v6370_v10 = vsub.f32 %v11807_v13, %v12025_v58  ;;  %v13799_v30 = vsub.f32 %v11831_v36, %v12025_v58  ;;  %v13800_v13 = vsub.f32 %v11853_v29, %v12025_v58 }
 0x47d   : > { %v6324_v62 = vmax.f32 %v6323_v34, 0.0  ;;  %v6365_v34 = vsub.f32 %v11753_v19, %v12025_v58  ;;  %v13803_v9 = vsub.f32 %v11875_v51, %v12025_v58  ;;  %v13804_v36 = vsub.f32 %v11897_v42, %v12025_v58 }
 0x47e   : > { %v13805_v29 = vsub.f32 %v11885_v60, %v12025_v58  ;;  %v13808_v51 = vsub.f32 %v11937_v27, %v12025_v58  ;;  %v13809_v42 = vsub.f32 %v11925_v18, %v12025_v58  ;;  %v13810_v60 = vsub.f32 %v11935_v2, %v12025_v58 }
 0x47f   : > { %v6325_v11 = vadd.f32 1e-05, %v6324_v62  ;;  %v12101_v62 = vld [vmem:[%s8168_s25 + $0x28] sm:$0xff]   ;;  %v13813_v27 = vsub.f32 %v11964_v8, %v12025_v58  ;;  %v13814_v18 = vsub.f32 %v11972_v17, %v12025_v58  ;;  %v13815_v2 = vsub.f32 %v11992_v38, %v12025_v58 }
 0x480   : > { %v13818_v8 = vsub.f32 %v12005_v20, %v12025_v58  ;;  %v13819_v17 = vunpack.c.l.bf16 %v12077_v43 }
 0x481   : > { %8080 = vrsqrt.f32 %v6325_v11  ;;  %v12087_v11 = vld [vmem:[%s8168_s25 + $0x70] sm:$0xff]  }
 0x482   : > { %13797 = vst [vmem:[#allocation33_spill] sm:$0xff] %v12087_v11 }
 0x48e   : > { %v8081_v37 = vpop.eup %8080 }
 0x48f   : > { %v6391_v32 = vmul.f32 %v8081_v37, %v6359_v56  ;;  %v6392_v39 = vmul.f32 %v8081_v37, %v6360_v47  ;;  %v6393_v35 = vmul.f32 %v8081_v37, %v6361_v52  ;;  %v6394_v7 = vmul.f32 %v8081_v37, %v6362_v22 }
 0x490   : > { %v6395_v33 = vmul.f32 %v8081_v37, %v6363_v57  ;;  %v6396_v54 = vmul.f32 %v8081_v37, %v6364_v28  ;;  %v6397_v19 = vmul.f32 %v8081_v37, %v6365_v34  ;;  %v6398_v50 = vmul.f32 %v8081_v37, %v6366_v12 }
 0x491   : > { %v6399_v40 = vmul.f32 %v8081_v37, %v6367_v41  ;;  %v6400_v14 = vmul.f32 %v8081_v37, %v6368_v24  ;;  %v6401_v26 = vmul.f32 %v8081_v37, %v6369_v45  ;;  %v6402_v23 = vmul.f32 %v8081_v37, %v6370_v10 }
 0x492   : > { %v6403_v11 = vmul.f32 %v8081_v37, %v13799_v30  ;;  %v6404_v56 = vmul.f32 %v8081_v37, %v13800_v13  ;;  %v13801_v52 = vsub.f32 %v11841_v16, %v12025_v58  ;;  %v13802_v22 = vsub.f32 %v11851_v49, %v12025_v58 }
 0x493   : > { %v6407_v24 = vmul.f32 %v8081_v37, %v13803_v9  ;;  %v6408_v57 = vmul.f32 %v8081_v37, %v13804_v36  ;;  %v6409_v34 = vmul.f32 %v8081_v37, %v13805_v29  ;;  %v13806_v16 = vsub.f32 %v11895_v44, %v12025_v58 }
 0x494   : > { %v6405_v28 = vmul.f32 %v8081_v37, %v13801_v52  ;;  %v6406_v47 = vmul.f32 %v8081_v37, %v13802_v22  ;;  %v13807_v49 = vsub.f32 %v11917_v53, %v12025_v58  ;;  %v6412_v45 = vmul.f32 %v8081_v37, %v13808_v51 }
 0x495   : > { %v6410_v12 = vmul.f32 %v8081_v37, %v13806_v16  ;;  %v6413_v10 = vmul.f32 %v8081_v37, %v13809_v42  ;;  %v6414_v30 = vmul.f32 %v8081_v37, %v13810_v60  ;;  %v13811_v44 = vsub.f32 %v11957_v1, %v12025_v58 }
 0x496   : > { %v6411_v41 = vmul.f32 %v8081_v37, %v13807_v49  ;;  %v13812_v53 = vsub.f32 %v11974_v0, %v12025_v58  ;;  %v6417_v22 = vmul.f32 %v8081_v37, %v13813_v27  ;;  %v6418_v9 = vmul.f32 %v8081_v37, %v13814_v18 }
 0x497   : > { %v6415_v13 = vmul.f32 %v8081_v37, %v13811_v44  ;;  %v6419_v36 = vmul.f32 %v8081_v37, %v13815_v2  ;;  %v13816_v1 = vsub.f32 %v12007_v4, %v12025_v58  ;;  %v13817_v0 = vsub.f32 %v11998_v63, %v12025_v58 }
 0x498   : > { %v6416_v52 = vmul.f32 %v8081_v37, %v13812_v53  ;;  %v6422_v49 = vmul.f32 %v8081_v37, %v13818_v8  ;;  %v6423_v51 = vadd.f32 %v6391_v32, %v13819_v17  ;;  %v13820_v42 = vunpack.c.h.bf16 %v12077_v43 }
 0x499   : > { %v6420_v29 = vmul.f32 %v8081_v37, %v13816_v1  ;;  %v6421_v16 = vmul.f32 %v8081_v37, %v13817_v0  ;;  %v13821_v60 = vunpack.c.l.bf16 %v12072_v25  ;;  %v13822_v4 = vunpack.c.h.bf16 %v12072_v25 }
 0x49a   : > { %v6424_v38 = vadd.f32 %v6392_v39, %v13820_v42  ;;  %v13823_v63 = vunpack.c.l.bf16 %v12082_v46  ;;  %v13824_v18 = vunpack.c.h.bf16 %v12082_v46  ;;  %v13825_v58 = vunpack.c.l.bf16 %v12091_v3 }
 0x49b   : > { %v6425_v44 = vadd.f32 %v6393_v35, %v13821_v60  ;;  %v6426_v53 = vadd.f32 %v6394_v7, %v13822_v4  ;;  %v13826_v32 = vunpack.c.h.bf16 %v12091_v3  ;;  %v13827_v39 = vunpack.c.l.bf16 %v12096_v48 }
 0x49c   : > { %v6427_v27 = vadd.f32 %v6395_v33, %v13823_v63  ;;  %v6428_v20 = vadd.f32 %v6396_v54, %v13824_v18  ;;  %v6429_v37 = vadd.f32 %v6397_v19, %v13825_v58  ;;  %v13828_v35 = vunpack.c.h.bf16 %v12096_v48 }
 0x49d   : > { %v6430_v2 = vadd.f32 %v6398_v50, %v13826_v32  ;;  %v6431_v43 = vadd.f32 %v6399_v40, %v13827_v39  ;;  %v13829_v25 = vunpack.c.l.bf16 %v12101_v62  ;;  %v13830_v33 = vunpack.c.h.bf16 %v12101_v62 }
 0x49e   : > { %v6432_v1 = vadd.f32 %v6400_v14, %v13828_v35  ;;  %v13831_v54 = vunpack.c.l.bf16 %v12106_v59  ;;  %v13832_v19 = vunpack.c.h.bf16 %v12106_v59  ;;  %v13833_v50 = vunpack.c.l.bf16 %v12111_v55 }
 0x49f   : > { %v6433_v7 = vadd.f32 %v6401_v26, %v13829_v25  ;;  %v6434_v0 = vadd.f32 %v6402_v23, %v13830_v33  ;;  %v13834_v40 = vunpack.c.h.bf16 %v12111_v55  ;;  %v13835_v14 = vunpack.c.l.bf16 %v12116_v21 }
 0x4a0   : > { %v6435_v46 = vadd.f32 %v6403_v11, %v13831_v54  ;;  %v6436_v3 = vadd.f32 %v6404_v56, %v13832_v19  ;;  %v6437_v8 = vadd.f32 %v6405_v28, %v13833_v50  ;;  %v13836_v26 = vunpack.c.h.bf16 %v12116_v21 }
 0x4a1   : > { %v6438_v48 = vadd.f32 %v6406_v47, %v13834_v40  ;;  %v6439_v17 = vadd.f32 %v6407_v24, %v13835_v14  ;;  %v13837_v23 = vunpack.c.l.bf16 %v12121_v5  ;;  %v13838_v11 = vunpack.c.h.bf16 %v12121_v5 }
 0x4a2   : > { %v6440_v62 = vadd.f32 %v6408_v57, %v13836_v26  ;;  %v13839_v56 = vunpack.c.l.bf16 %v12126_v61  ;;  %v13840_v28 = vunpack.c.h.bf16 %v12126_v61  ;;  %v13841_v47 = vunpack.c.l.bf16 %v12131_v31 }
 0x4a3   : > { %v6441_v42 = vadd.f32 %v6409_v34, %v13837_v23  ;;  %v6442_v59 = vadd.f32 %v6410_v12, %v13838_v11  ;;  %v13842_v21 = vunpack.c.h.bf16 %v12131_v31  ;;  %v13843_v34 = vunpack.c.l.bf16 %v12136_v15  ;;  %v13847_v31 = vld [vmem:[#allocation33_spill] sm:$0xff] }
 0x4a4   : > { %v12278_v60 = vadd.f32 %v6411_v41, %v13839_v56  ;;  %v12282_v55 = vadd.f32 %v6412_v45, %v13840_v28  ;;  %v12286_v24 = vadd.f32 %v6413_v10, %v13841_v47  ;;  %v13844_v12 = vunpack.c.h.bf16 %v12136_v15 }
 0x4a5   : > { %v12290_v57 = vadd.f32 %v6414_v30, %v13842_v21  ;;  %v12294_v5 = vadd.f32 %v6415_v13, %v13843_v34  ;;  %v13845_v61 = vunpack.c.l.bf16 %v12141_v6  ;;  %v13846_v4 = vunpack.c.h.bf16 %v12141_v6 }
 0x4a6   : > { %v12298_v41 = vadd.f32 %v6416_v52, %v13844_v12  ;;  %v13848_v30 = vunpack.c.l.bf16 %v13847_v31  ;;  %v13849_v15 = vunpack.c.h.bf16 %v13847_v31  ;;  %v7068_v58 = vpack.c.bf16 %v6423_v51, %v6423_v51 }
 0x4a7   : > { %v12302_v45 = vadd.f32 %v6417_v22, %v13845_v61  ;;  %v12306_v10 = vadd.f32 %v6418_v9, %v13846_v4  ;;  %v13850_v22 = vld [vmem:[#allocation68_spill] sm:$0xff]  ;;  %v7069_v32 = vpack.c.bf16 %v6424_v38, %v6424_v38  ;;  %v7071_v39 = vpack.c.bf16 %v6426_v53, %v6426_v53 }
 0x4a8   : > { %v12317_v13 = vadd.f32 %v6419_v36, %v13848_v30  ;;  %v12321_v52 = vadd.f32 %v6420_v29, %v13849_v15  ;;  %v13851_v63 = vunpack.c.l.bf16 %v13850_v22  ;;  %v13852_v9 = vunpack.c.h.bf16 %v13850_v22  ;;  %6584 = vst.msk [vmem:[%s12313_s5] sm:$0xf] %vm6583_vm9, %v7068_v58 }
 0x4a9   : > { %v7070_v36 = vpack.c.bf16 %v6425_v44, %v6425_v44  ;;  %v7072_v35 = vpack.c.bf16 %v6427_v27, %v6427_v27  ;;  %v7073_v25 = vpack.c.bf16 %v6428_v20, %v6428_v20  ;;  %v7074_v29 = vpack.c.bf16 %v6429_v37, %v6429_v37  ;;  %6585 = vst.msk [vmem:[%s12313_s5 + $0x4] sm:$0xf] %vm6583_vm9, %v7069_v32 }
 0x4aa   : > { %v12325_v6 = vadd.f32 %v6421_v16, %v13851_v63  ;;  %v12329_v18 = vadd.f32 %v6422_v49, %v13852_v9  ;;  %v7075_v33 = vpack.c.bf16 %v6430_v2, %v6430_v2  ;;  %v7076_v16 = vpack.c.bf16 %v6431_v43, %v6431_v43  ;;  %6587 = vst.msk [vmem:[%s12313_s5 + $0xc] sm:$0xf] %vm6583_vm9, %v7071_v39 }
 0x4ab   : > { %v7077_v54 = vpack.c.bf16 %v6432_v1, %v6432_v1  ;;  %v7078_v19 = vpack.c.bf16 %v6433_v7, %v6433_v7  ;;  %v7079_v50 = vpack.c.bf16 %v6434_v0, %v6434_v0  ;;  %6586 = vst.msk [vmem:[%s12313_s5 + $0x8] sm:$0xf] %vm6583_vm9, %v7070_v36  ;;  %v7080_v49 = vpack.c.bf16 %v6435_v46, %v6435_v46 }
 0x4ac   : > { %v7081_v51 = vpack.c.bf16 %v6436_v3, %v6436_v3  ;;  %v7082_v38 = vpack.c.bf16 %v6437_v8, %v6437_v8  ;;  %v7083_v44 = vpack.c.bf16 %v6438_v48, %v6438_v48  ;;  %6588 = vst.msk [vmem:[%s12313_s5 + $0x10] sm:$0xf] %vm6583_vm9, %v7072_v35  ;;  %6589 = vst.msk [vmem:[%s12313_s5 + $0x14] sm:$0xf] %vm6583_vm9, %v7073_v25 }
 0x4ad   : > { %6590 = vst.msk [vmem:[%s12313_s5 + $0x18] sm:$0xf] %vm6583_vm9, %v7074_v29  ;;  %6591 = vst.msk [vmem:[%s12313_s5 + $0x1c] sm:$0xf] %vm6583_vm9, %v7075_v33  ;;  %v7084_v53 = vpack.c.bf16 %v6439_v17, %v6439_v17  ;;  %v7085_v27 = vpack.c.bf16 %v6440_v62, %v6440_v62  ;;  %v7086_v20 = vpack.c.bf16 %v6441_v42, %v6441_v42 }
 0x4ae   : > { %v7087_v37 = vpack.c.bf16 %v6442_v59, %v6442_v59  ;;  %6592 = vst.msk [vmem:[%s12313_s5 + $0x20] sm:$0xf] %vm6583_vm9, %v7076_v16  ;;  %6593 = vst.msk [vmem:[%s12313_s5 + $0x24] sm:$0xf] %vm6583_vm9, %v7077_v54  ;;  %v7088_v2 = vpack.c.bf16 %v12278_v60, %v12278_v60  ;;  %v7089_v43 = vpack.c.bf16 %v12282_v55, %v12282_v55 }
 0x4af   : > { %6594 = vst.msk [vmem:[%s12313_s5 + $0x28] sm:$0xf] %vm6583_vm9, %v7078_v19  ;;  %6595 = vst.msk [vmem:[%s12313_s5 + $0x2c] sm:$0xf] %vm6583_vm9, %v7079_v50  ;;  %v7090_v1 = vpack.c.bf16 %v12286_v24, %v12286_v24  ;;  %v7091_v7 = vpack.c.bf16 %v12290_v57, %v12290_v57  ;;  %v7092_v0 = vpack.c.bf16 %v12294_v5, %v12294_v5 }
 0x4b0   : > { %6596 = vst.msk [vmem:[%s12313_s5 + $0x30] sm:$0xf] %vm6583_vm9, %v7080_v49  ;;  %6597 = vst.msk [vmem:[%s12313_s5 + $0x34] sm:$0xf] %vm6583_vm9, %v7081_v51  ;;  %v7093_v46 = vpack.c.bf16 %v12298_v41, %v12298_v41  ;;  %v7094_v3 = vpack.c.bf16 %v12302_v45, %v12302_v45  ;;  %v7095_v8 = vpack.c.bf16 %v12306_v10, %v12306_v10 }
 0x4b1   : > { %6598 = vst.msk [vmem:[%s12313_s5 + $0x38] sm:$0xf] %vm6583_vm9, %v7082_v38  ;;  %6599 = vst.msk [vmem:[%s12313_s5 + $0x3c] sm:$0xf] %vm6583_vm9, %v7083_v44  ;;  %v7096_v40 = vpack.c.bf16 %v12317_v13, %v12317_v13  ;;  %v7097_v48 = vpack.c.bf16 %v12321_v52, %v12321_v52  ;;  %v7098_v14 = vpack.c.bf16 %v12325_v6, %v12325_v6 }
 0x4b2   : > { %6600 = vst.msk [vmem:[%s12313_s5 + $0x40] sm:$0xf] %vm6583_vm9, %v7084_v53  ;;  %6601 = vst.msk [vmem:[%s12313_s5 + $0x44] sm:$0xf] %vm6583_vm9, %v7085_v27  ;;  %v7099_v17 = vpack.c.bf16 %v12329_v18, %v12329_v18 }
 0x4b3   : > { %6602 = vst.msk [vmem:[%s12313_s5 + $0x48] sm:$0xf] %vm6583_vm9, %v7086_v20  ;;  %6603 = vst.msk [vmem:[%s12313_s5 + $0x4c] sm:$0xf] %vm6583_vm9, %v7087_v37 }
 0x4b4   : > { %6604 = vst.msk [vmem:[%s12313_s5 + $0x50] sm:$0xf] %vm6583_vm9, %v7088_v2  ;;  %6605 = vst.msk [vmem:[%s12313_s5 + $0x54] sm:$0xf] %vm6583_vm9, %v7089_v43 }
 0x4b5   : > { %6606 = vst.msk [vmem:[%s12313_s5 + $0x58] sm:$0xf] %vm6583_vm9, %v7090_v1  ;;  %6607 = vst.msk [vmem:[%s12313_s5 + $0x5c] sm:$0xf] %vm6583_vm9, %v7091_v7 }
 0x4b6   : > { %6608 = vst.msk [vmem:[%s12313_s5 + $0x60] sm:$0xf] %vm6583_vm9, %v7092_v0  ;;  %6609 = vst.msk [vmem:[%s12313_s5 + $0x64] sm:$0xf] %vm6583_vm9, %v7093_v46 }
 0x4b7   : > { %6610 = vst.msk [vmem:[%s12313_s5 + $0x68] sm:$0xf] %vm6583_vm9, %v7094_v3  ;;  %6611 = vst.msk [vmem:[%s12313_s5 + $0x6c] sm:$0xf] %vm6583_vm9, %v7095_v8 }
 0x4b8   : > { %6612 = vst.msk [vmem:[%s12313_s5 + $0x70] sm:$0xf] %vm6583_vm9, %v7096_v40  ;;  %6613 = vst.msk [vmem:[%s12313_s5 + $0x74] sm:$0xf] %vm6583_vm9, %v7097_v48 }
 0x4b9   : > { %6614 = vst.msk [vmem:[%s12313_s5 + $0x78] sm:$0xf] %vm6583_vm9, %v7098_v14  ;;  %6615 = vst.msk [vmem:[%s12313_s5 + $0x7c] sm:$0xf] %vm6583_vm9, %v7099_v17 }
 0x4ba PF: > { %s13_s12 = sadd.s32 1, %s8104_s12  }
 0x4bb   : > { %p10_p4 = scmp.ge.s32.totalorder %s13_s12, 4  }
 0x4bd   :  { %12 = sbr.rel (!%p10_p4) target bundleno = 1 (0x1), region = 78 }

</bundles_post_ra>
